<compile_context>
chip_gen: v6e
topology: v6e:2x2x1
jax: 0.10.0
libtpu: 0.0.40
codegen_flags: <defaults>
</compile_context>

<pallas_src>
import functools

import jax
import jax.numpy as jnp
from jax import lax
from jax.experimental import pallas as pl
from jax.experimental.pallas import tpu as pltpu

LANE = 128


def _round_up(x, m):
    return (x + m - 1) // m * m


def _choose_tile_h(H, W, Ci, Cm, Co, budget_bytes=16 * 2**20):
    """Largest divisor of H whose per-step buffers fit `budget_bytes`.

    Capped at H // 2 (for H >= 16) so the strip axis contributes extra pipeline
    steps / megacore parallelism even at batch 1.  The budget keeps the
    double-buffered blocks well under v7x's 64 MiB VMEM.
    """
    def step_bytes(th):
        return (2 * (th + 4) * (W + 2) * Ci * 2      # bf16 input strip, 2 buffers
                + 2 * th * W * Co * 2                # bf16 output strip, 2 buffers
                + (th + 2) * (W + 2) * Cm * 2        # bf16 mid scratch
                + (th + 2) * W * Cm * 4              # f32 conv1 accumulator
                + th * W * Co * 4)                   # f32 conv2 accumulator

    cap = H // 2 if H >= 16 else H
    best = 1
    for th in range(1, H + 1):
        if H % th == 0 and th <= cap and step_bytes(th) <= budget_bytes:
            best = th
    return best


def _double_conv_kernel(x_ref, w1_ref, b1_ref, w2_ref, b2_ref, o_ref, mid_ref):
    # x_ref:  (1, TH+4, W+2, Ci)  bf16 strip of the spatially pre-padded input
    # w1_ref: (3, 3, Ci, Cm) bf16 ; b1_ref: (1, Cm) f32
    # w2_ref: (3, 3, Cm, Co) bf16 ; b2_ref: (1, Co) f32
    # o_ref:  (1, TH, W, Co) bf16 output strip
    # mid_ref:(TH+2, W+2, Cm) bf16 scratch: conv1 activation strip + 1-px halo
    TH = o_ref.shape[1]
    W = o_ref.shape[2]
    Ci = x_ref.shape[3]
    Cm = w1_ref.shape[3]
    Co = w2_ref.shape[3]
    Hm = TH + 2   # mid rows computed this strip (output rows + 1 halo row each side)

    # ---- conv1: 9 accumulating MXU dots (3 dy x 3 dx), f32 accumulation ----
    acc1 = jnp.zeros((Hm * W, Cm), jnp.float32)
    for dy in range(3):
        for dx in range(3):
            slab = x_ref[0, dy:dy + Hm, dx:dx + W, :]            # (Hm, W, Ci)
            acc1 = acc1 + jnp.dot(slab.reshape(Hm * W, Ci), w1_ref[dy, dx],
                                  preferred_element_type=jnp.float32)
    act1 = jnp.maximum(acc1 + b1_ref[...], 0.0).reshape(Hm, W, Cm)

    # Mid rows that fall outside the image are conv2's zero padding (NOT conv1
    # applied to the extra input padding) -> zero them with one vselect.  Done
    # unconditionally every step; no pl.when(program_id == 0), so correctness
    # holds under "parallel" core sharding.
    s = pl.program_id(1)
    h_total = pl.num_programs(1) * TH
    row = lax.broadcasted_iota(jnp.int32, (Hm, 1, 1), 0)
    g_mid = s * TH - 1 + row
    act1 = jnp.where(jnp.logical_and(g_mid >= 0, g_mid < h_total), act1, 0.0)

    # One full-width lane-dense store: left/right zero halo columns are
    # register-padded into the interior write (no width-1 masked column stores).
    act1 = act1.astype(mid_ref.dtype)
    zcol = jnp.zeros((Hm, 1, Cm), mid_ref.dtype)
    mid_ref[...] = jnp.concatenate([zcol, act1, zcol], axis=1)

    # ---- conv2: 9 accumulating MXU dots over the mid strip ----
    acc2 = jnp.zeros((TH * W, Co), jnp.float32)
    for dy in range(3):
        for dx in range(3):
            slab = mid_ref[dy:dy + TH, dx:dx + W, :]             # (TH, W, Cm)
            acc2 = acc2 + jnp.dot(slab.reshape(TH * W, Cm), w2_ref[dy, dx],
                                  preferred_element_type=jnp.float32)
    act2 = jnp.maximum(acc2 + b2_ref[...], 0.0)
    o_ref[...] = act2.reshape(1, TH, W, Co).astype(o_ref.dtype)


def double_conv(x_nchw, w1, b1, w2, b2, *, compute_dtype=jnp.bfloat16):
    """x_nchw: (N, Cin, H, W); w1: (Cmid, Cin, 3, 3); w2: (Cout, Cmid, 3, 3)."""
    N, Cin, H, W = x_nchw.shape
    Cmid = w1.shape[0]
    Cout = w2.shape[0]
    Ci = _round_up(Cin, LANE)
    Cm = _round_up(Cmid, LANE)
    Co = _round_up(Cout, LANE)

    TH = _choose_tile_h(H, W, Ci, Cm, Co)
    S = H // TH

    # NCHW -> NHWC; pad H by 2 (fused 2-conv halo), W by 1, channels to a
    # lane-dense multiple of 128 (extra channels are zero -> no contribution).
    x = jnp.transpose(x_nchw, (0, 2, 3, 1))
    xp = jnp.pad(x, ((0, 0), (2, 2), (1, 1), (0, Ci - Cin))).astype(compute_dtype)
    # Overlapping H strips (TH + 4 rows at stride TH), flattened to one axis.
    x_strips = jnp.stack(
        [xp[:, st * TH:st * TH + TH + 4] for st in range(S)], axis=1
    ).reshape(N * S, TH + 4, W + 2, Ci)

    # (Cout, Cin, kh, kw) -> (kh, kw, Cin, Cout), channel-padded, bf16.
    w1t = jnp.pad(jnp.transpose(w1, (2, 3, 1, 0)),
                  ((0, 0), (0, 0), (0, Ci - Cin), (0, Cm - Cmid))).astype(compute_dtype)
    w2t = jnp.pad(jnp.transpose(w2, (2, 3, 1, 0)),
                  ((0, 0), (0, 0), (0, Cm - Cmid), (0, Co - Cout))).astype(compute_dtype)
    b1r = jnp.pad(b1, (0, Cm - Cmid)).reshape(1, Cm).astype(jnp.float32)
    b2r = jnp.pad(b2, (0, Co - Cout)).reshape(1, Co).astype(jnp.float32)

    # Scoped-VMEM limit: defaults are only 16 MiB (v5e) / 32 MiB (v6e/v7x);
    # cap at 64 MiB so the request is valid on v7x.
    bpe = jnp.dtype(compute_dtype).itemsize
    step_bytes = (2 * (TH + 4) * (W + 2) * Ci * bpe
                  + 2 * TH * W * Co * bpe
                  + (TH + 2) * (W + 2) * Cm * bpe
                  + 9 * (Ci * Cm + Cm * Co) * bpe
                  + (TH + 2) * W * Cm * 4 + TH * W * Co * 4)
    vmem_limit = int(min(64 * 2**20, max(32 * 2**20, 2 * step_bytes)))

    cost = pl.CostEstimate(
        flops=2 * N * H * W * 9 * (Cin * Cmid + Cmid * Cout),
        transcendentals=0,
        bytes_accessed=int(x_strips.size * bpe + w1t.size * bpe + w2t.size * bpe
                           + (b1r.size + b2r.size) * 4 + N * H * W * Co * bpe))

    # Constant-index operands (weights / biases): single pipeline buffer.
    const_spec = functools.partial(pl.BlockSpec, pipeline_mode=pl.Buffered(1))

    out_nhwc = pl.pallas_call(
        _double_conv_kernel,
        out_shape=jax.ShapeDtypeStruct((N, H, W, Co), compute_dtype),
        grid_spec=pltpu.PrefetchScalarGridSpec(
            num_scalar_prefetch=0,
            grid=(N, S),
            in_specs=[
                pl.BlockSpec((1, TH + 4, W + 2, Ci),
                             lambda n, st: (n * S + st, 0, 0, 0)),
                const_spec((3, 3, Ci, Cm), lambda n, st: (0, 0, 0, 0)),
                const_spec((1, Cm), lambda n, st: (0, 0)),
                const_spec((3, 3, Cm, Co), lambda n, st: (0, 0, 0, 0)),
                const_spec((1, Co), lambda n, st: (0, 0)),
            ],
            out_specs=pl.BlockSpec((1, TH, W, Co), lambda n, st: (n, st, 0, 0)),
            scratch_shapes=[pltpu.VMEM((TH + 2, W + 2, Cm), compute_dtype)],
        ),
        compiler_params=pltpu.CompilerParams(
            dimension_semantics=("parallel", "parallel"),
            vmem_limit_bytes=vmem_limit),
        cost_estimate=cost,
    )(x_strips, w1t, b1r, w2t, b2r)

    # Drop channel padding; back to NCHW f32 for the PyTorch-facing API.
    # TODO(synk): keep NHWC (and bf16) end-to-end if the surrounding model
    #             allows, dropping this slice + transpose HBM round trip.
    return jnp.transpose(out_nhwc[..., :Cout].astype(jnp.float32), (0, 3, 1, 2))


def _reference_double_conv(x_nchw, w1, b1, w2, b2):
    """Pure-JAX reference (mirrors PyTorch Conv2d(k=3, pad=1) + ReLU, twice)."""
    dn = ("NCHW", "OIHW", "NCHW")
    y = lax.conv_general_dilated(x_nchw, w1, (1, 1), ((1, 1), (1, 1)),
                                 dimension_numbers=dn)
    y = jnp.maximum(y + b1[None, :, None, None], 0.0)
    y = lax.conv_general_dilated(y, w2, (1, 1), ((1, 1), (1, 1)),
                                 dimension_numbers=dn)
    y = jnp.maximum(y + b2[None, :, None, None], 0.0)
    return y


if __name__ == "__main__":
    # Small, deterministic synthetic setup: N=2, Cin=4, Cout=8, H=W=16.
    # (H=16 -> TILE_H=8 -> 2 strips: exercises the strip-boundary halo path.)
    N, Cin, Cout, H, W = 2, 4, 8, 16, 16
    key = jax.random.PRNGKey(0)
    kx, kw1, kb1, kw2, kb2 = jax.random.split(key, 5)

    x = jax.random.normal(kx, (N, Cin, H, W), dtype=jnp.float32)
    w1 = 0.1 * jax.random.normal(kw1, (Cout, Cin, 3, 3), dtype=jnp.float32)
    b1 = 0.1 * jax.random.normal(kb1, (Cout,), dtype=jnp.float32)
    w2 = 0.1 * jax.random.normal(kw2, (Cout, Cout, 3, 3), dtype=jnp.float32)
    b2 = 0.1 * jax.random.normal(kb2, (Cout,), dtype=jnp.float32)

    out = double_conv(x, w1, b1, w2, b2)
    out = jax.block_until_ready(out)

    ref = _reference_double_conv(x, w1, b1, w2, b2)
    assert out.shape == (N, Cout, H, W)
    # bf16 MXU operands / bf16 inter-conv activation / bf16 output -> loose tol.
    assert jnp.allclose(out, ref, atol=5e-2, rtol=5e-2), float(
        jnp.max(jnp.abs(out - ref)))

    print("KERNEL_OK")
</pallas_src>

<mosaic_0001>
module attributes {stable_mosaic.version = 11 : i64} {
  func.func @_double_conv_kernel(%arg0: i32, %arg1: i32, %arg2: memref<1x12x18x128xbf16, #tpu.memory_space<vmem>>, %arg3: memref<3x3x128x128xbf16, #tpu.memory_space<vmem>>, %arg4: memref<1x128xf32, #tpu.memory_space<vmem>>, %arg5: memref<3x3x128x128xbf16, #tpu.memory_space<vmem>>, %arg6: memref<1x128xf32, #tpu.memory_space<vmem>>, %arg7: memref<1x8x16x128xbf16, #tpu.memory_space<vmem>>, %arg8: memref<10x18x128xbf16, #tpu.memory_space<vmem>>) attributes {dimension_semantics = [#tpu.dimension_semantics<parallel>, #tpu.dimension_semantics<parallel>], iteration_bounds = array<i64: 2, 2>, scalar_prefetch = 0 : i64, scratch_operands = 1 : i64, tpu.core_type = #tpu.core_type<tc>, window_params = [{transform_indices = @transform_0, window_bounds = array<i64: 1, 12, 18, 128>}, {pipeline_mode = #tpu.pipeline_mode<synchronous>, transform_indices = @transform_1, window_bounds = array<i64: 3, 3, 128, 128>}, {pipeline_mode = #tpu.pipeline_mode<synchronous>, transform_indices = @transform_2, window_bounds = array<i64: 1, 128>}, {pipeline_mode = #tpu.pipeline_mode<synchronous>, transform_indices = @transform_3, window_bounds = array<i64: 3, 3, 128, 128>}, {pipeline_mode = #tpu.pipeline_mode<synchronous>, transform_indices = @transform_4, window_bounds = array<i64: 1, 128>}, {transform_indices = @transform_5, window_bounds = array<i64: 1, 8, 16, 128>}]} {
    %cst = arith.constant 0.000000e+00 : f32
    %0 = vector.broadcast %cst : f32 to vector<160x128xf32>
    %c0 = arith.constant 0 : index
    %c0_0 = arith.constant 0 : index
    %c0_1 = arith.constant 0 : index
    %c0_2 = arith.constant 0 : index
    %1 = vector.load %arg2[%c0, %c0_0, %c0_1, %c0_2] : memref<1x12x18x128xbf16, #tpu.memory_space<vmem>>, vector<1x10x16x128xbf16>
    %2 = vector.shape_cast %1 : vector<1x10x16x128xbf16> to vector<10x16x128xbf16>
    %3 = vector.shape_cast %2 : vector<10x16x128xbf16> to vector<160x128xbf16>
    %c0_3 = arith.constant 0 : index
    %c0_4 = arith.constant 0 : index
    %c0_5 = arith.constant 0 : index
    %c0_6 = arith.constant 0 : index
    %4 = vector.load %arg3[%c0_3, %c0_4, %c0_5, %c0_6] : memref<3x3x128x128xbf16, #tpu.memory_space<vmem>>, vector<1x1x128x128xbf16>
    %5 = vector.shape_cast %4 : vector<1x1x128x128xbf16> to vector<128x128xbf16>
    %cst_7 = arith.constant dense<0.000000e+00> : vector<160x128xf32>
    %6 = tpu.matmul %3, %5, %cst_7 {dimension_numbers = #tpu.dot_dimension_numbers<[1], [0], [0], [1], [0, 0, 1, 1], [], []>} : vector<160x128xbf16>, vector<128x128xbf16>, vector<160x128xf32> -> vector<160x128xf32>
    %7 = arith.addf %0, %6 : vector<160x128xf32>
    %c0_8 = arith.constant 0 : index
    %c0_9 = arith.constant 0 : index
    %c1 = arith.constant 1 : index
    %c0_10 = arith.constant 0 : index
    %8 = vector.load %arg2[%c0_8, %c0_9, %c1, %c0_10] : memref<1x12x18x128xbf16, #tpu.memory_space<vmem>>, vector<1x10x16x128xbf16>
    %9 = vector.shape_cast %8 : vector<1x10x16x128xbf16> to vector<10x16x128xbf16>
    %10 = vector.shape_cast %9 : vector<10x16x128xbf16> to vector<160x128xbf16>
    %c0_11 = arith.constant 0 : index
    %c1_12 = arith.constant 1 : index
    %c0_13 = arith.constant 0 : index
    %c0_14 = arith.constant 0 : index
    %11 = vector.load %arg3[%c0_11, %c1_12, %c0_13, %c0_14] : memref<3x3x128x128xbf16, #tpu.memory_space<vmem>>, vector<1x1x128x128xbf16>
    %12 = vector.shape_cast %11 : vector<1x1x128x128xbf16> to vector<128x128xbf16>
    %cst_15 = arith.constant dense<0.000000e+00> : vector<160x128xf32>
    %13 = tpu.matmul %10, %12, %cst_15 {dimension_numbers = #tpu.dot_dimension_numbers<[1], [0], [0], [1], [0, 0, 1, 1], [], []>} : vector<160x128xbf16>, vector<128x128xbf16>, vector<160x128xf32> -> vector<160x128xf32>
    %14 = arith.addf %7, %13 : vector<160x128xf32>
    %c0_16 = arith.constant 0 : index
    %c0_17 = arith.constant 0 : index
    %c2 = arith.constant 2 : index
    %c0_18 = arith.constant 0 : index
    %15 = vector.load %arg2[%c0_16, %c0_17, %c2, %c0_18] : memref<1x12x18x128xbf16, #tpu.memory_space<vmem>>, vector<1x10x16x128xbf16>
    %16 = vector.shape_cast %15 : vector<1x10x16x128xbf16> to vector<10x16x128xbf16>
    %17 = vector.shape_cast %16 : vector<10x16x128xbf16> to vector<160x128xbf16>
    %c0_19 = arith.constant 0 : index
    %c2_20 = arith.constant 2 : index
    %c0_21 = arith.constant 0 : index
    %c0_22 = arith.constant 0 : index
    %18 = vector.load %arg3[%c0_19, %c2_20, %c0_21, %c0_22] : memref<3x3x128x128xbf16, #tpu.memory_space<vmem>>, vector<1x1x128x128xbf16>
    %19 = vector.shape_cast %18 : vector<1x1x128x128xbf16> to vector<128x128xbf16>
    %cst_23 = arith.constant dense<0.000000e+00> : vector<160x128xf32>
    %20 = tpu.matmul %17, %19, %cst_23 {dimension_numbers = #tpu.dot_dimension_numbers<[1], [0], [0], [1], [0, 0, 1, 1], [], []>} : vector<160x128xbf16>, vector<128x128xbf16>, vector<160x128xf32> -> vector<160x128xf32>
    %21 = arith.addf %14, %20 : vector<160x128xf32>
    %c0_24 = arith.constant 0 : index
    %c1_25 = arith.constant 1 : index
    %c0_26 = arith.constant 0 : index
    %c0_27 = arith.constant 0 : index
    %22 = vector.load %arg2[%c0_24, %c1_25, %c0_26, %c0_27] : memref<1x12x18x128xbf16, #tpu.memory_space<vmem>>, vector<1x10x16x128xbf16>
    %23 = vector.shape_cast %22 : vector<1x10x16x128xbf16> to vector<10x16x128xbf16>
    %24 = vector.shape_cast %23 : vector<10x16x128xbf16> to vector<160x128xbf16>
    %c1_28 = arith.constant 1 : index
    %c0_29 = arith.constant 0 : index
    %c0_30 = arith.constant 0 : index
    %c0_31 = arith.constant 0 : index
    %25 = vector.load %arg3[%c1_28, %c0_29, %c0_30, %c0_31] : memref<3x3x128x128xbf16, #tpu.memory_space<vmem>>, vector<1x1x128x128xbf16>
    %26 = vector.shape_cast %25 : vector<1x1x128x128xbf16> to vector<128x128xbf16>
    %cst_32 = arith.constant dense<0.000000e+00> : vector<160x128xf32>
    %27 = tpu.matmul %24, %26, %cst_32 {dimension_numbers = #tpu.dot_dimension_numbers<[1], [0], [0], [1], [0, 0, 1, 1], [], []>} : vector<160x128xbf16>, vector<128x128xbf16>, vector<160x128xf32> -> vector<160x128xf32>
    %28 = arith.addf %21, %27 : vector<160x128xf32>
    %c0_33 = arith.constant 0 : index
    %c1_34 = arith.constant 1 : index
    %c1_35 = arith.constant 1 : index
    %c0_36 = arith.constant 0 : index
    %29 = vector.load %arg2[%c0_33, %c1_34, %c1_35, %c0_36] : memref<1x12x18x128xbf16, #tpu.memory_space<vmem>>, vector<1x10x16x128xbf16>
    %30 = vector.shape_cast %29 : vector<1x10x16x128xbf16> to vector<10x16x128xbf16>
    %31 = vector.shape_cast %30 : vector<10x16x128xbf16> to vector<160x128xbf16>
    %c1_37 = arith.constant 1 : index
    %c1_38 = arith.constant 1 : index
    %c0_39 = arith.constant 0 : index
    %c0_40 = arith.constant 0 : index
    %32 = vector.load %arg3[%c1_37, %c1_38, %c0_39, %c0_40] : memref<3x3x128x128xbf16, #tpu.memory_space<vmem>>, vector<1x1x128x128xbf16>
    %33 = vector.shape_cast %32 : vector<1x1x128x128xbf16> to vector<128x128xbf16>
    %cst_41 = arith.constant dense<0.000000e+00> : vector<160x128xf32>
    %34 = tpu.matmul %31, %33, %cst_41 {dimension_numbers = #tpu.dot_dimension_numbers<[1], [0], [0], [1], [0, 0, 1, 1], [], []>} : vector<160x128xbf16>, vector<128x128xbf16>, vector<160x128xf32> -> vector<160x128xf32>
    %35 = arith.addf %28, %34 : vector<160x128xf32>
    %c0_42 = arith.constant 0 : index
    %c1_43 = arith.constant 1 : index
    %c2_44 = arith.constant 2 : index
    %c0_45 = arith.constant 0 : index
    %36 = vector.load %arg2[%c0_42, %c1_43, %c2_44, %c0_45] : memref<1x12x18x128xbf16, #tpu.memory_space<vmem>>, vector<1x10x16x128xbf16>
    %37 = vector.shape_cast %36 : vector<1x10x16x128xbf16> to vector<10x16x128xbf16>
    %38 = vector.shape_cast %37 : vector<10x16x128xbf16> to vector<160x128xbf16>
    %c1_46 = arith.constant 1 : index
    %c2_47 = arith.constant 2 : index
    %c0_48 = arith.constant 0 : index
    %c0_49 = arith.constant 0 : index
    %39 = vector.load %arg3[%c1_46, %c2_47, %c0_48, %c0_49] : memref<3x3x128x128xbf16, #tpu.memory_space<vmem>>, vector<1x1x128x128xbf16>
    %40 = vector.shape_cast %39 : vector<1x1x128x128xbf16> to vector<128x128xbf16>
    %cst_50 = arith.constant dense<0.000000e+00> : vector<160x128xf32>
    %41 = tpu.matmul %38, %40, %cst_50 {dimension_numbers = #tpu.dot_dimension_numbers<[1], [0], [0], [1], [0, 0, 1, 1], [], []>} : vector<160x128xbf16>, vector<128x128xbf16>, vector<160x128xf32> -> vector<160x128xf32>
    %42 = arith.addf %35, %41 : vector<160x128xf32>
    %c0_51 = arith.constant 0 : index
    %c2_52 = arith.constant 2 : index
    %c0_53 = arith.constant 0 : index
    %c0_54 = arith.constant 0 : index
    %43 = vector.load %arg2[%c0_51, %c2_52, %c0_53, %c0_54] : memref<1x12x18x128xbf16, #tpu.memory_space<vmem>>, vector<1x10x16x128xbf16>
    %44 = vector.shape_cast %43 : vector<1x10x16x128xbf16> to vector<10x16x128xbf16>
    %45 = vector.shape_cast %44 : vector<10x16x128xbf16> to vector<160x128xbf16>
    %c2_55 = arith.constant 2 : index
    %c0_56 = arith.constant 0 : index
    %c0_57 = arith.constant 0 : index
    %c0_58 = arith.constant 0 : index
    %46 = vector.load %arg3[%c2_55, %c0_56, %c0_57, %c0_58] : memref<3x3x128x128xbf16, #tpu.memory_space<vmem>>, vector<1x1x128x128xbf16>
    %47 = vector.shape_cast %46 : vector<1x1x128x128xbf16> to vector<128x128xbf16>
    %cst_59 = arith.constant dense<0.000000e+00> : vector<160x128xf32>
    %48 = tpu.matmul %45, %47, %cst_59 {dimension_numbers = #tpu.dot_dimension_numbers<[1], [0], [0], [1], [0, 0, 1, 1], [], []>} : vector<160x128xbf16>, vector<128x128xbf16>, vector<160x128xf32> -> vector<160x128xf32>
    %49 = arith.addf %42, %48 : vector<160x128xf32>
    %c0_60 = arith.constant 0 : index
    %c2_61 = arith.constant 2 : index
    %c1_62 = arith.constant 1 : index
    %c0_63 = arith.constant 0 : index
    %50 = vector.load %arg2[%c0_60, %c2_61, %c1_62, %c0_63] : memref<1x12x18x128xbf16, #tpu.memory_space<vmem>>, vector<1x10x16x128xbf16>
    %51 = vector.shape_cast %50 : vector<1x10x16x128xbf16> to vector<10x16x128xbf16>
    %52 = vector.shape_cast %51 : vector<10x16x128xbf16> to vector<160x128xbf16>
    %c2_64 = arith.constant 2 : index
    %c1_65 = arith.constant 1 : index
    %c0_66 = arith.constant 0 : index
    %c0_67 = arith.constant 0 : index
    %53 = vector.load %arg3[%c2_64, %c1_65, %c0_66, %c0_67] : memref<3x3x128x128xbf16, #tpu.memory_space<vmem>>, vector<1x1x128x128xbf16>
    %54 = vector.shape_cast %53 : vector<1x1x128x128xbf16> to vector<128x128xbf16>
    %cst_68 = arith.constant dense<0.000000e+00> : vector<160x128xf32>
    %55 = tpu.matmul %52, %54, %cst_68 {dimension_numbers = #tpu.dot_dimension_numbers<[1], [0], [0], [1], [0, 0, 1, 1], [], []>} : vector<160x128xbf16>, vector<128x128xbf16>, vector<160x128xf32> -> vector<160x128xf32>
    %56 = arith.addf %49, %55 : vector<160x128xf32>
    %c0_69 = arith.constant 0 : index
    %c2_70 = arith.constant 2 : index
    %c2_71 = arith.constant 2 : index
    %c0_72 = arith.constant 0 : index
    %57 = vector.load %arg2[%c0_69, %c2_70, %c2_71, %c0_72] : memref<1x12x18x128xbf16, #tpu.memory_space<vmem>>, vector<1x10x16x128xbf16>
    %58 = vector.shape_cast %57 : vector<1x10x16x128xbf16> to vector<10x16x128xbf16>
    %59 = vector.shape_cast %58 : vector<10x16x128xbf16> to vector<160x128xbf16>
    %c2_73 = arith.constant 2 : index
    %c2_74 = arith.constant 2 : index
    %c0_75 = arith.constant 0 : index
    %c0_76 = arith.constant 0 : index
    %60 = vector.load %arg3[%c2_73, %c2_74, %c0_75, %c0_76] : memref<3x3x128x128xbf16, #tpu.memory_space<vmem>>, vector<1x1x128x128xbf16>
    %61 = vector.shape_cast %60 : vector<1x1x128x128xbf16> to vector<128x128xbf16>
    %cst_77 = arith.constant dense<0.000000e+00> : vector<160x128xf32>
    %62 = tpu.matmul %59, %61, %cst_77 {dimension_numbers = #tpu.dot_dimension_numbers<[1], [0], [0], [1], [0, 0, 1, 1], [], []>} : vector<160x128xbf16>, vector<128x128xbf16>, vector<160x128xf32> -> vector<160x128xf32>
    %63 = arith.addf %56, %62 : vector<160x128xf32>
    %c0_78 = arith.constant 0 : index
    %c0_79 = arith.constant 0 : index
    %64 = vector.load %arg4[%c0_78, %c0_79] : memref<1x128xf32, #tpu.memory_space<vmem>>, vector<1x128xf32>
    %65 = vector.broadcast %64 : vector<1x128xf32> to vector<160x128xf32>
    %66 = arith.addf %63, %65 : vector<160x128xf32>
    %cst_80 = arith.constant 0.000000e+00 : f32
    %67 = vector.broadcast %cst_80 : f32 to vector<160x128xf32>
    %68 = arith.maximumf %66, %67 : vector<160x128xf32>
    %69 = vector.shape_cast %68 : vector<160x128xf32> to vector<10x16x128xf32>
    %70 = tpu.iota {dimensions = array<i32: 0>} : vector<10x1x1xi32>
    %c8_i32 = arith.constant 8 : i32
    %71 = arith.muli %arg1, %c8_i32 : i32
    %c1_i32 = arith.constant 1 : i32
    %72 = arith.subi %71, %c1_i32 : i32
    %73 = vector.broadcast %72 : i32 to vector<10x1x1xi32>
    %74 = arith.addi %73, %70 : vector<10x1x1xi32>
    %c0_i32 = arith.constant 0 : i32
    %75 = vector.broadcast %c0_i32 : i32 to vector<10x1x1xi32>
    %76 = arith.cmpi sge, %74, %75 : vector<10x1x1xi32>
    %c16_i32 = arith.constant 16 : i32
    %77 = vector.broadcast %c16_i32 : i32 to vector<10x1x1xi32>
    %78 = arith.cmpi slt, %74, %77 : vector<10x1x1xi32>
    %79 = arith.andi %76, %78 : vector<10x1x1xi1>
    %cst_81 = arith.constant 0.000000e+00 : f32
    %80 = vector.shape_cast %79 : vector<10x1x1xi1> to vector<10x1x1xi1>
    %81 = vector.broadcast %80 : vector<10x1x1xi1> to vector<10x16x128xi1>
    %82 = vector.broadcast %cst_81 : f32 to vector<10x16x128xf32>
    %83 = arith.select %81, %69, %82 : vector<10x16x128xi1>, vector<10x16x128xf32>
    %84 = arith.truncf %83 : vector<10x16x128xf32> to vector<10x16x128xbf16>
    %cst_82 = arith.constant 0.000000e+00 : bf16
    %85 = vector.broadcast %cst_82 : bf16 to vector<10x1x128xbf16>
    %86 = tpu.concatenate %85, %84, %85 in 1 : vector<10x1x128xbf16>, vector<10x16x128xbf16>, vector<10x1x128xbf16> -> vector<10x18x128xbf16>
    %c0_83 = arith.constant 0 : index
    %c0_84 = arith.constant 0 : index
    %c0_85 = arith.constant 0 : index
    %87 = vector.load %arg8[%c0_83, %c0_84, %c0_85] : memref<10x18x128xbf16, #tpu.memory_space<vmem>>, vector<10x18x128xbf16>
    tpu.vector_store %arg8[%c0_83, %c0_84, %c0_85], %86 {strides = array<i32>} : memref<10x18x128xbf16, #tpu.memory_space<vmem>>, vector<10x18x128xbf16>,
    %cst_86 = arith.constant 0.000000e+00 : f32
    %88 = vector.broadcast %cst_86 : f32 to vector<128x128xf32>
    %c0_87 = arith.constant 0 : index
    %c0_88 = arith.constant 0 : index
    %c0_89 = arith.constant 0 : index
    %89 = vector.load %arg8[%c0_87, %c0_88, %c0_89] : memref<10x18x128xbf16, #tpu.memory_space<vmem>>, vector<8x16x128xbf16>
    %90 = vector.shape_cast %89 : vector<8x16x128xbf16> to vector<128x128xbf16>
    %c0_90 = arith.constant 0 : index
    %c0_91 = arith.constant 0 : index
    %c0_92 = arith.constant 0 : index
    %c0_93 = arith.constant 0 : index
    %91 = vector.load %arg5[%c0_90, %c0_91, %c0_92, %c0_93] : memref<3x3x128x128xbf16, #tpu.memory_space<vmem>>, vector<1x1x128x128xbf16>
    %92 = vector.shape_cast %91 : vector<1x1x128x128xbf16> to vector<128x128xbf16>
    %cst_94 = arith.constant dense<0.000000e+00> : vector<128x128xf32>
    %93 = tpu.matmul %90, %92, %cst_94 {dimension_numbers = #tpu.dot_dimension_numbers<[1], [0], [0], [1], [0, 0, 1, 1], [], []>} : vector<128x128xbf16>, vector<128x128xbf16>, vector<128x128xf32> -> vector<128x128xf32>
    %94 = arith.addf %88, %93 : vector<128x128xf32>
    %c0_95 = arith.constant 0 : index
    %c1_96 = arith.constant 1 : index
    %c0_97 = arith.constant 0 : index
    %95 = vector.load %arg8[%c0_95, %c1_96, %c0_97] : memref<10x18x128xbf16, #tpu.memory_space<vmem>>, vector<8x16x128xbf16>
    %96 = vector.shape_cast %95 : vector<8x16x128xbf16> to vector<128x128xbf16>
    %c0_98 = arith.constant 0 : index
    %c1_99 = arith.constant 1 : index
    %c0_100 = arith.constant 0 : index
    %c0_101 = arith.constant 0 : index
    %97 = vector.load %arg5[%c0_98, %c1_99, %c0_100, %c0_101] : memref<3x3x128x128xbf16, #tpu.memory_space<vmem>>, vector<1x1x128x128xbf16>
    %98 = vector.shape_cast %97 : vector<1x1x128x128xbf16> to vector<128x128xbf16>
    %cst_102 = arith.constant dense<0.000000e+00> : vector<128x128xf32>
    %99 = tpu.matmul %96, %98, %cst_102 {dimension_numbers = #tpu.dot_dimension_numbers<[1], [0], [0], [1], [0, 0, 1, 1], [], []>} : vector<128x128xbf16>, vector<128x128xbf16>, vector<128x128xf32> -> vector<128x128xf32>
    %100 = arith.addf %94, %99 : vector<128x128xf32>
    %c0_103 = arith.constant 0 : index
    %c2_104 = arith.constant 2 : index
    %c0_105 = arith.constant 0 : index
    %101 = vector.load %arg8[%c0_103, %c2_104, %c0_105] : memref<10x18x128xbf16, #tpu.memory_space<vmem>>, vector<8x16x128xbf16>
    %102 = vector.shape_cast %101 : vector<8x16x128xbf16> to vector<128x128xbf16>
    %c0_106 = arith.constant 0 : index
    %c2_107 = arith.constant 2 : index
    %c0_108 = arith.constant 0 : index
    %c0_109 = arith.constant 0 : index
    %103 = vector.load %arg5[%c0_106, %c2_107, %c0_108, %c0_109] : memref<3x3x128x128xbf16, #tpu.memory_space<vmem>>, vector<1x1x128x128xbf16>
    %104 = vector.shape_cast %103 : vector<1x1x128x128xbf16> to vector<128x128xbf16>
    %cst_110 = arith.constant dense<0.000000e+00> : vector<128x128xf32>
    %105 = tpu.matmul %102, %104, %cst_110 {dimension_numbers = #tpu.dot_dimension_numbers<[1], [0], [0], [1], [0, 0, 1, 1], [], []>} : vector<128x128xbf16>, vector<128x128xbf16>, vector<128x128xf32> -> vector<128x128xf32>
    %106 = arith.addf %100, %105 : vector<128x128xf32>
    %c1_111 = arith.constant 1 : index
    %c0_112 = arith.constant 0 : index
    %c0_113 = arith.constant 0 : index
    %107 = vector.load %arg8[%c1_111, %c0_112, %c0_113] : memref<10x18x128xbf16, #tpu.memory_space<vmem>>, vector<8x16x128xbf16>
    %108 = vector.shape_cast %107 : vector<8x16x128xbf16> to vector<128x128xbf16>
    %c1_114 = arith.constant 1 : index
    %c0_115 = arith.constant 0 : index
    %c0_116 = arith.constant 0 : index
    %c0_117 = arith.constant 0 : index
    %109 = vector.load %arg5[%c1_114, %c0_115, %c0_116, %c0_117] : memref<3x3x128x128xbf16, #tpu.memory_space<vmem>>, vector<1x1x128x128xbf16>
    %110 = vector.shape_cast %109 : vector<1x1x128x128xbf16> to vector<128x128xbf16>
    %cst_118 = arith.constant dense<0.000000e+00> : vector<128x128xf32>
    %111 = tpu.matmul %108, %110, %cst_118 {dimension_numbers = #tpu.dot_dimension_numbers<[1], [0], [0], [1], [0, 0, 1, 1], [], []>} : vector<128x128xbf16>, vector<128x128xbf16>, vector<128x128xf32> -> vector<128x128xf32>
    %112 = arith.addf %106, %111 : vector<128x128xf32>
    %c1_119 = arith.constant 1 : index
    %c1_120 = arith.constant 1 : index
    %c0_121 = arith.constant 0 : index
    %113 = vector.load %arg8[%c1_119, %c1_120, %c0_121] : memref<10x18x128xbf16, #tpu.memory_space<vmem>>, vector<8x16x128xbf16>
    %114 = vector.shape_cast %113 : vector<8x16x128xbf16> to vector<128x128xbf16>
    %c1_122 = arith.constant 1 : index
    %c1_123 = arith.constant 1 : index
    %c0_124 = arith.constant 0 : index
    %c0_125 = arith.constant 0 : index
    %115 = vector.load %arg5[%c1_122, %c1_123, %c0_124, %c0_125] : memref<3x3x128x128xbf16, #tpu.memory_space<vmem>>, vector<1x1x128x128xbf16>
    %116 = vector.shape_cast %115 : vector<1x1x128x128xbf16> to vector<128x128xbf16>
    %cst_126 = arith.constant dense<0.000000e+00> : vector<128x128xf32>
    %117 = tpu.matmul %114, %116, %cst_126 {dimension_numbers = #tpu.dot_dimension_numbers<[1], [0], [0], [1], [0, 0, 1, 1], [], []>} : vector<128x128xbf16>, vector<128x128xbf16>, vector<128x128xf32> -> vector<128x128xf32>
    %118 = arith.addf %112, %117 : vector<128x128xf32>
    %c1_127 = arith.constant 1 : index
    %c2_128 = arith.constant 2 : index
    %c0_129 = arith.constant 0 : index
    %119 = vector.load %arg8[%c1_127, %c2_128, %c0_129] : memref<10x18x128xbf16, #tpu.memory_space<vmem>>, vector<8x16x128xbf16>
    %120 = vector.shape_cast %119 : vector<8x16x128xbf16> to vector<128x128xbf16>
    %c1_130 = arith.constant 1 : index
    %c2_131 = arith.constant 2 : index
    %c0_132 = arith.constant 0 : index
    %c0_133 = arith.constant 0 : index
    %121 = vector.load %arg5[%c1_130, %c2_131, %c0_132, %c0_133] : memref<3x3x128x128xbf16, #tpu.memory_space<vmem>>, vector<1x1x128x128xbf16>
    %122 = vector.shape_cast %121 : vector<1x1x128x128xbf16> to vector<128x128xbf16>
    %cst_134 = arith.constant dense<0.000000e+00> : vector<128x128xf32>
    %123 = tpu.matmul %120, %122, %cst_134 {dimension_numbers = #tpu.dot_dimension_numbers<[1], [0], [0], [1], [0, 0, 1, 1], [], []>} : vector<128x128xbf16>, vector<128x128xbf16>, vector<128x128xf32> -> vector<128x128xf32>
    %124 = arith.addf %118, %123 : vector<128x128xf32>
    %c2_135 = arith.constant 2 : index
    %c0_136 = arith.constant 0 : index
    %c0_137 = arith.constant 0 : index
    %125 = vector.load %arg8[%c2_135, %c0_136, %c0_137] : memref<10x18x128xbf16, #tpu.memory_space<vmem>>, vector<8x16x128xbf16>
    %126 = vector.shape_cast %125 : vector<8x16x128xbf16> to vector<128x128xbf16>
    %c2_138 = arith.constant 2 : index
    %c0_139 = arith.constant 0 : index
    %c0_140 = arith.constant 0 : index
    %c0_141 = arith.constant 0 : index
    %127 = vector.load %arg5[%c2_138, %c0_139, %c0_140, %c0_141] : memref<3x3x128x128xbf16, #tpu.memory_space<vmem>>, vector<1x1x128x128xbf16>
    %128 = vector.shape_cast %127 : vector<1x1x128x128xbf16> to vector<128x128xbf16>
    %cst_142 = arith.constant dense<0.000000e+00> : vector<128x128xf32>
    %129 = tpu.matmul %126, %128, %cst_142 {dimension_numbers = #tpu.dot_dimension_numbers<[1], [0], [0], [1], [0, 0, 1, 1], [], []>} : vector<128x128xbf16>, vector<128x128xbf16>, vector<128x128xf32> -> vector<128x128xf32>
    %130 = arith.addf %124, %129 : vector<128x128xf32>
    %c2_143 = arith.constant 2 : index
    %c1_144 = arith.constant 1 : index
    %c0_145 = arith.constant 0 : index
    %131 = vector.load %arg8[%c2_143, %c1_144, %c0_145] : memref<10x18x128xbf16, #tpu.memory_space<vmem>>, vector<8x16x128xbf16>
    %132 = vector.shape_cast %131 : vector<8x16x128xbf16> to vector<128x128xbf16>
    %c2_146 = arith.constant 2 : index
    %c1_147 = arith.constant 1 : index
    %c0_148 = arith.constant 0 : index
    %c0_149 = arith.constant 0 : index
    %133 = vector.load %arg5[%c2_146, %c1_147, %c0_148, %c0_149] : memref<3x3x128x128xbf16, #tpu.memory_space<vmem>>, vector<1x1x128x128xbf16>
    %134 = vector.shape_cast %133 : vector<1x1x128x128xbf16> to vector<128x128xbf16>
    %cst_150 = arith.constant dense<0.000000e+00> : vector<128x128xf32>
    %135 = tpu.matmul %132, %134, %cst_150 {dimension_numbers = #tpu.dot_dimension_numbers<[1], [0], [0], [1], [0, 0, 1, 1], [], []>} : vector<128x128xbf16>, vector<128x128xbf16>, vector<128x128xf32> -> vector<128x128xf32>
    %136 = arith.addf %130, %135 : vector<128x128xf32>
    %c2_151 = arith.constant 2 : index
    %c2_152 = arith.constant 2 : index
    %c0_153 = arith.constant 0 : index
    %137 = vector.load %arg8[%c2_151, %c2_152, %c0_153] : memref<10x18x128xbf16, #tpu.memory_space<vmem>>, vector<8x16x128xbf16>
    %138 = vector.shape_cast %137 : vector<8x16x128xbf16> to vector<128x128xbf16>
    %c2_154 = arith.constant 2 : index
    %c2_155 = arith.constant 2 : index
    %c0_156 = arith.constant 0 : index
    %c0_157 = arith.constant 0 : index
    %139 = vector.load %arg5[%c2_154, %c2_155, %c0_156, %c0_157] : memref<3x3x128x128xbf16, #tpu.memory_space<vmem>>, vector<1x1x128x128xbf16>
    %140 = vector.shape_cast %139 : vector<1x1x128x128xbf16> to vector<128x128xbf16>
    %cst_158 = arith.constant dense<0.000000e+00> : vector<128x128xf32>
    %141 = tpu.matmul %138, %140, %cst_158 {dimension_numbers = #tpu.dot_dimension_numbers<[1], [0], [0], [1], [0, 0, 1, 1], [], []>} : vector<128x128xbf16>, vector<128x128xbf16>, vector<128x128xf32> -> vector<128x128xf32>
    %142 = arith.addf %136, %141 : vector<128x128xf32>
    %c0_159 = arith.constant 0 : index
    %c0_160 = arith.constant 0 : index
    %143 = vector.load %arg6[%c0_159, %c0_160] : memref<1x128xf32, #tpu.memory_space<vmem>>, vector<1x128xf32>
    %144 = vector.broadcast %143 : vector<1x128xf32> to vector<128x128xf32>
    %145 = arith.addf %142, %144 : vector<128x128xf32>
    %cst_161 = arith.constant 0.000000e+00 : f32
    %146 = vector.broadcast %cst_161 : f32 to vector<128x128xf32>
    %147 = arith.maximumf %145, %146 : vector<128x128xf32>
    %148 = vector.shape_cast %147 : vector<128x128xf32> to vector<1x8x16x128xf32>
    %149 = arith.truncf %148 : vector<1x8x16x128xf32> to vector<1x8x16x128xbf16>
    %c0_162 = arith.constant 0 : index
    %c0_163 = arith.constant 0 : index
    %c0_164 = arith.constant 0 : index
    %c0_165 = arith.constant 0 : index
    %150 = vector.load %arg7[%c0_162, %c0_163, %c0_164, %c0_165] : memref<1x8x16x128xbf16, #tpu.memory_space<vmem>>, vector<1x8x16x128xbf16>
    tpu.vector_store %arg7[%c0_162, %c0_163, %c0_164, %c0_165], %149 {strides = array<i32>} : memref<1x8x16x128xbf16, #tpu.memory_space<vmem>>, vector<1x8x16x128xbf16>,
    return
  }
  func.func @transform_0(%arg0: i32, %arg1: i32) -> (i32, i32, i32, i32) {
    %c2_i32 = arith.constant 2 : i32
    %0 = arith.muli %arg0, %c2_i32 : i32
    %1 = arith.addi %0, %arg1 : i32
    %c0_i32 = arith.constant 0 : i32
    %c0_i32_0 = arith.constant 0 : i32
    %c0_i32_1 = arith.constant 0 : i32
    %c0_i32_2 = arith.constant 0 : i32
    return %1, %c0_i32, %c0_i32_0, %c0_i32_1 : i32, i32, i32, i32
  }
  func.func @transform_1(%arg0: i32, %arg1: i32) -> (i32, i32, i32, i32) {
    %c0_i32 = arith.constant 0 : i32
    %c0_i32_0 = arith.constant 0 : i32
    %c0_i32_1 = arith.constant 0 : i32
    %c0_i32_2 = arith.constant 0 : i32
    %c0_i32_3 = arith.constant 0 : i32
    return %c0_i32, %c0_i32_0, %c0_i32_1, %c0_i32_2 : i32, i32, i32, i32
  }
  func.func @transform_2(%arg0: i32, %arg1: i32) -> (i32, i32) {
    %c0_i32 = arith.constant 0 : i32
    %c0_i32_0 = arith.constant 0 : i32
    %c0_i32_1 = arith.constant 0 : i32
    return %c0_i32, %c0_i32_0 : i32, i32
  }
  func.func @transform_3(%arg0: i32, %arg1: i32) -> (i32, i32, i32, i32) {
    %c0_i32 = arith.constant 0 : i32
    %c0_i32_0 = arith.constant 0 : i32
    %c0_i32_1 = arith.constant 0 : i32
    %c0_i32_2 = arith.constant 0 : i32
    %c0_i32_3 = arith.constant 0 : i32
    return %c0_i32, %c0_i32_0, %c0_i32_1, %c0_i32_2 : i32, i32, i32, i32
  }
  func.func @transform_4(%arg0: i32, %arg1: i32) -> (i32, i32) {
    %c0_i32 = arith.constant 0 : i32
    %c0_i32_0 = arith.constant 0 : i32
    %c0_i32_1 = arith.constant 0 : i32
    return %c0_i32, %c0_i32_0 : i32, i32
  }
  func.func @transform_5(%arg0: i32, %arg1: i32) -> (i32, i32, i32, i32) {
    %c0_i32 = arith.constant 0 : i32
    %c0_i32_0 = arith.constant 0 : i32
    %c0_i32_1 = arith.constant 0 : i32
    return %arg0, %arg1, %c0_i32, %c0_i32_0 : i32, i32, i32, i32
  }
}

</mosaic_0001>

<bundles_post_ra>
// kernel: tpu_custom_call.1
= control target key start
LH: loop header
LB: loop body
LE: loop exit
PB: predicated region body
PF: predicated region fallthrough
CT: control target
= control target key end

     0   :  { %10 = vsyncpa [#allocation4], 0  ;;  %s11782_s0 = inlined_call_operand.vmem [shape: bf16[4,12,18,128], index: 0, kind: input, shape index: {}]   ;;  %s11783_s1 = inlined_call_operand.vmem [shape: bf16[3,3,128,128], index: 1, kind: input, shape index: {}]   ;;  %s11784_s2 = inlined_call_operand.vmem [shape: f32[1,128], index: 2, kind: input, shape index: {}]   ;;  %s11785_s3 = inlined_call_operand.hbm [shape: bf16[3,3,128,128], index: 3, kind: input, shape index: {}]   ;;  %s11786_s4 = inlined_call_operand.vmem [shape: f32[1,128], index: 4, kind: input, shape index: {}]   ;;  %s11787_s5 = inlined_call_operand.hbm [shape: bf16[2,16,16,128], index: 5, kind: output, shape index: {}]  }
   0x1   :  { %11 = vsyncpa [#allocation5], 0 }
   0x2   :  { %13 = vsyncpa [#allocation5 + $0x1], 0  ;;  %s9171_s18 = smov 0   ;;  %s9173_s19 = smov 0  }
   0x3   :  { %s9175_s20 = smov 0   ;;  %s9177_s21 = smov 0  }
   0x4   :  { %s9179_s22 = smov 0   ;;  %s9181_s23 = smov 0  }
   0x5   :  { %s9183_s24 = smov 0   ;;  %s9185_s25 = smov 0  }
   0x6 LB: > { %s7066_s26 = sadd.s32 4294967295, %s9133_s25   ;;  %s7067_s27 = sadd.s32 4294967294, %s9133_s25   ;;  %s9133_s25 = sphi %s9185_s25, %s19_s25   ;;  %s9129_s24 = sphi %s9183_s24, %s11950_s24   ;;  %s9125_s23 = sphi %s9181_s23, %s11949_s23   ;;  %s9121_s22 = sphi %s9179_s22, %s11948_s22   ;;  %s9117_s21 = sphi %s9177_s21, %s11947_s21   ;;  %s9113_s20 = sphi %s9175_s20, %s11946_s20   ;;  %s9109_s19 = sphi %s9173_s19, %s11945_s19   ;;  %s9105_s18 = sphi %s9171_s18, %s11944_s18  }
   0x7   : > { %s28_s28 = sadd.s32 1, %s9125_s23  ;;  %s31_s29 = sadd.s32 1, %s9129_s24 }
   0x8   : > { %p29_p0 = scmp.ge.s32.totalorder %s28_s28, 2  ;;  %s154_s30 = sadd.s32 1, %s9113_s20 }
   0x9   : > { %p164_p1 = scmp.ne.s32.totalorder %s9113_s20, %s9109_s19  ;;  %p165_p2 = scmp.eq.s32.totalorder %s7066_s26, 3 }
   0xa   : > { %s11952_s28 = smov (%p29_p0, %s28_s28), 0  ;;  %s11954_s29 = smov (!%p29_p0, %s31_s29), %s9129_s24 }
   0xb   : > { %s150_s6 = ssub.s32 %s9125_s23, %s11952_s28  ;;  %p9223_p3 = por %p165_p2, %p164_p1 }
   0xc   : > { %p33_p4 = scmp.ge.s32.totalorder %s11954_s29, 2  ;;  %p170_p5 = scmp.ne.s32.totalorder %s9109_s19, %s9105_s18 }
   0xd   : > { %p171_p6 = scmp.eq.s32.totalorder %s7067_s27, 3  ;;  %p7070_p7 = scmp.ge.s32.totalorder %s9133_s25, 1 }
   0xe   : > { %s11956_s29 = smov (%p33_p4, %s11954_s29), 0  ;;  %p178_p9 = scmp.lt.s32.totalorder %s9133_s25, 5 }
   0xf   : > { %p9232_p8 = por %p171_p6, %p170_p5  ;;  %s149_s9 = ssub.s32 %s9129_s24, %s11956_s29 }
  0x10   : > { %s151_s10 = sor.u32 %s150_s6, %s149_s9  ;;  %p9239_p10 = pnand %p7070_p7, %p178_p9 }
  0x11   : > { %p152_p11 = scmp.eq.s32.totalorder %s151_s10, 0  ;;  %p9243_p12 = scmp.eq.s32.totalorder %s7066_s26, 0 }
  0x12   : > { %p8732_p13 = pneg %p9239_p10  ;;  %s9135_s14 = smov [#allocation3]  }
  0x13   : > { %s9250_s13 = scalar_select %p152_p11, %s9113_s20, %s154_s30  }
  0x14   : > { %s196_s15 = sshll.u32 %s9135_s14, 4  ;;  %p9254_p0 = pnand %p9243_p12, %p8732_p13  ;;  %s197_s15 = int_to_ptr.vmem [resolvable:$true] %s196_s15 }
  0x15   : > { %s9022_s17 = scalar_lea.vmem %s197_s15, 9216  ;;  %p9030_p6 = scmp.lt.s32.totalorder %s197_s15, %s197_s15 }
  0x16   : > { %p9013_p1 = pneg %p9254_p0  ;;  %p9023_p2 = scmp.ne.s32.totalorder %s197_s15, %s9022_s17 }
  0x17   : > { %p9031_p7 = scmp.lt.s32.totalorder %s9022_s17, %s9022_s17 }
  0x18   : > { %p9025_p4 = pnand %p9023_p2, %p9013_p1 }
  0x19   : > { %p9032_p9 = por %p9031_p7, %p9030_p6 }
  0x1a   : > { %p9026_p5 = pneg %p9025_p4 }
  0x1c   : > { %p9033_p11 = pnand %p9032_p9, %p9026_p5 }
  0x1e   : > { %9036 = shalt.err (!%p9033_p11)
}
  0x1f   : > { %s9136_s26 = smov 64   ;;  %s9137_s27 = smov 4  }
  0x20   : > { %8735 = dma.hbm_to_vmem [thread:$0]  (!%p9254_p0), %s11785_s3, 9216, %s197_s15, [#allocation4], %s9136_s26, %s9136_s26, %s9137_s27  }
  0x21   : > { %227 = sbr.rel (%p9239_p10) target bundleno = 892 (0x37c), region = 40 }
  0x26   : > { %9096 = dma.done.wait (%p9243_p12), [#allocation4], 9216  }
  0x27   : > { %9098 = vsyncadd (%p9243_p12), [#allocation4], 4294958080  ;;  %s7076_s9 = sshll.u32 %s9121_s22, 1  ;;  %v8812_v0 = vld [vmem:[%s11783_s1 + $0x78] sm:$0xff]   ;;  %v8814_v2 = vld [vmem:[%s11783_s1 + $0x70] sm:$0xff]   ;;  %v11800_v39 = vmov 0 }
  0x28   : > { %s258_s10 = sadd.s32 %s9117_s21, %s7076_s9  ;;  %v8813_v1 = vld [vmem:[%s11783_s1 + $0x38] sm:$0xff]   ;;  %8113 = vmatprep.subr.bf16.mxu0 %v8812_v0  ;;  %v8815_v3 = vld [vmem:[%s11783_s1 + $0x30] sm:$0xff]   ;;  %v8816_v4 = vld [vmem:[%s11783_s1 + $0x68] sm:$0xff]   ;;  %vm314_vm0 = vsmask.f32 3328  ;;  %vm1026_vm3 = vcmask 1042432  }
  0x29   : > { %p259_p13 = scmp.lt.s32.totalorder %s258_s10, 3  ;;  %8149 = vmatprep.subr.bf16.mxu1 %v8813_v1  ;;  %8114 = vmatpush3.bf16.msra.mxu0 %v8812_v0  ;;  %v8817_v5 = vld [vmem:[%s11783_s1 + $0x28] sm:$0xff]   ;;  %v8818_v6 = vld [vmem:[%s11783_s1 + $0x60] sm:$0xff]   ;;  %vm315_vm1 = vsmask.f32 7440  ;;  %v8820_v8 = vld [vmem:[%s11783_s1 + $0x58] sm:$0xff]  }
  0x2a   : > { %8150 = vmatpush3.bf16.msra.mxu1 %v8813_v1  ;;  %8115 = vmatprep.subr.bf16.mxu0 %v8814_v2  ;;  %v8819_v7 = vld [vmem:[%s11783_s1 + $0x20] sm:$0xff]   ;;  %v8821_v9 = vld [vmem:[%s11783_s1 + $0x18] sm:$0xff]   ;;  %v8822_v10 = vld [vmem:[%s11783_s1 + $0x50] sm:$0xff]   ;;  %vm1027_vm4 = vcmask 1046532   ;;  %vm3836_vm12 = vcmask 1040384   ;;  %s254_s6 = sand.u32 1, %s9109_s19  }
  0x2b   : > { %8151 = vmatprep.subr.bf16.mxu1 %v8815_v3  ;;  %s11958_s10 = smov (!%p259_p13, %s258_s10), 3  ;;  %v8823_v11 = vld [vmem:[%s11783_s1 + $0x10] sm:$0xff]   ;;  %v8824_v20 = vld [vmem:[%s11783_s1 + $0x48] sm:$0xff]   ;;  %v8826_v38 = vld [vmem:[%s11783_s1 + $0x40] sm:$0xff]   ;;  %vm3837_vm13 = vsmask.f32 256 }
  0x2c   : > { %s8725_s15 = smul.u32 144, %s11958_s10  ;;  %v8825_v33 = vld [vmem:[%s11783_s1 + $0x8] sm:$0xff]   ;;  %vm9350_vm2 = vmor %vm314_vm0, %vm315_vm1  ;;  %v8827_v53 = vld [vmem:[%s11783_s1] sm:$0xff]   ;;  %s7075_s9 = sshll.u32 %s254_s6, 6 }
  0x2d   : > { %8116 = vmatpush3.bf16.msra.mxu0 %v8814_v2  ;;  %v11801_v39 = vsel %vm9350_vm2, 4294967295, %v11800_v39  ;;  %vm9577_vm5 = vmor %vm1026_vm3, %vm1027_vm4  ;;  %s11673_s14 = scalar_lea.vmem [#allocation6], %s7075_s9  ;;  %s7759_s10 = sshll.u32 %s9117_s21, 4 }
  0x2e   : > { %8152 = vmatpush3.bf16.msra.mxu1 %v8815_v3  ;;  %8117 = vmatprep.subr.bf16.mxu0 %v8816_v4  ;;  %s9306_s17 = scalar_lea.vmem %s11782_s0, %s8725_s15  ;;  %11802 = vst [vmem:[#allocation9_spill] sm:$0xff] %v11801_v39  ;;  %s7739_s16 = sshll.u32 %s9121_s22, 5 }
  0x2f   : > { %8153 = vmatprep.subr.bf16.mxu1 %v8817_v5  ;;  %v268_v12 = vld [vmem:[%s9306_s17] sm:$0xf]  ;;  %v9316_v13 = vld [vmem:[%s9306_s17 + $0x4] sm:$0xf]  ;;  %v9319_v14 = vld [vmem:[%s9306_s17 + $0x8] sm:$0x1]  ;;  %s6975_s30 = sadd.s32 %s7759_s10, %s7739_s16 }
  0x30   : > { %v318_v15 = vshrl.u32 %v268_v12, 16  ;;  %v321_v16 = vshll.u32 %v268_v12, 16  ;;  %v327_v17 = vshll.u32 %v9316_v13, 16  ;;  %v331_v18 = vshrl.u32 %v9316_v13, 16  ;;  %v9324_v19 = vld [vmem:[%s9306_s17 + $0xc] sm:$0xf] }
  0x31   : > { %8118 = vmatpush3.bf16.msra.mxu0 %v8816_v4  ;;  %v337_v21 = vshll.u32 %v9319_v14, 16  ;;  %v7112_v22 = vcombine.low %v268_v12, %v9316_v13  ;;  %v9332_v23 = vld [vmem:[%s9306_s17 + $0x10] sm:$0xf]  ;;  %v9335_v24 = vld [vmem:[%s9306_s17 + $0x14] sm:$0x1]  ;;  %v342_v30 = vshrl.u32 %v9324_v19, 16 }
  0x32   : > { %8154 = vmatpush3.bf16.msra.mxu1 %v8817_v5  ;;  %8119 = vmatprep.subr.bf16.mxu0 %v8818_v6  ;;  %v320_v25 = vrot.slane %v318_v15, 4  ;;  %v323_v26 = vrot.slane %v321_v16, 5  ;;  %v329_v27 = vrot.slane %v327_v17, 5  ;;  %v333_v28 = vrot.slane %v331_v18, 4  ;;  %v9355_v47 = vld [vmem:[%s9306_s17 + $0x18] sm:$0xf] }
  0x33   : > { %8155 = vmatprep.subr.bf16.mxu1 %v8819_v7  ;;  %v339_v29 = vrot.slane %v337_v21, 5  ;;  %v345_v31 = vshll.u32 %v9324_v19, 16  ;;  %v351_v32 = vshll.u32 %v9332_v23, 16  ;;  %8165 = vmatprep.mubr.bf16.mxu1 %v7112_v22  ;;  %v355_v36 = vshrl.u32 %v9332_v23, 16  ;;  %v9358_v49 = vld [vmem:[%s9306_s17 + $0x1c] sm:$0xf] }
  0x34   : > { %v324_v34 = vor.u32 %v323_v26, %v320_v25  ;;  %v334_v35 = vor.u32 %v333_v28, %v329_v27  ;;  %v361_v37 = vshll.u32 %v9335_v24, 16  ;;  %v344_v40 = vrot.slane %v342_v30, 4  ;;  %v9361_v50 = vld [vmem:[%s9306_s17 + $0x20] sm:$0x1]  ;;  %v9374_v58 = vld [vmem:[%s9306_s17 + $0x24] sm:$0xf] }
  0x35   : > { %8120 = vmatpush3.bf16.msra.mxu0 %v8818_v6  ;;  %v347_v41 = vrot.slane %v345_v31, 5  ;;  %v353_v42 = vrot.slane %v351_v32, 5  ;;  %v357_v45 = vrot.slane %v355_v36, 4  ;;  %v366_v51 = vshrl.u32 %v9355_v47, 16  ;;  %v9377_v59 = vld [vmem:[%s9306_s17 + $0x28] sm:$0xf] }
  0x36   : > { %8156 = vmatpush3.bf16.msra.mxu1 %v8819_v7  ;;  %8121 = vmatprep.subr.bf16.mxu0 %v8820_v8  ;;  %v325_v43 = vrot.slane %v324_v34, 4  ;;  %v335_v44 = vrot.slane %v334_v35, 4  ;;  %v363_v46 = vrot.slane %v361_v37, 5  ;;  %v369_v52 = vshll.u32 %v9355_v47, 16  ;;  %v9380_v0 = vld [vmem:[%s9306_s17 + $0x2c] sm:$0x1] }
  0x37   : > { %8157 = vmatprep.subr.bf16.mxu1 %v8821_v9  ;;  %v348_v48 = vor.u32 %v347_v41, %v344_v40  ;;  %v358_v56 = vor.u32 %v357_v45, %v353_v42  ;;  %v375_v57 = vshll.u32 %v9358_v49, 16  ;;  %v368_v62 = vrot.slane %v366_v51, 4  ;;  %v8830_v7 = vld [vmem:[%s11783_s1 + $0xb8] sm:$0xff]   ;;  %v9411_v32 = vld [vmem:[%s9306_s17 + $0x30] sm:$0xf]  ;;  %s6978_s22 = sshll.u32 %s11673_s14, 4  ;;  %s11725_s22 = int_to_ptr.vmem [resolvable:$true] %s6978_s22 }
  0x38   : > { %v330_v54 = vsel %vm9350_vm2, %v325_v43, %v329_v27  ;;  %v340_v55 = vsel %vm9350_vm2, %v335_v44, %v339_v29  ;;  %v371_v63 = vrot.slane %v369_v52, 5  ;;  %v379_v3 = vshrl.u32 %v9358_v49, 16  ;;  %v8835_v16 = vld [vmem:[%s11783_s1 + $0xf8] sm:$0xff]   ;;  %v8831_v27 = vld [vmem:[%s11783_s1 + $0xb0] sm:$0xff]   ;;  %s11731_s12 = scalar_lea.sflag [#allocation5], %s254_s6  ;;  %s9037_s26 = scalar_lea.vmem %s11725_s22, 1024 }
  0x39   : > { %8122 = vmatpush3.bf16.msra.mxu0 %v8820_v8  ;;  %v7094_v60 = vcombine.low %v330_v54, %v340_v55  ;;  %v349_v61 = vrot.slane %v348_v48, 4  ;;  %v359_v1 = vrot.slane %v358_v56, 4  ;;  %v377_v2 = vrot.slane %v375_v57, 5  ;;  %v9420_v40 = vld [vmem:[%s9306_s17 + $0x38] sm:$0x1]  ;;  %p9038_p10 = scmp.ne.s32.totalorder %s11725_s22, %s9037_s26  ;;  %s9138_s27 = smov [#allocation6]  }
  0x3a   : > { %8158 = vmatpush3.bf16.msra.mxu1 %v8821_v9  ;;  %8123 = vmatprep.subr.bf16.mxu0 %v8822_v10  ;;  %v385_v4 = vshll.u32 %v9361_v50, 16  ;;  %v7113_v6 = vcombine.low %v9324_v19, %v9332_v23  ;;  %v372_v8 = vor.u32 %v371_v63, %v368_v62  ;;  %v390_v9 = vshrl.u32 %v9374_v58, 16  ;;  %v9430_v51 = vld [vmem:[%s9306_s17 + $0x3c] sm:$0xf]  ;;  %v9436_v57 = vld [vmem:[%s9306_s17 + $0x40] sm:$0xf] }
  0x3b   : > { %8159 = vmatprep.subr.bf16.mxu1 %v8823_v11  ;;  %v354_v5 = vsel %vm9350_vm2, %v349_v61, %v353_v42  ;;  %8129 = vmatprep.mubr.bf16.mxu0 %v7094_v60  ;;  %v393_v15 = vshll.u32 %v9374_v58, 16  ;;  %v403_v25 = vshrl.u32 %v9377_v59, 16  ;;  %v409_v26 = vshll.u32 %v9380_v0, 16  ;;  %p9039_p12 = pnand %p9038_p10, %p9223_p3  ;;  %s9041_s9 = sshll.u32 %s9138_s27, 4  ;;  %s9042_s9 = int_to_ptr.vmem [resolvable:$false] %s9041_s9 }
  0x3c   : > { %v387_v12 = vrot.slane %v385_v4, 5  ;;  %v373_v18 = vrot.slane %v372_v8, 4  ;;  %v392_v19 = vrot.slane %v390_v9, 4  ;;  %v7114_v29 = vcombine.low %v9355_v47, %v9358_v49  ;;  %s9043_s10 = scalar_lea.vmem %s9042_s9, 2048  ;;  %p9044_p1 = scmp.lt.s32.totalorder %s11725_s22, %s9042_s9 }
  0x3d   : > { %8124 = vmatpush3.bf16.msra.mxu0 %v8822_v10  ;;  %v364_v10 = vsel %vm9350_vm2, %v359_v1, %v363_v46  ;;  %v395_v22 = vrot.slane %v393_v15, 5  ;;  %v7115_v31 = vcombine.low %v9374_v58, %v9377_v59  ;;  %v405_v36 = vrot.slane %v403_v25, 4  ;;  %v9441_v1 = vld [vmem:[%s9306_s17 + $0x44] sm:$0x1]  ;;  %p9040_p0 = pneg %p9039_p12  ;;  %p9045_p2 = scmp.lt.s32.totalorder %s9043_s10, %s9037_s26 }
  0x3e   : > { %8160 = vmatpush3.bf16.msra.mxu1 %v8823_v11  ;;  %8125 = vmatprep.subr.bf16.mxu0 %v8824_v20  ;;  %v381_v11 = vrot.slane %v379_v3, 4  ;;  %v7095_v17 = vcombine.low %v354_v5, %v364_v10  ;;  %v378_v28 = vsel %vm9350_vm2, %v373_v18, %v377_v2  ;;  %v411_v37 = vrot.slane %v409_v26, 5  ;;  %v8838_v5 = vld [vmem:[%s11783_s1 + $0xa0] sm:$0xff]  }
  0x3f   : > { %8161 = vmatprep.subr.bf16.mxu1 %v8825_v33  ;;  %v396_v35 = vor.u32 %v395_v22, %v392_v19  ;;  %v414_v41 = vshrl.u32 %v9411_v32, 16  ;;  %v417_v42 = vshll.u32 %v9411_v32, 16  ;;  %v433_v48 = vshll.u32 %v9420_v40, 16  ;;  %v8842_v18 = vld [vmem:[%s11783_s1 + $0xe0] sm:$0xff]   ;;  %p9046_p4 = por %p9045_p2, %p9044_p1 }
  0x40   : > { %v382_v21 = vor.u32 %v381_v11, %v377_v2  ;;  %v8840_v2 = vld [vmem:[%s11783_s1 + $0xe8] sm:$0xff]   ;;  %v447_v10 = vshll.u32 %v9436_v57, 16  ;;  %v451_v11 = vshrl.u32 %v9436_v57, 16  ;;  %v457_v22 = vshll.u32 %v9441_v1, 16 }
  0x41   : > { %8126 = vmatpush3.bf16.msra.mxu0 %v8824_v20  ;;  %v399_v20 = vshll.u32 %v9377_v59, 16  ;;  %v397_v46 = vrot.slane %v396_v35, 4  ;;  %v416_v54 = vrot.slane %v414_v41, 4  ;;  %v419_v55 = vrot.slane %v417_v42, 5  ;;  %v9487_v41 = vld [vmem:[%s9306_s17 + $0x58] sm:$0xf]  ;;  %p9047_p5 = pnand %p9046_p4, %p9040_p0 }
  0x42   : > { %8162 = vmatpush3.bf16.msra.mxu1 %v8825_v33  ;;  %8127 = vmatprep.subr.bf16.mxu0 %v8826_v38  ;;  %v9414_v33 = vld [vmem:[%s9306_s17 + $0x34] sm:$0xf]  ;;  %v383_v34 = vrot.slane %v382_v21, 4  ;;  %v435_v63 = vrot.slane %v433_v48, 5  ;;  %v453_v21 = vrot.slane %v451_v11, 4 }
  0x43   : > { %8163 = vmatprep.subr.bf16.mxu1 %v8827_v53  ;;  %v401_v30 = vrot.slane %v399_v20, 5  ;;  %v423_v43 = vshll.u32 %v9414_v33, 16  ;;  %v427_v44 = vshrl.u32 %v9414_v33, 16  ;;  %v420_v3 = vor.u32 %v419_v55, %v416_v54 }
  0x44   : > { %v388_v45 = vsel %vm9350_vm2, %v383_v34, %v387_v12  ;;  %v7116_v4 = vcombine.low %v9411_v32, %v9414_v33  ;;  %v449_v20 = vrot.slane %v447_v10, 5  ;;  %v9475_v32 = vld [vmem:[%s9306_s17 + $0x50] sm:$0x1] }
  0x45   : > { %8128 = vmatpush3.bf16.msra.mxu0 %v8826_v38  ;;  %v8836_v38 = vld [vmem:[%s11783_s1 + $0xf0] sm:$0xff]   ;;  %v406_v47 = vor.u32 %v405_v36, %v401_v30  ;;  %v7096_v52 = vcombine.low %v378_v28, %v388_v45  ;;  %v425_v56 = vrot.slane %v423_v43, 5  ;;  %v402_v60 = vsel %vm9350_vm2, %v397_v46, %v401_v30  ;;  %v8841_v28 = vld [vmem:[%s11783_s1 + $0x98] sm:$0xff]   ;;  %v9472_v30 = vld [vmem:[%s9306_s17 + $0x4c] sm:$0xf] }
  0x46   : > { %8164 = vmatpush3.bf16.msra.mxu1 %v8827_v53  ;;  %8185 = vmatprep.subr.bf16.mxu0 %v8830_v7  ;;  %v8834_v53 = vld [vmem:[%s11783_s1 + $0xa8] sm:$0xff]   ;;  %v429_v62 = vrot.slane %v427_v44, 4  ;;  %v421_v15 = vrot.slane %v420_v3, 4  ;;  %v454_v35 = vor.u32 %v453_v21, %v449_v20  ;;  %v459_v36 = vrot.slane %v457_v22, 5  ;;  %v8846_v45 = vld [vmem:[%s11783_s1 + $0xd8] sm:$0xff]  }
  0x47   : > { %8221 = vmatprep.subr.bf16.mxu1 %v8835_v16  ;;  %v407_v61 = vrot.slane %v406_v47, 4  ;;  %v471_v58 = vshll.u32 %v9472_v30, 16  ;;  %v475_v48 = vshrl.u32 %v9472_v30, 16  ;;  %v284_v21 = vld [vmem:[%s9306_s17 + $0x60] sm:$0xf]  ;;  %v1031_v22 = vrot.slane %v9316_v13, 5 }
  0x48   : > { %8130 = vmatmul.mubr.bf16.vlgmr.msra.gmra.mxu0 %v7095_v17  ;;  %v430_v9 = vor.u32 %v429_v62, %v425_v56  ;;  %v426_v25 = vsel %vm9350_vm2, %v421_v15, %v425_v56  ;;  %v455_v46 = vrot.slane %v454_v35, 4 }
  0x49   : > { %8166 = vmatmul.mubr.bf16.vlgmr.msra.gmra.mxu1 %v7113_v6  ;;  %8186 = vmatpush3.bf16.msra.mxu0 %v8830_v7  ;;  %v438_v6 = vshrl.u32 %v9430_v51, 16  ;;  %v441_v7 = vshll.u32 %v9430_v51, 16  ;;  %v412_v8 = vsel %vm9350_vm2, %v407_v61, %v411_v37  ;;  %v473_v54 = vrot.slane %v471_v58, 5 }
  0x4a   : > { %8187 = vmatprep.subr.bf16.mxu0 %v8831_v27  ;;  %8169 = vmatprep.mubr.bf16.mxu1 %v7114_v29  ;;  %v7097_v12 = vcombine.low %v402_v60, %v412_v8  ;;  %v431_v19 = vrot.slane %v430_v9, 4  ;;  %v9469_v29 = vld [vmem:[%s9306_s17 + $0x48] sm:$0xf]  ;;  %v460_v56 = vsel %vm9350_vm2, %v455_v46, %v459_v36  ;;  %v477_v60 = vrot.slane %v475_v48, 4  ;;  %v9542_v48 = vld [vmem:[%s9306_s17 + $0x74] sm:$0x1] }
  0x4b   : > { %8222 = vmatpush3.bf16.msra.mxu1 %v8835_v16  ;;  %8133 = vmatprep.mubr.bf16.mxu0 %v7096_v52  ;;  %v440_v16 = vrot.slane %v438_v6, 4  ;;  %v443_v17 = vrot.slane %v441_v7, 5  ;;  %v462_v37 = vshrl.u32 %v9469_v29, 16  ;;  %v465_v44 = vshll.u32 %v9469_v29, 16 }
  0x4c   : > { %8223 = vmatprep.subr.bf16.mxu1 %v8836_v38  ;;  %v436_v34 = vsel %vm9350_vm2, %v431_v19, %v435_v63  ;;  %v7118_v55 = vcombine.low %v9469_v29, %v9472_v30  ;;  %v8845_v63 = vld [vmem:[%s11783_s1 + $0x90] sm:$0xff]   ;;  %v495_v6 = vshll.u32 %v9487_v41, 16  ;;  %v478_v7 = vor.u32 %v477_v60, %v473_v54  ;;  %v9526_v29 = vld [vmem:[%s9306_s17 + $0x64] sm:$0xf] }
  0x4d   : > { %8188 = vmatpush3.bf16.msra.mxu0 %v8831_v27  ;;  %v444_v26 = vor.u32 %v443_v17, %v440_v16  ;;  %v7117_v27 = vcombine.low %v9430_v51, %v9436_v57  ;;  %v7098_v42 = vcombine.low %v426_v25, %v436_v34  ;;  %v464_v47 = vrot.slane %v462_v37, 4  ;;  %v8847_v16 = vld [vmem:[%s11783_s1 + $0x88] sm:$0xff]   ;;  %v8848_v17 = vld [vmem:[%s11783_s1 + $0xd0] sm:$0xff]  }
  0x4e   : > { %8189 = vmatprep.subr.bf16.mxu0 %v8834_v53  ;;  %v481_v51 = vshll.u32 %v9475_v32, 16  ;;  %v9529_v34 = vld [vmem:[%s9306_s17 + $0x68] sm:$0x1]  ;;  %v519_v37 = vshll.u32 %v9526_v29, 16  ;;  %v7120_v60 = vcombine.low %v284_v21, %v9526_v29 }
  0x4f   : > { %8224 = vmatpush3.bf16.msra.mxu1 %v8836_v38  ;;  %v9484_v38 = vld [vmem:[%s9306_s17 + $0x54] sm:$0xf]  ;;  %v445_v43 = vrot.slane %v444_v26, 4 }
  0x50   : > { %8134 = vmatmul.mubr.bf16.gmra.mxu0 %v7097_v12  ;;  %8225 = vmatprep.subr.bf16.mxu1 %v8840_v2  ;;  %v483_v61 = vrot.slane %v481_v51, 5  ;;  %v486_v62 = vshrl.u32 %v9484_v38, 16  ;;  %v497_v12 = vrot.slane %v495_v6, 5  ;;  %v7119_v15 = vcombine.low %v9484_v38, %v9487_v41  ;;  %v8851_v51 = vld [vmem:[%s11783_s1 + $0xc8] sm:$0xff]  }
  0x51   : > { %8170 = vmatmul.mubr.bf16.gmra.mxu1 %v7115_v31  ;;  %8190 = vmatpush3.bf16.msra.mxu0 %v8834_v53  ;;  %v9492_v31 = vld [vmem:[%s9306_s17 + $0x5c] sm:$0x1]  ;;  %v450_v52 = vsel %vm9350_vm2, %v445_v43, %v449_v20  ;;  %v467_v53 = vrot.slane %v465_v44, 5  ;;  %v9539_v43 = vld [vmem:[%s9306_s17 + $0x70] sm:$0xf] }
  0x52   : > { %8173 = vmatprep.mubr.bf16.mxu1 %v7116_v4  ;;  %8191 = vmatprep.subr.bf16.mxu0 %v8838_v5  ;;  %v489_v4 = vshll.u32 %v9484_v38, 16  ;;  %v488_v8 = vrot.slane %v486_v62, 4  ;;  %v505_v9 = vshll.u32 %v9492_v31, 16  ;;  %v523_v38 = vshrl.u32 %v9526_v29, 16  ;;  %v8852_v62 = vld [vmem:[%s11783_s1 + $0x80] sm:$0xff]  }
  0x53   : > { %8226 = vmatpush3.bf16.msra.mxu1 %v8840_v2  ;;  %8137 = vmatprep.mubr.bf16.mxu0 %v7098_v42  ;;  %v7099_v2 = vcombine.low %v450_v52, %v460_v56  ;;  %v468_v3 = vor.u32 %v467_v53, %v464_v47  ;;  %v9536_v42 = vld [vmem:[%s9306_s17 + $0x6c] sm:$0xf]  ;;  %v521_v52 = vrot.slane %v519_v37, 5  ;;  %v1033_v37 = vrot.slane %v1031_v22, 4 }
  0x54   : > { %8227 = vmatprep.subr.bf16.mxu1 %v8842_v18  ;;  %v491_v11 = vrot.slane %v489_v4, 5  ;;  %v507_v20 = vrot.slane %v505_v9, 5  ;;  %v525_v53 = vrot.slane %v523_v38, 4  ;;  %v537_v4 = vshll.u32 %v9536_v42, 16  ;;  %v8853_v9 = vld [vmem:[%s11783_s1 + $0xc0] sm:$0xff]  }
  0x55   : > { %8192 = vmatpush3.bf16.msra.mxu0 %v8838_v5  ;;  %v499_v5 = vshrl.u32 %v9487_v41, 16  ;;  %v469_v10 = vrot.slane %v468_v3, 4 }
  0x56   : > { %8193 = vmatprep.subr.bf16.mxu0 %v8841_v28  ;;  %v492_v26 = vor.u32 %v491_v11, %v488_v8  ;;  %v539_v11 = vrot.slane %v537_v4, 5  ;;  %v8856_v4 = vld [vmem:[%s9306_s17 + $0x18] sm:$0xff]  }
  0x57   : > { %8228 = vmatpush3.bf16.msra.mxu1 %v8842_v18  ;;  %v479_v18 = vrot.slane %v478_v7, 4  ;;  %v501_v19 = vrot.slane %v499_v5, 4  ;;  %v474_v25 = vsel %vm9350_vm2, %v469_v10, %v473_v54  ;;  %v529_v54 = vshll.u32 %v9529_v34, 16 }
  0x58   : > { %8138 = vmatmul.mubr.bf16.gmra.mxu0 %v7099_v2  ;;  %8229 = vmatprep.subr.bf16.mxu1 %v8846_v45  ;;  %v493_v58 = vrot.slane %v492_v26, 4  ;;  %v526_v2 = vor.u32 %v525_v53, %v521_v52  ;;  %v543_v5 = vshll.u32 %v9539_v43, 16  ;;  %v1045_v53 = vrot.slane %v9358_v49, 5 }
  0x59   : > { %8174 = vmatmul.mubr.bf16.gmra.mxu1 %v7117_v27  ;;  %8194 = vmatpush3.bf16.msra.mxu0 %v8841_v28  ;;  %v510_v27 = vshrl.u32 %v284_v21, 16  ;;  %v513_v28 = vshll.u32 %v284_v21, 16  ;;  %v484_v35 = vsel %vm9350_vm2, %v479_v18, %v483_v61  ;;  %v502_v36 = vor.u32 %v501_v19, %v497_v12  ;;  %v996_v18 = vld [vmem:[%s9306_s17] sm:$0xe] }
  0x5a   : > { %8177 = vmatprep.mubr.bf16.mxu1 %v7118_v55  ;;  %8195 = vmatprep.subr.bf16.mxu0 %v8845_v63  ;;  %v7100_v44 = vcombine.low %v474_v25, %v484_v35  ;;  %v498_v55 = vsel %vm9350_vm2, %v493_v58, %v497_v12  ;;  %v534_v61 = vshrl.u32 %v9536_v42, 16  ;;  %v531_v3 = vrot.slane %v529_v54, 5 }
  0x5b   : > { %8230 = vmatpush3.bf16.msra.mxu1 %v8846_v45  ;;  %v512_v46 = vrot.slane %v510_v27, 4  ;;  %v515_v47 = vrot.slane %v513_v28, 5  ;;  %v503_v45 = vrot.slane %v502_v36, 4  ;;  %v527_v10 = vrot.slane %v526_v2, 4  ;;  %v997_v28 = vld [vmem:[%s9306_s17 + $0xc] sm:$0xe] }
  0x5c   : > { %8231 = vmatprep.subr.bf16.mxu1 %v8848_v17  ;;  %8141 = vmatprep.mubr.bf16.mxu0 %v7100_v44  ;;  %v536_v8 = vrot.slane %v534_v61, 4  ;;  %v547_v12 = vshrl.u32 %v9539_v43, 16  ;;  %v1034_v19 = vrot.slane %v9319_v14, 5  ;;  %v545_v21 = vrot.slane %v543_v5, 5 }
  0x5d   : > { %8196 = vmatpush3.bf16.msra.mxu0 %v8845_v63  ;;  %v516_v56 = vor.u32 %v515_v47, %v512_v46  ;;  %v508_v63 = vsel %vm9350_vm2, %v503_v45, %v507_v20  ;;  %v7130_v25 = vrot.slane %v996_v18, 9  ;;  %v11803_v14 = vmov 0  ;;  %v8855_v45 = vld [vmem:[%s9306_s17 + $0xc] sm:$0xff]  }
  0x5e   : > { %8197 = vmatprep.subr.bf16.mxu0 %v8847_v16  ;;  %v7101_v6 = vcombine.low %v498_v55, %v508_v63  ;;  %v540_v26 = vor.u32 %v539_v11, %v536_v8  ;;  %v549_v27 = vrot.slane %v547_v12, 4  ;;  %v11804_v14 = vsel %vm9577_vm5, 4294967295, %v11803_v14  ;;  %v8862_v11 = vld [vmem:[%s11783_s1 + $0x170] sm:$0xff]  }
  0x5f   : > { %8232 = vmatpush3.bf16.msra.mxu1 %v8848_v17  ;;  %v517_v7 = vrot.slane %v516_v56, 4  ;;  %v553_v17 = vshll.u32 %v9542_v48, 16  ;;  %11805 = vst [vmem:[#allocation10_spill] sm:$0xff] %v11804_v14  ;;  %v7121_v58 = vcombine.low %v9536_v42, %v9539_v43  ;;  %v1038_v46 = vrot.slane %v9332_v23, 5  ;;  %v1000_v12 = vld [vmem:[%s9306_s17 + $0x30] sm:$0xe] }
  0x60   : > { %8233 = vmatprep.subr.bf16.mxu1 %v8851_v51  ;;  %8142 = vmatmul.mubr.bf16.gmra.mxu0 %v7101_v6  ;;  %v541_v38 = vrot.slane %v540_v26, 4  ;;  %v550_v44 = vor.u32 %v549_v27, %v545_v21  ;;  %v1032_v47 = vsel %vm9577_vm5, %v7130_v25, %v1031_v22  ;;  %v1041_v42 = vrot.slane %v9335_v24, 5  ;;  %v999_v22 = vld [vmem:[%s9306_s17 + $0x24] sm:$0xe]  ;;  %v8857_v18 = vld [vmem:[%s11783_s1 + $0x130] sm:$0xff]   ;;  %v8860_v27 = vld [vmem:[%s11783_s1 + $0x128] sm:$0xff]  }
  0x61   : > { %8178 = vmatmul.mubr.bf16.gmra.mxu1 %v7119_v15  ;;  %8198 = vmatpush3.bf16.msra.mxu0 %v8847_v16  ;;  %v522_v20 = vsel %vm9350_vm2, %v517_v7, %v521_v52  ;;  %v9571_v15 = vld [vmem:[%s11783_s1 + $0x138] sm:$0xff]   ;;  %v532_v16 = vsel %vm9350_vm2, %v527_v10, %v531_v3  ;;  %v555_v36 = vrot.slane %v553_v17, 5  ;;  %v7131_v13 = vrot.slane %v997_v28, 9  ;;  %v8859_v26 = vld [vmem:[%s9306_s17 + $0x30] sm:$0xff]  }
  0x62   : > { %8181 = vmatprep.mubr.bf16.mxu1 %v7120_v60  ;;  %8199 = vmatprep.subr.bf16.mxu0 %v8852_v62  ;;  %v7102_v35 = vcombine.low %v522_v20, %v532_v16  ;;  %v998_v52 = vld [vmem:[%s9306_s17 + $0x18] sm:$0xe]  ;;  %v546_v23 = vsel %vm9350_vm2, %v541_v38, %v545_v21  ;;  %v551_v54 = vrot.slane %v550_v44, 4  ;;  %v1048_v55 = vrot.slane %v9361_v50, 5  ;;  %v1002_v38 = vld [vmem:[%s9306_s17 + $0x48] sm:$0xe] }
  0x63   : > { %8234 = vmatpush3.bf16.msra.mxu1 %v8851_v51  ;;  %v1035_v51 = vsel %vm9577_vm5, %v1033_v37, %v1034_v19  ;;  %v1040_v61 = vrot.slane %v1038_v46, 4  ;;  %v1047_v24 = vrot.slane %v1045_v53, 4  ;;  %v1052_v63 = vrot.slane %v9377_v59, 5  ;;  %v8861_v50 = vld [vmem:[%s11783_s1 + $0x178] sm:$0xff]  }
  0x64   : > { %8235 = vmatprep.subr.bf16.mxu1 %v8853_v9  ;;  %8145 = vmatprep.mubr.bf16.mxu0 %v7102_v35  ;;  %v556_v56 = vsel %vm9350_vm2, %v551_v54, %v555_v36  ;;  %v7156_v60 = vcombine.low %v1032_v47, %v1035_v51  ;;  %v1039_v2 = vsel %vm9577_vm5, %v7131_v13, %v1038_v46  ;;  %v7133_v6 = vrot.slane %v999_v22, 9  ;;  %v1001_v19 = vld [vmem:[%s9306_s17 + $0x3c] sm:$0xe]  ;;  %v1003_v47 = vld [vmem:[%s9306_s17 + $0x54] sm:$0xe] }
  0x65   : > { %8200 = vmatpush3.bf16.msra.mxu0 %v8852_v62  ;;  %v7132_v62 = vrot.slane %v998_v52, 9  ;;  %v7103_v49 = vcombine.low %v546_v23, %v556_v56  ;;  %v1042_v3 = vsel %vm9577_vm5, %v1040_v61, %v1041_v42  ;;  %v1055_v7 = vrot.slane %v9380_v0, 5  ;;  %v8864_v35 = vld [vmem:[%s9306_s17 + $0x3c] sm:$0xff]  }
  0x66   : > { %8257 = vmatprep.subr.bf16.mxu0 %v9571_v15  ;;  %v1049_v8 = vsel %vm9577_vm5, %v1047_v24, %v1048_v55  ;;  %v1054_v5 = vrot.slane %v1052_v63, 4  ;;  %v1059_v10 = vrot.slane %v9414_v33, 5  ;;  %v1066_v17 = vrot.slane %v9436_v57, 5  ;;  %v8866_v57 = vld [vmem:[%s11783_s1 + $0x168] sm:$0xff]   ;;  %v8863_v42 = vld [vmem:[%s11783_s1 + $0x120] sm:$0xff]   ;;  %v8872_v22 = vld [vmem:[%s11783_s1 + $0x158] sm:$0xff]  }
  0x67   : > { %8236 = vmatpush3.bf16.msra.mxu1 %v8853_v9  ;;  %v1046_v59 = vsel %vm9577_vm5, %v7132_v62, %v1045_v53  ;;  %v8858_v9 = vld [vmem:[%s9306_s17 + $0x24] sm:$0xff]   ;;  %v7157_v0 = vcombine.low %v1039_v2, %v1042_v3  ;;  %v1062_v21 = vrot.slane %v9420_v40, 5  ;;  %v1073_v33 = vrot.slane %v9472_v30, 5  ;;  %v1004_v56 = vld [vmem:[%s9306_s17 + $0x60] sm:$0xe] }
  0x68   : > { %8146 = vmatmul.mubr.bf16.gmra.mxu0 %v7103_v49  ;;  %8293 = vmatprep.subr.bf16.mxu1 %v8861_v50  ;;  %v7158_v20 = vcombine.low %v1046_v59, %v1049_v8  ;;  %v7134_v25 = vrot.slane %v1000_v12, 9  ;;  %v1061_v16 = vrot.slane %v1059_v10, 4  ;;  %v7135_v28 = vrot.slane %v1001_v19, 9  ;;  %v8865_v55 = vld [vmem:[%s9306_s17 + $0x48] sm:$0xff]   ;;  %v8869_v49 = vld [vmem:[%s9306_s17 + $0x54] sm:$0xff]  }
  0x69   : > { %8182 = vmatmul.mubr.bf16.gmra.mxu1 %v7121_v58  ;;  %8201 = vmatprep.mubr.bf16.mxu0 %v7156_v60  ;;  %v1068_v40 = vrot.slane %v1066_v17, 4  ;;  %v1069_v30 = vrot.slane %v9441_v1, 5  ;;  %v1053_v36 = vsel %vm9577_vm5, %v7133_v6, %v1052_v63  ;;  %v1056_v37 = vsel %vm9577_vm5, %v1054_v5, %v1055_v7  ;;  %v8867_v60 = vld [vmem:[%s11783_s1 + $0x118] sm:$0xff]   ;;  %v8870_v5 = vld [vmem:[%s11783_s1 + $0x110] sm:$0xff]   ;;  %v7228_v12 = vld [vmem:[%s9306_s17 + $0xc] sm:$0xf] }
  0x6a   : > { %8237 = vmatprep.mubr.bf16.mxu1 %v8855_v45  ;;  %v1075_v44 = vrot.slane %v1073_v33, 4  ;;  %v1076_v58 = vrot.slane %v9475_v32, 5  ;;  %v1060_v46 = vsel %vm9577_vm5, %v7134_v25, %v1059_v10  ;;  %v1063_v1 = vsel %vm9577_vm5, %v1061_v16, %v1062_v21  ;;  %v8871_v21 = vld [vmem:[%s9306_s17 + $0x60] sm:$0xff]  }
  0x6b   : > { %v1080_v51 = vrot.slane %v9487_v41, 5  ;;  %v7159_v45 = vcombine.low %v1053_v36, %v1056_v37  ;;  %v7136_v52 = vrot.slane %v1002_v38, 9  ;;  %v1087_v32 = vrot.slane %v9526_v29, 5  ;;  %v7232_v36 = vld [vmem:[%s9306_s17 + $0x1c] sm:$0xf] }
  0x6c   : > { %v7160_v53 = vcombine.low %v1060_v46, %v1063_v1  ;;  %v1083_v23 = vrot.slane %v9492_v31, 5  ;;  %v7137_v41 = vrot.slane %v1003_v47, 9  ;;  %v1067_v13 = vsel %vm9577_vm5, %v7135_v28, %v1066_v17  ;;  %v9714_v17 = vld [vmem:[%s9306_s17 + $0x10] sm:$0xf]  ;;  %v9740_v37 = vld [vmem:[%s9306_s17 + $0x20] sm:$0x1] }
  0x6d   : > { %v1082_v54 = vrot.slane %v1080_v51, 4  ;;  %v1070_v29 = vsel %vm9577_vm5, %v1068_v40, %v1069_v30  ;;  %v1094_v31 = vrot.slane %v9539_v43, 5  ;;  %v1074_v61 = vsel %vm9577_vm5, %v7136_v52, %v1073_v33  ;;  %v8877_v33 = vld [vmem:[%s11783_s1 + $0x148] sm:$0xff]   ;;  %v8879_v52 = vld [vmem:[%s11783_s1 + $0x140] sm:$0xff]  }
  0x6e   : > { %v1077_v62 = vsel %vm9577_vm5, %v1075_v44, %v1076_v58  ;;  %v1089_v24 = vrot.slane %v1087_v32, 4  ;;  %v1090_v63 = vrot.slane %v9529_v34, 5  ;;  %v7138_v43 = vrot.slane %v1004_v56, 9  ;;  %v8875_v1 = vld [vmem:[%s9306_s17 + $0x6c] sm:$0xff]  }
  0x6f   : > { %v1096_v3 = vrot.slane %v1094_v31, 4  ;;  %v7161_v6 = vcombine.low %v1067_v13, %v1070_v29  ;;  %v7162_v7 = vcombine.low %v1074_v61, %v1077_v62  ;;  %v9684_v59 = vsel %vm9577_vm5, %v7137_v41, %v1080_v51  ;;  %v8878_v62 = vld [vmem:[%s11783_s1 + $0x100] sm:$0xff]  }
  0x70   : > { %8202 = vmatmul.mubr.bf16.vlgmr.msra.gmra.mxu0 %v7157_v0  ;;  %v9688_v34 = vsel %vm9577_vm5, %v1082_v54, %v1083_v23  ;;  %v9695_v8 = vsel %vm9577_vm5, %v1089_v24, %v1090_v63  ;;  %v9717_v0 = vld [vmem:[%s9306_s17 + $0x14] sm:$0x1]  ;;  %v1650_v19 = vshll.u32 %v7228_v12, 16  ;;  %v1656_v25 = vshll.u32 %v9714_v17, 16  ;;  %v7292_v23 = vld [vmem:[%s9306_s17 + $0xc] sm:$0xe] }
  0x71   : > { %8238 = vmatmul.mubr.bf16.vlgmr.msra.gmra.mxu1 %v8856_v4  ;;  %8258 = vmatpush3.bf16.msra.mxu0 %v9571_v15  ;;  %v8868_v15 = vld [vmem:[%s11783_s1 + $0x160] sm:$0xff]   ;;  %v1097_v4 = vrot.slane %v9542_v48, 5  ;;  %v8874_v48 = vld [vmem:[%s11783_s1 + $0x150] sm:$0xff]   ;;  %v1660_v16 = vshrl.u32 %v9714_v17, 16  ;;  %v1680_v51 = vshll.u32 %v7232_v36, 16  ;;  %v2166_v41 = vrot.slane %v9714_v17, 5 }
  0x72   : > { %8241 = vmatprep.mubr.bf16.mxu1 %v8858_v9  ;;  %8294 = vmatpush3.bf16.msra.mxu1 %v8861_v50  ;;  %v1005_v50 = vld [vmem:[%s9306_s17 + $0x6c] sm:$0xe]  ;;  %v9702_v9 = vsel %vm9577_vm5, %v7138_v43, %v1087_v32  ;;  %v1658_v38 = vrot.slane %v1656_v25, 5  ;;  %v8876_v43 = vld [vmem:[%s9306_s17 + $0x78] sm:$0xff]   ;;  %v9779_v17 = vld [vmem:[%s9306_s17 + $0x2c] sm:$0x1] }
  0x73   : > { %8295 = vmatprep.subr.bf16.mxu1 %v8862_v11  ;;  %8205 = vmatprep.mubr.bf16.mxu0 %v7158_v20  ;;  %v7139_v2 = vrot.slane %v1005_v50, 9  ;;  %v7163_v20 = vcombine.low %v9684_v59, %v9688_v34  ;;  %v7164_v28 = vcombine.low %v9702_v9, %v9695_v8  ;;  %v1662_v44 = vrot.slane %v1660_v16, 4  ;;  %v9766_v59 = vld [vmem:[%s11783_s1 + $0x1f8] sm:$0xff]  }
  0x74   : > { %8259 = vmatprep.subr.bf16.mxu0 %v8857_v18  ;;  %v1682_v29 = vrot.slane %v1680_v51, 5  ;;  %v2168_v61 = vrot.slane %v2166_v41, 4  ;;  %v2169_v50 = vrot.slane %v9717_v0, 5 }
  0x75   : > { %8260 = vmatpush3.bf16.msra.mxu0 %v8857_v18  ;;  %v9706_v10 = vsel %vm9577_vm5, %v7139_v2, %v1094_v31  ;;  %v1647_v18 = vshrl.u32 %v7228_v12, 16  ;;  %v1663_v32 = vor.u32 %v1662_v44, %v1658_v38  ;;  %v9776_v12 = vld [vmem:[%s9306_s17 + $0x28] sm:$0xf] }
  0x76   : > { %8296 = vmatpush3.bf16.msra.mxu1 %v8862_v11  ;;  %8261 = vmatprep.subr.bf16.mxu0 %v8860_v27  ;;  %v9710_v11 = vsel %vm9577_vm5, %v1096_v3, %v1097_v4  ;;  %v2170_v9 = vsel %vm9577_vm5, %v2168_v61, %v2169_v50 }
  0x77   : > { %8297 = vmatprep.subr.bf16.mxu1 %v8866_v57  ;;  %v7165_v40 = vcombine.low %v9706_v10, %v9710_v11  ;;  %v1649_v30 = vrot.slane %v1647_v18, 4  ;;  %v1664_v56 = vrot.slane %v1663_v32, 4  ;;  %v2183_v10 = vrot.slane %v9779_v17, 5 }
  0x78   : > { %8206 = vmatmul.mubr.bf16.gmra.mxu0 %v7159_v45  ;;  %v1684_v45 = vshrl.u32 %v7232_v36, 16 }
  0x79   : > { %8242 = vmatmul.mubr.bf16.gmra.mxu1 %v8859_v26  ;;  %8262 = vmatpush3.bf16.msra.mxu0 %v8860_v27  ;;  %v1666_v26 = vshll.u32 %v9717_v0, 16  ;;  %v9732_v27 = vld [vmem:[%s11783_s1 + $0x108] sm:$0xff]  }
  0x7a   : > { %8245 = vmatprep.mubr.bf16.mxu1 %v8864_v35  ;;  %8298 = vmatpush3.bf16.msra.mxu1 %v8866_v57  ;;  %v7231_v57 = vld [vmem:[%s9306_s17 + $0x18] sm:$0xf]  ;;  %v1652_v35 = vrot.slane %v1650_v19, 5 }
  0x7b   : > { %8299 = vmatprep.subr.bf16.mxu1 %v8868_v15  ;;  %8209 = vmatprep.mubr.bf16.mxu0 %v7160_v53  ;;  %v1668_v58 = vrot.slane %v1666_v26, 5  ;;  %v1671_v46 = vshrl.u32 %v7231_v57, 16  ;;  %v1674_v47 = vshll.u32 %v7231_v57, 16 }
  0x7c   : > { %8263 = vmatprep.subr.bf16.mxu0 %v8863_v42 }
  0x7d   : > { %8264 = vmatpush3.bf16.msra.mxu0 %v8863_v42  ;;  %v1673_v53 = vrot.slane %v1671_v46, 4  ;;  %v1690_v42 = vshll.u32 %v9740_v37, 16  ;;  %v1676_v13 = vrot.slane %v1674_v47, 5  ;;  %v1669_v2 = vsel %vm9350_vm2, %v1664_v56, %v1668_v58 }
  0x7e   : > { %8300 = vmatpush3.bf16.msra.mxu1 %v8868_v15  ;;  %8265 = vmatprep.subr.bf16.mxu0 %v8867_v60  ;;  %v1653_v15 = vor.u32 %v1652_v35, %v1649_v30  ;;  %v1704_v35 = vshll.u32 %v9776_v12, 16  ;;  %v1714_v46 = vshll.u32 %v9779_v17, 16 }
  0x7f   : > { %8301 = vmatprep.subr.bf16.mxu1 %v8872_v22  ;;  %v1692_v31 = vrot.slane %v1690_v42, 5  ;;  %v1677_v24 = vor.u32 %v1676_v13, %v1673_v53  ;;  %v7295_v13 = vld [vmem:[%s9306_s17 + $0x30] sm:$0xe] }
  0x80   : > { %8210 = vmatmul.mubr.bf16.gmra.mxu0 %v7161_v6  ;;  %v1654_v54 = vrot.slane %v1653_v15, 4  ;;  %v2173_v6 = vrot.slane %v7232_v36, 5  ;;  %v1708_v36 = vshrl.u32 %v9776_v12, 16  ;;  %v7305_v11 = vrot.slane %v7295_v13, 9 }
  0x81   : > { %8246 = vmatmul.mubr.bf16.gmra.mxu1 %v8865_v55  ;;  %8266 = vmatpush3.bf16.msra.mxu0 %v8867_v60  ;;  %v1686_v55 = vrot.slane %v1684_v45, 4  ;;  %v7302_v60 = vrot.slane %v7292_v23, 9 }
  0x82   : > { %8249 = vmatprep.mubr.bf16.mxu1 %v8869_v49  ;;  %8302 = vmatpush3.bf16.msra.mxu1 %v8872_v22  ;;  %v7293_v22 = vld [vmem:[%s9306_s17 + $0x18] sm:$0xe]  ;;  %v1659_v49 = vsel %vm9350_vm2, %v1654_v54, %v1658_v38  ;;  %v2175_v19 = vrot.slane %v2173_v6, 4  ;;  %v1710_v15 = vrot.slane %v1708_v36, 4  ;;  %v7296_v36 = vld [vmem:[%s9306_s17 + $0x3c] sm:$0xe] }
  0x83   : > { %8303 = vmatprep.subr.bf16.mxu1 %v8874_v48  ;;  %8213 = vmatprep.mubr.bf16.mxu0 %v7162_v7  ;;  %v1687_v63 = vor.u32 %v1686_v55, %v1682_v29  ;;  %v2167_v3 = vsel %vm9577_vm5, %v7302_v60, %v2166_v41  ;;  %v7303_v4 = vrot.slane %v7293_v22, 9  ;;  %v7234_v7 = vld [vmem:[%s9306_s17 + $0x24] sm:$0xf]  ;;  %v7274_v34 = vcombine.low %v1659_v49, %v1669_v2  ;;  %v7240_v49 = vld [vmem:[%s9306_s17 + $0x3c] sm:$0xf] }
  0x84   : > { %8267 = vmatprep.subr.bf16.mxu0 %v8870_v5  ;;  %v7328_v0 = vcombine.low %v2167_v3, %v2170_v9  ;;  %v1695_v26 = vshrl.u32 %v7234_v7, 16  ;;  %v1698_v57 = vshll.u32 %v7234_v7, 16  ;;  %v8884_v3 = vld [vmem:[%s11783_s1 + $0x1f0] sm:$0xff]   ;;  %v1743_v17 = vshrl.u32 %v7240_v49, 16 }
  0x85   : > { %8268 = vmatpush3.bf16.msra.mxu0 %v8870_v5  ;;  %v1688_v8 = vrot.slane %v1687_v63, 4  ;;  %v9771_v5 = vld [vmem:[%s11783_s1 + $0x1b8] sm:$0xff]   ;;  %v9784_v18 = vsel %vm9577_vm5, %v7303_v4, %v2173_v6  ;;  %v9829_v4 = vld [vmem:[%s9306_s17 + $0x40] sm:$0xf] }
  0x86   : > { %8304 = vmatpush3.bf16.msra.mxu1 %v8874_v48  ;;  %8269 = vmatprep.subr.bf16.mxu0 %v9732_v27  ;;  %v1678_v48 = vrot.slane %v1677_v24, 4  ;;  %v1697_v44 = vrot.slane %v1695_v26, 4  ;;  %v1700_v58 = vrot.slane %v1698_v57, 5  ;;  %v9853_v26 = vld [vmem:[%s9306_s17 + $0x50] sm:$0x1] }
  0x87   : > { %8305 = vmatprep.subr.bf16.mxu1 %v8877_v33  ;;  %v1693_v16 = vsel %vm9350_vm2, %v1688_v8, %v1692_v31  ;;  %v9834_v8 = vld [vmem:[%s9306_s17 + $0x44] sm:$0x1] }
  0x88   : > { %8214 = vmatmul.mubr.bf16.gmra.mxu0 %v7163_v20  ;;  %v2176_v20 = vrot.slane %v9740_v37, 5  ;;  %v1683_v25 = vsel %vm9350_vm2, %v1678_v48, %v1682_v29  ;;  %v7294_v37 = vld [vmem:[%s9306_s17 + $0x24] sm:$0xe]  ;;  %v1701_v45 = vor.u32 %v1700_v58, %v1697_v44  ;;  %v1762_v44 = vshll.u32 %v9834_v8, 16 }
  0x89   : > { %8250 = vmatmul.mubr.bf16.gmra.mxu1 %v8871_v21  ;;  %8217 = vmatprep.mubr.bf16.mxu0 %v7164_v28  ;;  %v7237_v21 = vld [vmem:[%s9306_s17 + $0x30] sm:$0xf]  ;;  %v9798_v28 = vcombine.low %v1683_v25, %v1693_v16  ;;  %v7304_v56 = vrot.slane %v7294_v37, 9  ;;  %v8886_v37 = vld [vmem:[%s11783_s1 + $0x1e8] sm:$0xff]  }
  0x8a   : > { %8253 = vmatprep.mubr.bf16.mxu1 %v8875_v1  ;;  %8306 = vmatpush3.bf16.msra.mxu1 %v8877_v33  ;;  %v9789_v33 = vld [vmem:[%s9306_s17 + $0x34] sm:$0xf]  ;;  %v2177_v30 = vsel %vm9577_vm5, %v2175_v19, %v2176_v20  ;;  %v1706_v1 = vrot.slane %v1704_v35, 5  ;;  %v1719_v47 = vshrl.u32 %v7237_v21, 16  ;;  %v1722_v51 = vshll.u32 %v7237_v21, 16 }
  0x8b   : > { %8307 = vmatprep.subr.bf16.mxu1 %v8879_v52  ;;  %8270 = vmatpush3.bf16.msra.mxu0 %v9732_v27  ;;  %v9796_v27 = vld [vmem:[%s9306_s17 + $0x38] sm:$0x1]  ;;  %v7329_v38 = vcombine.low %v9784_v18, %v2177_v30  ;;  %v1728_v32 = vshll.u32 %v9789_v33, 16  ;;  %v1732_v53 = vshrl.u32 %v9789_v33, 16  ;;  %v1702_v29 = vrot.slane %v1701_v45, 4  ;;  %v8881_v20 = vld [vmem:[%s11783_s1 + $0x1b0] sm:$0xff]  }
  0x8c   : > { %8271 = vmatprep.subr.bf16.mxu0 %v8878_v62  ;;  %v1711_v42 = vor.u32 %v1710_v15, %v1706_v1  ;;  %v1721_v23 = vrot.slane %v1719_v47, 4  ;;  %v1724_v41 = vrot.slane %v1722_v51, 5  ;;  %v1738_v54 = vshll.u32 %v9796_v27, 16  ;;  %v7243_v18 = vld [vmem:[%s9306_s17 + $0x48] sm:$0xf] }
  0x8d   : > { %v1730_v55 = vrot.slane %v1728_v32, 5  ;;  %v1734_v22 = vrot.slane %v1732_v53, 4  ;;  %v1707_v24 = vsel %vm9350_vm2, %v1702_v29, %v1706_v1  ;;  %v2190_v48 = vrot.slane %v9796_v27, 5  ;;  %v9842_v19 = vld [vmem:[%s9306_s17 + $0x4c] sm:$0xf] }
  0x8e   : > { %8308 = vmatpush3.bf16.msra.mxu1 %v8879_v52  ;;  %v1716_v52 = vrot.slane %v1714_v46, 5  ;;  %v1712_v31 = vrot.slane %v1711_v42, 4  ;;  %v1725_v60 = vor.u32 %v1724_v41, %v1721_v23  ;;  %v1740_v61 = vrot.slane %v1738_v54, 5  ;;  %v8888_v41 = vld [vmem:[%s11783_s1 + $0x1e0] sm:$0xff]  }
  0x8f   : > { %8365 = vmatprep.subr.bf16.mxu1 %v9766_v59  ;;  %8272 = vmatpush3.bf16.msra.mxu0 %v8878_v62  ;;  %v2180_v62 = vrot.slane %v9776_v12, 5  ;;  %v1735_v63 = vor.u32 %v1734_v22, %v1730_v55  ;;  %v1745_v27 = vrot.slane %v1743_v17, 4  ;;  %v1752_v35 = vshll.u32 %v9829_v4, 16  ;;  %v7297_v22 = vld [vmem:[%s9306_s17 + $0x48] sm:$0xe] }
  0x90   : > { %8329 = vmatprep.subr.bf16.mxu0 %v9771_v5  ;;  %8218 = vmatmul.mubr.bf16.gmra.mxu0 %v7165_v40  ;;  %v1717_v40 = vsel %vm9350_vm2, %v1712_v31, %v1716_v52  ;;  %v1726_v50 = vrot.slane %v1725_v60, 4  ;;  %v1767_v58 = vshrl.u32 %v7243_v18, 16  ;;  %v1770_v47 = vshll.u32 %v7243_v18, 16 }
  0x91   : > { %8254 = vmatmul.mubr.bf16.gmra.mxu1 %v8876_v43  ;;  %8273 = vmatprep.mubr.bf16.mxu0 %v7274_v34  ;;  %v2181_v43 = vsel %vm9577_vm5, %v7304_v56, %v2180_v62  ;;  %v2182_v2 = vrot.slane %v2180_v62, 4  ;;  %v7276_v6 = vcombine.low %v1707_v24, %v1717_v40  ;;  %v1736_v7 = vrot.slane %v1735_v63, 4  ;;  %v7246_v62 = vld [vmem:[%s9306_s17 + $0x54] sm:$0xf]  ;;  %v8885_v24 = vld [vmem:[%s11783_s1 + $0x1a0] sm:$0xff]  }
  0x92   : > { %8309 = vmatprep.mubr.bf16.mxu1 %v7328_v0  ;;  %v2187_v34 = vrot.slane %v9789_v33, 5  ;;  %v1731_v9 = vsel %vm9350_vm2, %v1726_v50, %v1730_v55  ;;  %v1746_v0 = vshll.u32 %v7240_v49, 16  ;;  %v1754_v15 = vrot.slane %v1752_v35, 5  ;;  %v9887_v40 = vld [vmem:[%s9306_s17 + $0x58] sm:$0xf] }
  0x93   : > { %v2184_v12 = vsel %vm9577_vm5, %v2182_v2, %v2183_v10  ;;  %v1741_v21 = vsel %vm9350_vm2, %v1736_v7, %v1740_v61  ;;  %v1764_v45 = vrot.slane %v1762_v44, 5  ;;  %v1769_v52 = vrot.slane %v1767_v58, 4  ;;  %v9890_v50 = vld [vmem:[%s9306_s17 + $0x5c] sm:$0x1] }
  0x94   : > { %v7330_v33 = vcombine.low %v2181_v43, %v2184_v12  ;;  %v2188_v25 = vsel %vm9577_vm5, %v7305_v11, %v2187_v34  ;;  %v2189_v16 = vrot.slane %v2187_v34, 4  ;;  %v7277_v57 = vcombine.low %v1731_v9, %v1741_v21  ;;  %v8890_v7 = vld [vmem:[%s11783_s1 + $0x1d8] sm:$0xff]  }
  0x95   : > { %v1748_v30 = vrot.slane %v1746_v0, 5  ;;  %v1776_v32 = vshll.u32 %v9842_v19, 16  ;;  %v1772_v42 = vrot.slane %v1770_v47, 5  ;;  %v1786_v23 = vshll.u32 %v9853_v26, 16 }
  0x96   : > { %v7306_v29 = vrot.slane %v7296_v36, 9  ;;  %v2194_v55 = vrot.slane %v9829_v4, 5  ;;  %v2197_v11 = vrot.slane %v9834_v8, 5  ;;  %v2204_v8 = vrot.slane %v9853_v26, 5  ;;  %v9913_v26 = vld [vmem:[%s9306_s17 + $0x68] sm:$0x1] }
  0x97   : > { %v1749_v1 = vor.u32 %v1748_v30, %v1745_v27  ;;  %v1778_v13 = vrot.slane %v1776_v32, 5  ;;  %v1773_v31 = vor.u32 %v1772_v42, %v1769_v52  ;;  %v1788_v61 = vrot.slane %v1786_v23, 5  ;;  %v8889_v32 = vld [vmem:[%s11783_s1 + $0x190] sm:$0xff]  }
  0x98   : > { %8274 = vmatmul.mubr.bf16.vlgmr.msra.gmra.mxu0 %v9798_v28  ;;  %v8882_v28 = vld [vmem:[%s11783_s1 + $0x1a8] sm:$0xff]   ;;  %v2195_v63 = vsel %vm9577_vm5, %v7306_v29, %v2194_v55  ;;  %v2196_v10 = vrot.slane %v2194_v55, 4  ;;  %v1791_v9 = vshrl.u32 %v7246_v62, 16  ;;  %v1800_v30 = vshll.u32 %v9887_v40, 16 }
  0x99   : > { %8310 = vmatmul.mubr.bf16.vlgmr.msra.gmra.mxu1 %v7329_v38  ;;  %v2191_v38 = vsel %vm9577_vm5, %v2189_v16, %v2190_v48  ;;  %8330 = vmatpush3.bf16.msra.mxu0 %v9771_v5  ;;  %v1750_v53 = vrot.slane %v1749_v1, 4  ;;  %v1780_v5 = vshrl.u32 %v9842_v19, 16  ;;  %v1774_v43 = vrot.slane %v1773_v31, 4 }
  0x9a   : > { %8366 = vmatpush3.bf16.msra.mxu1 %v9766_v59  ;;  %8313 = vmatprep.mubr.bf16.mxu1 %v7330_v33  ;;  %v1756_v59 = vshrl.u32 %v9829_v4, 16  ;;  %v7331_v46 = vcombine.low %v2188_v25, %v2191_v38  ;;  %v2201_v4 = vrot.slane %v9842_v19, 5  ;;  %v2198_v48 = vsel %vm9577_vm5, %v2196_v10, %v2197_v11  ;;  %v9905_v19 = vld [vmem:[%s9306_s17 + $0x64] sm:$0xf]  ;;  %v8887_v33 = vld [vmem:[%s11783_s1 + $0x198] sm:$0xff]   ;;  %v8891_v10 = vld [vmem:[%s11783_s1 + $0x188] sm:$0xff]  }
  0x9b   : > { %8367 = vmatprep.subr.bf16.mxu1 %v8884_v3  ;;  %8277 = vmatprep.mubr.bf16.mxu0 %v7276_v6  ;;  %v1755_v56 = vsel %vm9350_vm2, %v1750_v53, %v1754_v15  ;;  %v1782_v60 = vrot.slane %v1780_v5, 4  ;;  %v7249_v6 = vld [vmem:[%s9306_s17 + $0x60] sm:$0xf]  ;;  %v1779_v17 = vsel %vm9350_vm2, %v1774_v43, %v1778_v13  ;;  %v7332_v18 = vcombine.low %v2195_v63, %v2198_v48  ;;  %v7252_v11 = vld [vmem:[%s9306_s17 + $0x6c] sm:$0xf] }
  0x9c   : > { %8331 = vmatprep.subr.bf16.mxu0 %v8881_v20  ;;  %v1758_v51 = vrot.slane %v1756_v59, 4  ;;  %v2203_v21 = vrot.slane %v2201_v4, 4  ;;  %v1793_v25 = vrot.slane %v1791_v9, 4  ;;  %v1794_v16 = vshll.u32 %v7246_v62, 16  ;;  %v7255_v9 = vld [vmem:[%s9306_s17 + $0x78] sm:$0xf] }
  0x9d   : > { %8332 = vmatpush3.bf16.msra.mxu0 %v8881_v20  ;;  %v1783_v2 = vor.u32 %v1782_v60, %v1778_v13  ;;  %v1804_v35 = vshrl.u32 %v9887_v40, 16  ;;  %v1810_v36 = vshll.u32 %v9890_v50, 16  ;;  %v1815_v58 = vshrl.u32 %v7249_v6, 16 }
  0x9e   : > { %8368 = vmatpush3.bf16.msra.mxu1 %v8884_v3  ;;  %v1759_v54 = vor.u32 %v1758_v51, %v1754_v15  ;;  %8333 = vmatprep.subr.bf16.mxu0 %v8882_v28  ;;  %v7307_v3 = vrot.slane %v7297_v22, 9  ;;  %v2205_v59 = vsel %vm9577_vm5, %v2203_v21, %v2204_v8  ;;  %v1796_v44 = vrot.slane %v1794_v16, 5  ;;  %v7299_v22 = vld [vmem:[%s9306_s17 + $0x60] sm:$0xe]  ;;  %v9971_v16 = vld [vmem:[%s9306_s17 + $0x80] sm:$0x1] }
  0x9f   : > { %8369 = vmatprep.subr.bf16.mxu1 %v8886_v37  ;;  %v1784_v0 = vrot.slane %v1783_v2, 4  ;;  %v1802_v1 = vrot.slane %v1800_v30, 5  ;;  %v1806_v15 = vrot.slane %v1804_v35, 4  ;;  %v1812_v47 = vrot.slane %v1810_v36, 5 }
  0xa0   : > { %v1760_v49 = vrot.slane %v1759_v54, 4  ;;  %8278 = vmatmul.mubr.bf16.gmra.mxu0 %v7277_v57  ;;  %v2202_v20 = vsel %vm9577_vm5, %v7307_v3, %v2201_v4  ;;  %v7298_v57 = vld [vmem:[%s9306_s17 + $0x54] sm:$0xe]  ;;  %v1817_v51 = vrot.slane %v1815_v58, 4  ;;  %v1824_v52 = vshll.u32 %v9905_v19, 16 }
  0xa1   : > { %8314 = vmatmul.mubr.bf16.gmra.mxu1 %v7331_v46  ;;  %8334 = vmatpush3.bf16.msra.mxu0 %v8882_v28  ;;  %v1789_v27 = vsel %vm9350_vm2, %v1784_v0, %v1788_v61  ;;  %v7333_v46 = vcombine.low %v2202_v20, %v2205_v59  ;;  %v1797_v28 = vor.u32 %v1796_v44, %v1793_v25  ;;  %v1828_v42 = vshrl.u32 %v9905_v19, 16  ;;  %v9953_v4 = vld [vmem:[%s9306_s17 + $0x70] sm:$0xf] }
  0xa2   : > { %8370 = vmatpush3.bf16.msra.mxu1 %v8886_v37  ;;  %v1765_v34 = vsel %vm9350_vm2, %v1760_v49, %v1764_v45  ;;  %8335 = vmatprep.subr.bf16.mxu0 %v8885_v24  ;;  %v8892_v37 = vld [vmem:[%s11783_s1 + $0x1d0] sm:$0xff]   ;;  %v7279_v38 = vcombine.low %v1779_v17, %v1789_v27  ;;  %v1818_v45 = vshll.u32 %v7249_v6, 16  ;;  %v1807_v53 = vor.u32 %v1806_v15, %v1802_v1 }
  0xa3   : > { %8371 = vmatprep.subr.bf16.mxu1 %v8888_v41  ;;  %v7278_v12 = vcombine.low %v1755_v56, %v1765_v34  ;;  %8317 = vmatprep.mubr.bf16.mxu1 %v7332_v18  ;;  %v1834_v5 = vshll.u32 %v9913_v26, 16  ;;  %v7308_v23 = vrot.slane %v7298_v57, 9  ;;  %v1798_v54 = vrot.slane %v1797_v28, 4  ;;  %v9956_v6 = vld [vmem:[%s9306_s17 + $0x74] sm:$0x1]  ;;  %v8894_v57 = vld [vmem:[%s11783_s1 + $0x180] sm:$0xff]  }
  0xa4   : > { %v1820_v13 = vrot.slane %v1818_v45, 5  ;;  %v1826_v29 = vrot.slane %v1824_v52, 5  ;;  %v2208_v55 = vrot.slane %v9887_v40, 5  ;;  %v1808_v56 = vrot.slane %v1807_v53, 4  ;;  %v8895_v40 = vld [vmem:[%s11783_s1 + $0x1c0] sm:$0xff]  }
  0xa5   : > { %8281 = vmatprep.mubr.bf16.mxu0 %v7278_v12  ;;  %8336 = vmatpush3.bf16.msra.mxu0 %v8885_v24  ;;  %v1830_v31 = vrot.slane %v1828_v42, 4  ;;  %v1836_v60 = vrot.slane %v1834_v5, 5  ;;  %v2211_v61 = vrot.slane %v9890_v50, 5  ;;  %v1803_v62 = vsel %vm9350_vm2, %v1798_v54, %v1802_v1 }
  0xa6   : > { %8372 = vmatpush3.bf16.msra.mxu1 %v8888_v41  ;;  %8337 = vmatprep.subr.bf16.mxu0 %v8887_v33  ;;  %v8893_v41 = vld [vmem:[%s11783_s1 + $0x1c8] sm:$0xff]   ;;  %v1821_v49 = vor.u32 %v1820_v13, %v1817_v51  ;;  %v2209_v24 = vsel %vm9577_vm5, %v7308_v23, %v2208_v55  ;;  %v2210_v63 = vrot.slane %v2208_v55, 4  ;;  %v1813_v50 = vsel %vm9350_vm2, %v1808_v56, %v1812_v47  ;;  %v7301_v47 = vld [vmem:[%s9306_s17 + $0x78] sm:$0xe] }
  0xa7   : > { %8373 = vmatprep.subr.bf16.mxu1 %v8890_v7  ;;  %v1831_v43 = vor.u32 %v1830_v31, %v1826_v29  ;;  %v7309_v2 = vrot.slane %v7299_v22, 9  ;;  %v2215_v3 = vrot.slane %v9905_v19, 5  ;;  %v2218_v8 = vrot.slane %v9913_v26, 5  ;;  %v9965_v19 = vld [vmem:[%s9306_s17 + $0x7c] sm:$0xf] }
  0xa8   : > { %8282 = vmatmul.mubr.bf16.gmra.mxu0 %v7279_v38  ;;  %v1822_v34 = vrot.slane %v1821_v49, 4  ;;  %v2212_v48 = vsel %vm9577_vm5, %v2210_v63, %v2211_v61  ;;  %v1839_v21 = vshrl.u32 %v7252_v11, 16  ;;  %v1848_v25 = vshll.u32 %v9953_v4, 16  ;;  %v7300_v26 = vld [vmem:[%s9306_s17 + $0x6c] sm:$0xe] }
  0xa9   : > { %8318 = vmatmul.mubr.bf16.gmra.mxu1 %v7333_v46  ;;  %8338 = vmatpush3.bf16.msra.mxu0 %v8887_v33  ;;  %v1832_v12 = vrot.slane %v1831_v43, 4  ;;  %v7334_v17 = vcombine.low %v2209_v24, %v2212_v48  ;;  %v2216_v0 = vsel %vm9577_vm5, %v7309_v2, %v2215_v3  ;;  %v2217_v18 = vrot.slane %v2215_v3, 4  ;;  %v7400_v24 = vld [vmem:[%s9306_s17 + $0x18] sm:$0xf]  ;;  %v10007_v43 = vld [vmem:[%s9306_s17 + $0x20] sm:$0x1] }
  0xaa   : > { %8374 = vmatpush3.bf16.msra.mxu1 %v8890_v7  ;;  %8339 = vmatprep.subr.bf16.mxu0 %v8889_v32  ;;  %v7280_v7 = vcombine.low %v1803_v62, %v1813_v50  ;;  %v1827_v20 = vsel %vm9350_vm2, %v1822_v34, %v1826_v29  ;;  %v1842_v33 = vshll.u32 %v7252_v11, 16  ;;  %v1852_v35 = vshrl.u32 %v9953_v4, 16  ;;  %v10004_v50 = vld [vmem:[%s9306_s17 + $0x1c] sm:$0xf]  ;;  %v10012_v34 = vld [vmem:[%s9306_s17 + $0x28] sm:$0xf] }
  0xab   : > { %8375 = vmatprep.subr.bf16.mxu1 %v8892_v37  ;;  %v1837_v27 = vsel %vm9350_vm2, %v1832_v12, %v1836_v60  ;;  %8321 = vmatprep.mubr.bf16.mxu1 %v7334_v17  ;;  %v2219_v30 = vsel %vm9577_vm5, %v2217_v18, %v2218_v8  ;;  %v1858_v36 = vshll.u32 %v9956_v6, 16  ;;  %v1841_v59 = vrot.slane %v1839_v21, 4 }
  0xac   : > { %8285 = vmatprep.mubr.bf16.mxu0 %v7280_v7  ;;  %v7335_v38 = vcombine.low %v2216_v0, %v2219_v30  ;;  %v1844_v44 = vrot.slane %v1842_v33, 5  ;;  %v1850_v58 = vrot.slane %v1848_v25, 5  ;;  %v1854_v46 = vrot.slane %v1852_v35, 4  ;;  %v7403_v7 = vld [vmem:[%s9306_s17 + $0x24] sm:$0xf] }
  0xad   : > { %8340 = vmatpush3.bf16.msra.mxu0 %v8889_v32  ;;  %v1860_v1 = vrot.slane %v1858_v36, 5  ;;  %v1863_v15 = vshrl.u32 %v7255_v9, 16  ;;  %v1866_v51 = vshll.u32 %v7255_v9, 16  ;;  %v1872_v45 = vshll.u32 %v9965_v19, 16  ;;  %v9989_v32 = vld [vmem:[%s11783_s1 + $0x238] sm:$0xff]  }
  0xae   : > { %8376 = vmatpush3.bf16.msra.mxu1 %v8892_v37  ;;  %8341 = vmatprep.subr.bf16.mxu0 %v8891_v10  ;;  %v7281_v37 = vcombine.low %v1827_v20, %v1837_v27  ;;  %v1845_v28 = vor.u32 %v1844_v44, %v1841_v59  ;;  %v1876_v52 = vshrl.u32 %v9965_v19, 16  ;;  %v1855_v53 = vor.u32 %v1854_v46, %v1850_v58  ;;  %v10029_v35 = vld [vmem:[%s9306_s17 + $0x2c] sm:$0x1]  ;;  %v7406_v44 = vld [vmem:[%s9306_s17 + $0x30] sm:$0xf] }
  0xaf   : > { %8377 = vmatprep.subr.bf16.mxu1 %v8893_v41  ;;  %v1865_v42 = vrot.slane %v1863_v15, 4  ;;  %v1882_v5 = vshll.u32 %v9971_v16, 16  ;;  %v7310_v23 = vrot.slane %v7300_v26, 9  ;;  %v1868_v54 = vrot.slane %v1866_v51, 5 }
  0xb0   : > { %8286 = vmatmul.mubr.bf16.gmra.mxu0 %v7281_v37  ;;  %v1874_v13 = vrot.slane %v1872_v45, 5  ;;  %v1878_v29 = vrot.slane %v1876_v52, 4  ;;  %v1856_v55 = vrot.slane %v1855_v53, 4  ;;  %v2222_v56 = vrot.slane %v9953_v4, 5  ;;  %v10039_v53 = vld [vmem:[%s9306_s17 + $0x38] sm:$0x1] }
  0xb1   : > { %8342 = vmatpush3.bf16.msra.mxu0 %v8891_v10  ;;  %8322 = vmatmul.mubr.bf16.gmra.mxu1 %v7335_v38  ;;  %v1884_v22 = vrot.slane %v1882_v5, 5  ;;  %v2225_v31 = vrot.slane %v9956_v6, 5  ;;  %v1869_v61 = vor.u32 %v1868_v54, %v1865_v42  ;;  %v7311_v49 = vrot.slane %v7301_v47, 9  ;;  %v10035_v47 = vld [vmem:[%s9306_s17 + $0x34] sm:$0xf]  ;;  %v8897_v42 = vld [vmem:[%s9306_s17 + $0x24] sm:$0xff]  }
  0xb2   : > { %8378 = vmatpush3.bf16.msra.mxu1 %v8893_v41  ;;  %8343 = vmatprep.subr.bf16.mxu0 %v8894_v57  ;;  %v1846_v41 = vrot.slane %v1845_v28, 4  ;;  %v1879_v62 = vor.u32 %v1878_v29, %v1874_v13  ;;  %v1861_v63 = vsel %vm9350_vm2, %v1856_v55, %v1860_v1  ;;  %v2223_v10 = vsel %vm9577_vm5, %v7310_v23, %v2222_v56 }
  0xb3   : > { %8379 = vmatprep.subr.bf16.mxu1 %v8895_v40  ;;  %v2224_v11 = vrot.slane %v2222_v56, 4  ;;  %v1870_v3 = vrot.slane %v1869_v61, 4  ;;  %v2232_v6 = vrot.slane %v9971_v16, 5  ;;  %v2782_v12 = vshrl.u32 %v7400_v24, 16  ;;  %v8900_v56 = vld [vmem:[%s9306_s17 + $0x30] sm:$0xff]  }
  0xb4   : > { %v1851_v60 = vsel %vm9350_vm2, %v1846_v41, %v1850_v58  ;;  %v1880_v4 = vrot.slane %v1879_v62, 4  ;;  %v2785_v20 = vshll.u32 %v7400_v24, 16  ;;  %v2791_v16 = vshll.u32 %v10004_v50, 16 }
  0xb5   : > { %8344 = vmatpush3.bf16.msra.mxu0 %v8894_v57  ;;  %v7282_v2 = vcombine.low %v1851_v60, %v1861_v63  ;;  %v2226_v48 = vsel %vm9577_vm5, %v2224_v11, %v2225_v31  ;;  %v1875_v17 = vsel %vm9350_vm2, %v1870_v3, %v1874_v13  ;;  %v2784_v25 = vrot.slane %v2782_v12, 4  ;;  %v7409_v13 = vld [vmem:[%s9306_s17 + $0x3c] sm:$0xf]  ;;  %v10051_v63 = vld [vmem:[%s9306_s17 + $0x40] sm:$0xf] }
  0xb6   : > { %8380 = vmatpush3.bf16.msra.mxu1 %v8895_v40  ;;  %8401 = vmatprep.subr.bf16.mxu0 %v9989_v32  ;;  %v2229_v40 = vrot.slane %v9965_v19, 5  ;;  %v1885_v0 = vsel %vm9350_vm2, %v1880_v4, %v1884_v22  ;;  %v7336_v18 = vcombine.low %v2223_v10, %v2226_v48  ;;  %v8896_v19 = vld [vmem:[%s9306_s17 + $0x18] sm:$0xff]   ;;  %v2787_v57 = vrot.slane %v2785_v20, 5  ;;  %v8899_v22 = vld [vmem:[%s11783_s1 + $0x230] sm:$0xff]   ;;  %v10055_v3 = vld [vmem:[%s9306_s17 + $0x44] sm:$0x1] }
  0xb7   : > { %8289 = vmatprep.mubr.bf16.mxu0 %v7282_v2  ;;  %v7283_v21 = vcombine.low %v1875_v17, %v1885_v0  ;;  %v2795_v27 = vshrl.u32 %v10004_v50, 16  ;;  %v2801_v30 = vshll.u32 %v10007_v43, 16  ;;  %v2793_v36 = vrot.slane %v2791_v16, 5 }
  0xb8   : > { %v2230_v8 = vsel %vm9577_vm5, %v7311_v49, %v2229_v40  ;;  %v2231_v9 = vrot.slane %v2229_v40, 4  ;;  %8325 = vmatprep.mubr.bf16.mxu1 %v7336_v18  ;;  %v2806_v37 = vshrl.u32 %v7403_v7, 16  ;;  %v2809_v38 = vshll.u32 %v7403_v7, 16 }
  0xb9   : > { %8290 = vmatmul.mubr.bf16.gmra.mxu0 %v7283_v21  ;;  %v2815_v59 = vshll.u32 %v10012_v34, 16  ;;  %v2788_v58 = vor.u32 %v2787_v57, %v2784_v25  ;;  %v2797_v46 = vrot.slane %v2795_v27, 4  ;;  %v2803_v1 = vrot.slane %v2801_v30, 5  ;;  %v8902_v21 = vld [vmem:[%s11783_s1 + $0x228] sm:$0xff]  }
  0xba   : > { %v2233_v33 = vsel %vm9577_vm5, %v2231_v9, %v2232_v6  ;;  %8345 = vmatprep.mubr.bf16.mxu0 %v8896_v19  ;;  %v2819_v15 = vshrl.u32 %v10012_v34, 16  ;;  %v2808_v28 = vrot.slane %v2806_v37, 4  ;;  %v2811_v51 = vrot.slane %v2809_v38, 5  ;;  %v10071_v57 = vld [vmem:[%s9306_s17 + $0x4c] sm:$0xf] }
  0xbb   : > { %v7337_v26 = vcombine.low %v2230_v8, %v2233_v33  ;;  %v2817_v45 = vrot.slane %v2815_v59, 5  ;;  %v2825_v52 = vshll.u32 %v10029_v35, 16  ;;  %v2789_v5 = vrot.slane %v2788_v58, 4  ;;  %v10076_v37 = vld [vmem:[%s9306_s17 + $0x50] sm:$0x1]  ;;  %v8901_v59 = vld [vmem:[%s9306_s17 + $0x3c] sm:$0xff]  }
  0xbc   : > { %v2798_v23 = vor.u32 %v2797_v46, %v2793_v36  ;;  %v2821_v41 = vrot.slane %v2819_v15, 4  ;;  %v2830_v54 = vshrl.u32 %v7406_v44, 16  ;;  %v2812_v29 = vor.u32 %v2811_v51, %v2808_v28  ;;  %v7415_v15 = vld [vmem:[%s9306_s17 + $0x54] sm:$0xf] }
  0xbd   : > { %8326 = vmatmul.mubr.bf16.gmra.mxu1 %v7337_v26  ;;  %v2827_v55 = vrot.slane %v2825_v52, 5  ;;  %v2833_v31 = vshll.u32 %v7406_v44, 16  ;;  %v2839_v60 = vshll.u32 %v10035_v47, 16  ;;  %v2794_v61 = vsel %vm9350_vm2, %v2789_v5, %v2793_v36  ;;  %v7412_v26 = vld [vmem:[%s9306_s17 + $0x48] sm:$0xf] }
  0xbe   : > { %v2799_v62 = vrot.slane %v2798_v23, 4  ;;  %v2822_v49 = vor.u32 %v2821_v41, %v2817_v45  ;;  %v2832_v24 = vrot.slane %v2830_v54, 4  ;;  %v2813_v10 = vrot.slane %v2812_v29, 4  ;;  %v8903_v52 = vld [vmem:[%s9306_s17 + $0x48] sm:$0xff]   ;;  %v10084_v5 = vld [vmem:[%s9306_s17 + $0x58] sm:$0xf] }
  0xbf   : > { %v2835_v11 = vrot.slane %v2833_v31, 5  ;;  %v2841_v40 = vrot.slane %v2839_v60, 5  ;;  %v2843_v2 = vshrl.u32 %v10035_v47, 16  ;;  %v2849_v7 = vshll.u32 %v10039_v53, 16  ;;  %v8904_v41 = vld [vmem:[%s11783_s1 + $0x220] sm:$0xff]  }
  0xc0   : > { %v2804_v4 = vsel %vm9350_vm2, %v2799_v62, %v2803_v1  ;;  %v2823_v6 = vrot.slane %v2822_v49, 4  ;;  %v2854_v48 = vshrl.u32 %v7409_v13, 16  ;;  %v2818_v9 = vsel %vm9350_vm2, %v2813_v10, %v2817_v45 }
  0xc1   : > { %8346 = vmatmul.mubr.bf16.vlgmr.msra.gmra.mxu0 %v8897_v42  ;;  %v7446_v8 = vcombine.low %v2794_v61, %v2804_v4  ;;  %v2836_v12 = vor.u32 %v2835_v11, %v2832_v24  ;;  %v2845_v17 = vrot.slane %v2843_v2, 4  ;;  %v2851_v18 = vrot.slane %v2849_v7, 5 }
  0xc2   : > { %8402 = vmatpush3.bf16.msra.mxu0 %v9989_v32  ;;  %v2828_v0 = vsel %vm9350_vm2, %v2823_v6, %v2827_v55  ;;  %8349 = vmatprep.mubr.bf16.mxu0 %v8900_v56  ;;  %v2856_v19 = vrot.slane %v2854_v48, 4  ;;  %v2857_v20 = vshll.u32 %v7409_v13, 16  ;;  %v2863_v32 = vshll.u32 %v10051_v63, 16  ;;  %v10094_v55 = vld [vmem:[%s9306_s17 + $0x5c] sm:$0x1] }
  0xc3   : > { %8381 = vmatprep.mubr.bf16.mxu1 %v7446_v8  ;;  %v7447_v33 = vcombine.low %v2818_v9, %v2828_v0  ;;  %8403 = vmatprep.subr.bf16.mxu0 %v8899_v22  ;;  %v2837_v25 = vrot.slane %v2836_v12, 4  ;;  %v2846_v16 = vor.u32 %v2845_v17, %v2841_v40  ;;  %v2867_v30 = vshrl.u32 %v10051_v63, 16  ;;  %v8906_v8 = vld [vmem:[%s11783_s1 + $0x218] sm:$0xff]  }
  0xc4   : > { %v2859_v27 = vrot.slane %v2857_v20, 5  ;;  %v2873_v36 = vshll.u32 %v10055_v3, 16  ;;  %v2878_v38 = vshrl.u32 %v7412_v26, 16  ;;  %v2865_v46 = vrot.slane %v2863_v32, 5  ;;  %v8905_v12 = vld [vmem:[%s9306_s17 + $0x54] sm:$0xff]  }
  0xc5   : > { %8382 = vmatmul.mubr.bf16.vlgmr.msra.gmra.mxu1 %v7447_v33  ;;  %v2842_v44 = vsel %vm9350_vm2, %v2837_v25, %v2841_v40  ;;  %v2847_v58 = vrot.slane %v2846_v16, 4  ;;  %v2881_v1 = vshll.u32 %v7412_v26, 16  ;;  %v2869_v51 = vrot.slane %v2867_v30, 4  ;;  %v7418_v25 = vld [vmem:[%s9306_s17 + $0x60] sm:$0xf] }
  0xc6   : > { %8404 = vmatpush3.bf16.msra.mxu0 %v8899_v22  ;;  %v2860_v28 = vor.u32 %v2859_v27, %v2856_v19  ;;  %v2875_v45 = vrot.slane %v2873_v36, 5  ;;  %v2880_v42 = vrot.slane %v2878_v38, 4  ;;  %v2887_v13 = vshll.u32 %v10071_v57, 16  ;;  %v10112_v16 = vld [vmem:[%s9306_s17 + $0x64] sm:$0xf] }
  0xc7   : > { %v2852_v23 = vsel %vm9350_vm2, %v2847_v58, %v2851_v18  ;;  %8405 = vmatprep.subr.bf16.mxu0 %v8902_v21  ;;  %v2883_v54 = vrot.slane %v2881_v1, 5  ;;  %v2891_v29 = vshrl.u32 %v10071_v57, 16  ;;  %v2870_v31 = vor.u32 %v2869_v51, %v2865_v46  ;;  %v8907_v30 = vld [vmem:[%s9306_s17 + $0x60] sm:$0xff]   ;;  %v10116_v36 = vld [vmem:[%s9306_s17 + $0x68] sm:$0x1]  ;;  %v8909_v1 = vld [vmem:[%s11783_s1 + $0x210] sm:$0xff]  }
  0xc8   : > { %v7448_v22 = vcombine.low %v2842_v44, %v2852_v23  ;;  %v2861_v56 = vrot.slane %v2860_v28, 4  ;;  %v2897_v60 = vshll.u32 %v10076_v37, 16  ;;  %v2889_v62 = vrot.slane %v2887_v13, 5  ;;  %v10128_v13 = vld [vmem:[%s9306_s17 + $0x70] sm:$0xf] }
  0xc9   : > { %8350 = vmatmul.mubr.bf16.gmra.mxu0 %v8901_v59  ;;  %v2884_v61 = vor.u32 %v2883_v54, %v2880_v42  ;;  %v2893_v49 = vrot.slane %v2891_v29, 4  ;;  %v2902_v24 = vshrl.u32 %v7415_v15, 16  ;;  %v2871_v11 = vrot.slane %v2870_v31, 4 }
  0xca   : > { %8385 = vmatprep.mubr.bf16.mxu1 %v7448_v22  ;;  %v2866_v10 = vsel %vm9350_vm2, %v2861_v56, %v2865_v46  ;;  %8406 = vmatpush3.bf16.msra.mxu0 %v8902_v21  ;;  %v2899_v40 = vrot.slane %v2897_v60, 5  ;;  %v2905_v2 = vshll.u32 %v7415_v15, 16  ;;  %v2911_v48 = vshll.u32 %v10084_v5, 16  ;;  %v10133_v56 = vld [vmem:[%s9306_s17 + $0x74] sm:$0x1] }
  0xcb   : > { %8353 = vmatprep.mubr.bf16.mxu0 %v8903_v52  ;;  %8407 = vmatprep.subr.bf16.mxu0 %v8904_v41  ;;  %v2885_v4 = vrot.slane %v2884_v61, 4  ;;  %v2894_v6 = vor.u32 %v2893_v49, %v2889_v62  ;;  %v2904_v7 = vrot.slane %v2902_v24, 4  ;;  %v2876_v9 = vsel %vm9350_vm2, %v2871_v11, %v2875_v45  ;;  %v7421_v52 = vld [vmem:[%s9306_s17 + $0x6c] sm:$0xf] }
  0xcc   : > { %v2907_v17 = vrot.slane %v2905_v2, 5  ;;  %v2915_v0 = vshrl.u32 %v10084_v5, 16  ;;  %v2921_v18 = vshll.u32 %v10094_v55, 16  ;;  %v7449_v19 = vcombine.low %v2866_v10, %v2876_v9  ;;  %v8910_v61 = vld [vmem:[%s11783_s1 + $0x208] sm:$0xff]  }
  0xcd   : > { %v2890_v20 = vsel %vm9350_vm2, %v2885_v4, %v2889_v62  ;;  %v2895_v21 = vrot.slane %v2894_v6, 4  ;;  %v2913_v33 = vrot.slane %v2911_v48, 5  ;;  %v2926_v38 = vshrl.u32 %v7418_v25, 16 }
  0xce   : > { %8408 = vmatpush3.bf16.msra.mxu0 %v8904_v41  ;;  %v2908_v32 = vor.u32 %v2907_v17, %v2904_v7  ;;  %v2917_v26 = vrot.slane %v2915_v0, 4  ;;  %v2923_v27 = vrot.slane %v2921_v18, 5  ;;  %8386 = vmatmul.mubr.bf16.gmra.mxu1 %v7449_v19  ;;  %v2929_v44 = vshll.u32 %v7418_v25, 16  ;;  %v8913_v19 = vld [vmem:[%s11783_s1 + $0x200] sm:$0xff]   ;;  %v10154_v25 = vld [vmem:[%s9306_s17 + $0x7c] sm:$0xf] }
  0xcf   : > { %v2900_v59 = vsel %vm9350_vm2, %v2895_v21, %v2899_v40  ;;  %8409 = vmatprep.subr.bf16.mxu0 %v8906_v8  ;;  %v2935_v58 = vshll.u32 %v10112_v16, 16  ;;  %v2939_v46 = vshrl.u32 %v10112_v16, 16  ;;  %v2928_v45 = vrot.slane %v2926_v38, 4  ;;  %v8908_v40 = vld [vmem:[%s9306_s17 + $0x6c] sm:$0xff]  }
  0xd0   : > { %v7450_v15 = vcombine.low %v2890_v20, %v2900_v59  ;;  %v2909_v28 = vrot.slane %v2908_v32, 4  ;;  %v2918_v51 = vor.u32 %v2917_v26, %v2913_v33  ;;  %v2931_v42 = vrot.slane %v2929_v44, 5  ;;  %v10157_v32 = vld [vmem:[%s9306_s17 + $0x80] sm:$0x1]  ;;  %v7427_v59 = vld [vmem:[%s9306_s17 + $0x84] sm:$0xf] }
  0xd1   : > { %8354 = vmatmul.mubr.bf16.gmra.mxu0 %v8905_v12  ;;  %v2937_v23 = vrot.slane %v2935_v58, 5  ;;  %v2941_v41 = vrot.slane %v2939_v46, 4  ;;  %v2945_v54 = vshll.u32 %v10116_v36, 16  ;;  %v2950_v31 = vshrl.u32 %v7421_v52, 16  ;;  %v8911_v12 = vld [vmem:[%s9306_s17 + $0x78] sm:$0xff]  }
  0xd2   : > { %8389 = vmatprep.mubr.bf16.mxu1 %v7450_v15  ;;  %v2914_v29 = vsel %vm9350_vm2, %v2909_v28, %v2913_v33  ;;  %v2919_v22 = vrot.slane %v2918_v51, 4  ;;  %8410 = vmatpush3.bf16.msra.mxu0 %v8906_v8  ;;  %v2953_v60 = vshll.u32 %v7421_v52, 16  ;;  %v2932_v62 = vor.u32 %v2931_v42, %v2928_v45  ;;  %v7424_v33 = vld [vmem:[%s9306_s17 + $0x78] sm:$0xf]  ;;  %v10161_v44 = vld [vmem:[%s9306_s17 + $0x88] sm:$0xf] }
  0xd3   : > { %8357 = vmatprep.mubr.bf16.mxu0 %v8907_v30  ;;  %v2942_v49 = vor.u32 %v2941_v41, %v2937_v23  ;;  %v2947_v24 = vrot.slane %v2945_v54, 5  ;;  %8411 = vmatprep.subr.bf16.mxu0 %v8909_v1  ;;  %v2959_v10 = vshll.u32 %v10128_v13, 16  ;;  %v2952_v2 = vrot.slane %v2950_v31, 4  ;;  %v10166_v28 = vld [vmem:[%s9306_s17 + $0x8c] sm:$0x1] }
  0xd4   : > { %v2924_v11 = vsel %vm9350_vm2, %v2919_v22, %v2923_v27  ;;  %v2955_v4 = vrot.slane %v2953_v60, 5  ;;  %v2963_v6 = vshrl.u32 %v10128_v13, 16  ;;  %v2933_v48 = vrot.slane %v2932_v62, 4 }
  0xd5   : > { %v7451_v7 = vcombine.low %v2914_v29, %v2924_v11  ;;  %v2943_v8 = vrot.slane %v2942_v49, 4  ;;  %v2961_v9 = vrot.slane %v2959_v10, 5  ;;  %v2969_v18 = vshll.u32 %v10133_v56, 16  ;;  %v7464_v49 = vld [vmem:[%s9306_s17 + $0x18] sm:$0xe]  ;;  %v8912_v10 = vld [vmem:[%s9306_s17 + $0x84] sm:$0xff]  }
  0xd6   : > { %v2956_v17 = vor.u32 %v2955_v4, %v2952_v2  ;;  %v2965_v0 = vrot.slane %v2963_v6, 4  ;;  %8412 = vmatpush3.bf16.msra.mxu0 %v8909_v1  ;;  %v2938_v20 = vsel %vm9350_vm2, %v2933_v48, %v2937_v23  ;;  %v2974_v58 = vshrl.u32 %v7424_v33, 16 }
  0xd7   : > { %8390 = vmatmul.mubr.bf16.gmra.mxu1 %v7451_v7  ;;  %v2948_v21 = vsel %vm9350_vm2, %v2943_v8, %v2947_v24  ;;  %8413 = vmatprep.subr.bf16.mxu0 %v8910_v61  ;;  %v2971_v38 = vrot.slane %v2969_v18, 5  ;;  %v2977_v46 = vshll.u32 %v7424_v33, 16  ;;  %v2983_v1 = vshll.u32 %v10154_v25, 16  ;;  %v7466_v33 = vld [vmem:[%s9306_s17 + $0x30] sm:$0xe] }
  0xd8   : > { %v7452_v26 = vcombine.low %v2938_v20, %v2948_v21  ;;  %v2957_v27 = vrot.slane %v2956_v17, 4  ;;  %v2966_v30 = vor.u32 %v2965_v0, %v2961_v9  ;;  %v2987_v15 = vshrl.u32 %v10154_v25, 16  ;;  %v7465_v17 = vld [vmem:[%s9306_s17 + $0x24] sm:$0xe] }
  0xd9   : > { %8358 = vmatmul.mubr.bf16.gmra.mxu0 %v8908_v40  ;;  %v2993_v52 = vshll.u32 %v10157_v32, 16  ;;  %v2998_v42 = vshrl.u32 %v7427_v59, 16  ;;  %v2976_v23 = vrot.slane %v2974_v58, 4  ;;  %v2979_v41 = vrot.slane %v2977_v46, 5  ;;  %v7467_v46 = vld [vmem:[%s9306_s17 + $0x3c] sm:$0xe] }
  0xda   : > { %8393 = vmatprep.mubr.bf16.mxu1 %v7452_v26  ;;  %v2962_v51 = vsel %vm9350_vm2, %v2957_v27, %v2961_v9  ;;  %v2967_v45 = vrot.slane %v2966_v30, 4  ;;  %8361 = vmatprep.mubr.bf16.mxu0 %v8911_v12  ;;  %v2985_v54 = vrot.slane %v2983_v1, 5  ;;  %v2989_v29 = vrot.slane %v2987_v15, 4 }
  0xdb   : > { %8414 = vmatpush3.bf16.msra.mxu0 %v8910_v61  ;;  %v2995_v31 = vrot.slane %v2993_v52, 5  ;;  %v3000_v60 = vrot.slane %v2998_v42, 4  ;;  %v3001_v62 = vshll.u32 %v7427_v59, 16  ;;  %v2980_v11 = vor.u32 %v2979_v41, %v2976_v23 }
  0xdc   : > { %v2972_v22 = vsel %vm9350_vm2, %v2967_v45, %v2971_v38  ;;  %8415 = vmatprep.subr.bf16.mxu0 %v8913_v19  ;;  %v2990_v40 = vor.u32 %v2989_v29, %v2985_v54  ;;  %v3007_v2 = vshll.u32 %v10161_v44, 16  ;;  %v3011_v4 = vshrl.u32 %v10161_v44, 16 }
  0xdd   : > { %v7453_v24 = vcombine.low %v2962_v51, %v2972_v22  ;;  %v3003_v61 = vrot.slane %v3001_v62, 5  ;;  %v3017_v6 = vshll.u32 %v10166_v28, 16  ;;  %v7474_v7 = vrot.slane %v7464_v49, 9  ;;  %v7468_v22 = vld [vmem:[%s9306_s17 + $0x48] sm:$0xe] }
  0xde   : > { %v2981_v48 = vrot.slane %v2980_v11, 4  ;;  %v2991_v8 = vrot.slane %v2990_v40, 4  ;;  %v3009_v9 = vrot.slane %v3007_v2, 5  ;;  %v3301_v12 = vrot.slane %v10004_v50, 5 }
  0xdf   : > { %8394 = vmatmul.mubr.bf16.gmra.mxu1 %v7453_v24  ;;  %8416 = vmatpush3.bf16.msra.mxu0 %v8913_v19  ;;  %v3004_v0 = vor.u32 %v3003_v61, %v3000_v60  ;;  %v3013_v18 = vrot.slane %v3011_v4, 4  ;;  %v3019_v20 = vrot.slane %v3017_v6, 5  ;;  %v3304_v21 = vrot.slane %v10007_v43, 5  ;;  %v7469_v24 = vld [vmem:[%s9306_s17 + $0x54] sm:$0xe] }
  0xe0   : > { %v2986_v26 = vsel %vm9350_vm2, %v2981_v48, %v2985_v54  ;;  %v2996_v27 = vsel %vm9350_vm2, %v2991_v8, %v2995_v31  ;;  %v3302_v19 = vsel %vm9577_vm5, %v7474_v7, %v3301_v12  ;;  %v3303_v30 = vrot.slane %v3301_v12, 4  ;;  %v7470_v6 = vld [vmem:[%s9306_s17 + $0x60] sm:$0xe] }
  0xe1   : > { %8362 = vmatmul.mubr.bf16.gmra.mxu0 %v8912_v10  ;;  %v7454_v50 = vcombine.low %v2986_v26, %v2996_v27  ;;  %v3005_v38 = vrot.slane %v3004_v0, 4  ;;  %v3014_v59 = vor.u32 %v3013_v18, %v3009_v9  ;;  %v7475_v58 = vrot.slane %v7465_v17, 9  ;;  %v7472_v0 = vld [vmem:[%s9306_s17 + $0x78] sm:$0xe] }
  0xe2   : > { %v3305_v43 = vsel %vm9577_vm5, %v3303_v30, %v3304_v21  ;;  %v3308_v1 = vrot.slane %v10012_v34, 5  ;;  %v3311_v15 = vrot.slane %v10029_v35, 5  ;;  %v7476_v51 = vrot.slane %v7466_v33, 9  ;;  %v7473_v21 = vld [vmem:[%s9306_s17 + $0x84] sm:$0xe] }
  0xe3   : > { %8397 = vmatprep.mubr.bf16.mxu1 %v7454_v50  ;;  %v3010_v45 = vsel %vm9350_vm2, %v3005_v38, %v3009_v9  ;;  %v3015_v52 = vrot.slane %v3014_v59, 4  ;;  %v7500_v42 = vcombine.low %v3302_v19, %v3305_v43  ;;  %v3315_v23 = vrot.slane %v10035_v47, 5 }
  0xe4   : > { %v3309_v41 = vsel %vm9577_vm5, %v7475_v58, %v3308_v1  ;;  %v3310_v54 = vrot.slane %v3308_v1, 4  ;;  %v3318_v29 = vrot.slane %v10039_v53, 5  ;;  %v3322_v60 = vrot.slane %v10051_v63, 5 }
  0xe5   : > { %v3020_v34 = vsel %vm9350_vm2, %v3015_v52, %v3019_v20  ;;  %8417 = vmatprep.mubr.bf16.mxu0 %v7500_v42  ;;  %v3316_v35 = vsel %vm9577_vm5, %v7476_v51, %v3315_v23  ;;  %v3317_v31 = vrot.slane %v3315_v23, 4  ;;  %v7477_v49 = vrot.slane %v7467_v46, 9 }
  0xe6   : > { %v7455_v62 = vcombine.low %v3010_v45, %v3020_v34  ;;  %v3312_v47 = vsel %vm9577_vm5, %v3310_v54, %v3311_v15  ;;  %v3325_v53 = vrot.slane %v10055_v3, 5  ;;  %v3324_v40 = vrot.slane %v3322_v60, 4  ;;  %v7471_v3 = vld [vmem:[%s9306_s17 + $0x6c] sm:$0xe]  ;;  %s7519_s17 = sshll.u32 %s9117_s21, 3  ;;  %s7740_s21 = sshll.u32 %s6975_s30, 6 }
  0xe7   : > { %v7501_v10 = vcombine.low %v3309_v41, %v3312_v47  ;;  %v3319_v11 = vsel %vm9577_vm5, %v3317_v31, %v3318_v29  ;;  %v7478_v2 = vrot.slane %v7468_v22, 9  ;;  %v3329_v63 = vrot.slane %v10071_v57, 5  ;;  %s7520_s11 = sadd.s32 4294967295, %s7519_s17  ;;  %s11723_s15 = scalar_lea.hbm %s11787_s5, %s7740_s21 }
  0xe8   : > { %8398 = vmatmul.mubr.bf16.gmra.mxu1 %v7455_v62  ;;  %v7502_v61 = vcombine.low %v3316_v35, %v3319_v11  ;;  %v3332_v4 = vrot.slane %v10076_v37, 5  ;;  %v3336_v7 = vrot.slane %v10084_v5, 5  ;;  %v3323_v48 = vsel %vm9577_vm5, %v7477_v49, %v3322_v60 }
  0xe9   : > { %8418 = vmatmul.mubr.bf16.vlgmr.msra.gmra.mxu0 %v7501_v10  ;;  %v3326_v8 = vsel %vm9577_vm5, %v3324_v40, %v3325_v53  ;;  %v3331_v9 = vrot.slane %v3329_v63, 4  ;;  %v3343_v12 = vrot.slane %v10112_v16, 5  ;;  %v3330_v57 = vsel %vm9577_vm5, %v7478_v2, %v3329_v63 }
  0xea   : > { %8421 = vmatprep.mubr.bf16.mxu0 %v7502_v61  ;;  %v7479_v37 = vrot.slane %v7469_v24, 9  ;;  %v3339_v17 = vrot.slane %v10094_v55, 5  ;;  %v7480_v18 = vrot.slane %v7470_v6, 9  ;;  %v3350_v20 = vrot.slane %v10128_v13, 5 }
  0xeb   : > { %v3333_v5 = vsel %vm9577_vm5, %v3331_v9, %v3332_v4  ;;  %v7503_v33 = vcombine.low %v3323_v48, %v3326_v8  ;;  %v3338_v26 = vrot.slane %v3336_v7, 4  ;;  %v3346_v27 = vrot.slane %v10116_v36, 5 }
  0xec   : > { %v7504_v19 = vcombine.low %v3330_v57, %v3333_v5  ;;  %v3345_v16 = vrot.slane %v3343_v12, 4  ;;  %v7481_v30 = vrot.slane %v7471_v3, 9  ;;  %v3352_v50 = vrot.slane %v3350_v20, 4 }
  0xed   : > { %v3353_v38 = vrot.slane %v10133_v56, 5  ;;  %v7482_v59 = vrot.slane %v7472_v0, 9  ;;  %v3357_v55 = vrot.slane %v10154_v25, 5  ;;  %v3360_v58 = vrot.slane %v10157_v32, 5 }
  0xee   : > { %v3364_v46 = vrot.slane %v10161_v44, 5  ;;  %v7483_v13 = vrot.slane %v7473_v21, 9  ;;  %v3367_v43 = vrot.slane %v10166_v28, 5  ;;  %v3337_v36 = vsel %vm9577_vm5, %v7479_v37, %v3336_v7 }
  0xef   : > { %v3340_v1 = vsel %vm9577_vm5, %v3338_v26, %v3339_v17  ;;  %v3359_v15 = vrot.slane %v3357_v55, 4  ;;  %v3344_v25 = vsel %vm9577_vm5, %v7480_v18, %v3343_v12  ;;  %v3347_v32 = vsel %vm9577_vm5, %v3345_v16, %v3346_v27 }
  0xf0   : > { %v3366_v56 = vrot.slane %v3364_v46, 4  ;;  %v7505_v44 = vcombine.low %v3337_v36, %v3340_v1  ;;  %v7506_v51 = vcombine.low %v3344_v25, %v3347_v32  ;;  %v3351_v28 = vsel %vm9577_vm5, %v7481_v30, %v3350_v20 }
  0xf1   : > { %8422 = vmatmul.mubr.bf16.gmra.mxu0 %v7503_v33  ;;  %v3354_v45 = vsel %vm9577_vm5, %v3352_v50, %v3353_v38  ;;  %v3358_v52 = vsel %vm9577_vm5, %v7482_v59, %v3357_v55  ;;  %v3361_v42 = vsel %vm9577_vm5, %v3359_v15, %v3360_v58  ;;  %v3365_v35 = vsel %vm9577_vm5, %v7483_v13, %v3364_v46 }
  0xf2   : > { %8425 = vmatprep.mubr.bf16.mxu0 %v7504_v19  ;;  %v7507_v23 = vcombine.low %v3351_v28, %v3354_v45  ;;  %v7508_v41 = vcombine.low %v3358_v52, %v3361_v42  ;;  %v3368_v31 = vsel %vm9577_vm5, %v3366_v56, %v3367_v43 }
  0xf3   : > { %v7509_v53 = vcombine.low %v3365_v35, %v3368_v31 }
  0xf9   : > { %8426 = vmatmul.mubr.bf16.gmra.mxu0 %v7505_v44 }
  0xfa   : > { %8429 = vmatprep.mubr.bf16.mxu0 %v7506_v51 }
 0x101   : > { %8430 = vmatmul.mubr.bf16.gmra.mxu0 %v7507_v23 }
 0x102   : > { %8433 = vmatprep.mubr.bf16.mxu0 %v7508_v41 }
 0x108   : > { %v8131_v54 = vpop.f32.mrf.mxu0 }
 0x109   : > { %v8167_v29 = vpop.f32.mrf.mxu1  ;;  %8434 = vmatmul.mubr.bf16.gmra.mxu0 %v7509_v53 }
 0x10a   : > { %v926_v22 = vadd.f32 %v8167_v29, %v8131_v54  ;;  %v696_v34 = vpop.f32.mrf.mxu0 }
 0x10b   : > { %v917_v60 = vpop.f32.mrf.mxu1 }
 0x10c   : > { %v918_v62 = vadd.f32 %v917_v60, %v696_v34  ;;  %v8132_v47 = vpop.f32.mrf.mxu0 }
 0x10d   : > { %v8168_v49 = vpop.f32.mrf.mxu1 }
 0x10e   : > { %v929_v24 = vadd.f32 %v8168_v49, %v8132_v47  ;;  %v10255_v10 = vpop.f32.mrf.mxu0 }
 0x10f   : > { %v10257_v11 = vpop.f32.mrf.mxu1 }
 0x110   : > { %v8135_v40 = vpop.f32.mrf.mxu0 }
 0x111   : > { %v8171_v2 = vpop.f32.mrf.mxu1 }
 0x112   : > { %v942_v61 = vadd.f32 %v8171_v2, %v8135_v40  ;;  %v712_v63 = vpop.f32.mrf.mxu0 }
 0x113   : > { %v933_v4 = vpop.f32.mrf.mxu1 }
 0x114   : > { %v934_v6 = vadd.f32 %v933_v4, %v712_v63  ;;  %v8136_v7 = vpop.f32.mrf.mxu0 }
 0x115   : > { %v8172_v3 = vpop.f32.mrf.mxu1 }
 0x116   : > { %v945_v48 = vadd.f32 %v8172_v3, %v8136_v7  ;;  %v10259_v8 = vpop.f32.mrf.mxu0 }
 0x117   : > { %v10261_v9 = vpop.f32.mrf.mxu1 }
 0x118   : > { %v8139_v12 = vpop.f32.mrf.mxu0 }
 0x119   : > { %v8175_v57 = vpop.f32.mrf.mxu1 }
 0x11a   : > { %v10263_v37 = vadd.f32 %v8175_v57, %v8139_v12  ;;  %v728_v17 = vpop.f32.mrf.mxu0  ;;  %v8915_v12 = vld [vmem:[#allocation3 + $0xb8] sm:$0xff]  }
 0x11b   : > { %v949_v0 = vpop.f32.mrf.mxu1  ;;  %8501 = vmatprep.subr.bf16.mxu0 %v8915_v12 }
 0x11c   : > { %v10265_v5 = vadd.f32 %v949_v0, %v728_v17  ;;  %v8140_v18 = vpop.f32.mrf.mxu0  ;;  %8502 = vmatpush3.bf16.msra.mxu0 %v8915_v12 }
 0x11d   : > { %v8176_v20 = vpop.f32.mrf.mxu1 }
 0x11e   : > { %v10267_v21 = vadd.f32 %v8176_v20, %v8140_v18  ;;  %v10269_v33 = vpop.f32.mrf.mxu0 }
 0x11f   : > { %v10271_v26 = vpop.f32.mrf.mxu1 }
 0x120   : > { %v8143_v19 = vpop.f32.mrf.mxu0 }
 0x121   : > { %v8179_v27 = vpop.f32.mrf.mxu1 }
 0x122   : > { %v10273_v16 = vadd.f32 %v8179_v27, %v8143_v19  ;;  %v744_v50 = vpop.f32.mrf.mxu0  ;;  %v8914_v19 = vld [vmem:[#allocation3 + $0x78] sm:$0xff]  }
 0x123   : > { %v965_v30 = vpop.f32.mrf.mxu1  ;;  %8437 = vmatprep.subr.bf16.mxu1 %v8914_v19 }
 0x124   : > { %v10275_v38 = vadd.f32 %v965_v30, %v744_v50  ;;  %v8144_v55 = vpop.f32.mrf.mxu0  ;;  %v8917_v30 = vld [vmem:[#allocation3 + $0xb0] sm:$0xff]   ;;  %8438 = vmatpush3.bf16.msra.mxu1 %v8914_v19 }
 0x125   : > { %v8180_v59 = vpop.f32.mrf.mxu1  ;;  %8503 = vmatprep.subr.bf16.mxu0 %v8917_v30 }
 0x126   : > { %v10277_v58 = vadd.f32 %v8180_v59, %v8144_v55  ;;  %v10281_v13 = vpop.f32.mrf.mxu0  ;;  %8504 = vmatpush3.bf16.msra.mxu0 %v8917_v30 }
 0x127   : > { %v10279_v46 = vpop.f32.mrf.mxu1 }
 0x128   : > { %v8147_v1 = vpop.f32.mrf.mxu0 }
 0x129   : > { %v8183_v43 = vpop.f32.mrf.mxu1 }
 0x12a   : > { %v10283_v15 = vadd.f32 %v8183_v43, %v8147_v1  ;;  %v760_v25 = vpop.f32.mrf.mxu0  ;;  %v8916_v43 = vld [vmem:[#allocation3 + $0x70] sm:$0xff]  }
 0x12b   : > { %v981_v36 = vpop.f32.mrf.mxu1  ;;  %8439 = vmatprep.subr.bf16.mxu1 %v8916_v43 }
 0x12c   : > { %v10285_v32 = vadd.f32 %v981_v36, %v760_v25  ;;  %v8148_v51 = vpop.f32.mrf.mxu0  ;;  %v8919_v36 = vld [vmem:[#allocation3 + $0xa8] sm:$0xff]   ;;  %8440 = vmatpush3.bf16.msra.mxu1 %v8916_v43 }
 0x12d   : > { %v8184_v56 = vpop.f32.mrf.mxu1  ;;  %8505 = vmatprep.subr.bf16.mxu0 %v8919_v36 }
 0x12e   : > { %v10289_v28 = vadd.f32 %v8184_v56, %v8148_v51  ;;  %v10291_v52 = vpop.f32.mrf.mxu0  ;;  %8506 = vmatpush3.bf16.msra.mxu0 %v8919_v36 }
 0x12f   : > { %v10287_v44 = vpop.f32.mrf.mxu1 }
 0x130   : > { %v8203_v23 = vpop.f32.mrf.mxu0 }
 0x131   : > { %v8239_v45 = vpop.f32.mrf.mxu1  ;;  %v1319_v41 = vadd.f32 %v8203_v23, %v926_v22 }
 0x132   : > { %v1238_v29 = vpop.f32.mrf.mxu0 }
 0x133   : > { %v1517_v42 = vpop.f32.mrf.mxu1  ;;  %v1317_v34 = vadd.f32 %v1238_v29, %v918_v62  ;;  %v10293_v35 = vadd.f32 %v8239_v45, %v1319_v41  ;;  %v8918_v41 = vld [vmem:[#allocation3 + $0x68] sm:$0xff]  }
 0x134   : > { %v8204_v60 = vpop.f32.mrf.mxu0  ;;  %8441 = vmatprep.subr.bf16.mxu1 %v8918_v41 }
 0x135   : > { %v8240_v54 = vpop.f32.mrf.mxu1  ;;  %v1320_v47 = vadd.f32 %v8204_v60, %v929_v24  ;;  %v10297_v49 = vadd.f32 %v1517_v42, %v1317_v34  ;;  %8442 = vmatpush3.bf16.msra.mxu1 %v8918_v41 }
 0x136   : > { %v10299_v40 = vpop.f32.mrf.mxu0 }
 0x137   : > { %v10295_v31 = vpop.f32.mrf.mxu1  ;;  %v10301_v2 = vadd.f32 %v8240_v54, %v1320_v47  ;;  %v8921_v54 = vld [vmem:[#allocation3 + $0xa0] sm:$0xff]  }
 0x138   : > { %v8207_v4 = vpop.f32.mrf.mxu0  ;;  %8507 = vmatprep.subr.bf16.mxu0 %v8921_v54 }
 0x139   : > { %v8243_v53 = vpop.f32.mrf.mxu1  ;;  %v1323_v7 = vadd.f32 %v8207_v4, %v942_v61  ;;  %8508 = vmatpush3.bf16.msra.mxu0 %v8921_v54  ;;  %v8927_v54 = vld [vmem:[#allocation3 + $0x48] sm:$0xff]  }
 0x13a   : > { %v1254_v3 = vpop.f32.mrf.mxu0 }
 0x13b   : > { %v1533_v63 = vpop.f32.mrf.mxu1  ;;  %v1321_v62 = vadd.f32 %v1254_v3, %v934_v6  ;;  %v10303_v57 = vadd.f32 %v8243_v53, %v1323_v7  ;;  %v8920_v53 = vld [vmem:[#allocation3 + $0x60] sm:$0xff]  }
 0x13c   : > { %v8208_v0 = vpop.f32.mrf.mxu0  ;;  %8443 = vmatprep.subr.bf16.mxu1 %v8920_v53 }
 0x13d   : > { %v8244_v22 = vpop.f32.mrf.mxu1  ;;  %v1324_v24 = vadd.f32 %v8208_v0, %v945_v48  ;;  %v10307_v18 = vadd.f32 %v1533_v63, %v1321_v62  ;;  %v8923_v63 = vld [vmem:[#allocation3 + $0x98] sm:$0xff]   ;;  %8444 = vmatpush3.bf16.msra.mxu1 %v8920_v53 }
 0x13e   : > { %v10309_v27 = vpop.f32.mrf.mxu0  ;;  %8509 = vmatprep.subr.bf16.mxu0 %v8923_v63 }
 0x13f   : > { %v10305_v17 = vpop.f32.mrf.mxu1  ;;  %v10311_v61 = vadd.f32 %v8244_v22, %v1324_v24  ;;  %8510 = vmatpush3.bf16.msra.mxu0 %v8923_v63  ;;  %v8922_v24 = vld [vmem:[#allocation3 + $0x58] sm:$0xff]   ;;  %v8929_v63 = vld [vmem:[#allocation3 + $0x40] sm:$0xff]  }
 0x140   : > { %v8211_v59 = vpop.f32.mrf.mxu0  ;;  %8445 = vmatprep.subr.bf16.mxu1 %v8922_v24 }
 0x141   : > { %v8247_v20 = vpop.f32.mrf.mxu1  ;;  %v1327_v6 = vadd.f32 %v8211_v59, %v10263_v37  ;;  %8446 = vmatpush3.bf16.msra.mxu1 %v8922_v24 }
 0x142   : > { %v1270_v48 = vpop.f32.mrf.mxu0 }
 0x143   : > { %v1549_v50 = vpop.f32.mrf.mxu1  ;;  %v1325_v1 = vadd.f32 %v1270_v48, %v10265_v5  ;;  %v10315_v56 = vadd.f32 %v8247_v20, %v1327_v6  ;;  %v8924_v20 = vld [vmem:[#allocation3 + $0x90] sm:$0xff]  }
 0x144   : > { %v8212_v51 = vpop.f32.mrf.mxu0  ;;  %8511 = vmatprep.subr.bf16.mxu0 %v8924_v20  ;;  %v8925_v6 = vld [vmem:[#allocation3 + $0x50] sm:$0xff]  }
 0x145   : > { %v8248_v55 = vpop.f32.mrf.mxu1  ;;  %v1328_v45 = vadd.f32 %v8212_v51, %v10267_v21  ;;  %v10320_v42 = vadd.f32 %v1549_v50, %v1325_v1  ;;  %8512 = vmatpush3.bf16.msra.mxu0 %v8924_v20  ;;  %8447 = vmatprep.subr.bf16.mxu1 %v8925_v6 }
 0x146   : > { %v10322_v23 = vpop.f32.mrf.mxu0  ;;  %8448 = vmatpush3.bf16.msra.mxu1 %v8925_v6 }
 0x147   : > { %v10317_v25 = vpop.f32.mrf.mxu1  ;;  %v10324_v29 = vadd.f32 %v8248_v55, %v1328_v45  ;;  %v8926_v55 = vld [vmem:[#allocation3 + $0x88] sm:$0xff]   ;;  %8449 = vmatprep.subr.bf16.mxu1 %v8927_v54 }
 0x148   : > { %v8215_v34 = vpop.f32.mrf.mxu0  ;;  %8513 = vmatprep.subr.bf16.mxu0 %v8926_v55 }
 0x149   : > { %v8251_v37 = vpop.f32.mrf.mxu1  ;;  %v1331_v60 = vadd.f32 %v8215_v34, %v10273_v16  ;;  %8514 = vmatpush3.bf16.msra.mxu0 %v8926_v55 }
 0x14a   : > { %v1286_v21 = vpop.f32.mrf.mxu0  ;;  %8450 = vmatpush3.bf16.msra.mxu1 %v8927_v54  ;;  %v10402_v54 = vld [vmem:[#allocation3 + $0x138] sm:$0xff]  }
 0x14b   : > { %v1565_v5 = vpop.f32.mrf.mxu1  ;;  %v1329_v4 = vadd.f32 %v1286_v21, %v10275_v38  ;;  %v10328_v7 = vadd.f32 %v8251_v37, %v1331_v60  ;;  %8451 = vmatprep.subr.bf16.mxu1 %v8929_v63  ;;  %11806 = vst [vmem:[#allocation11_spill] sm:$0xff] %v10402_v54 }
 0x14c   : > { %v8216_v3 = vpop.f32.mrf.mxu0 }
 0x14d   : > { %v8252_v47 = vpop.f32.mrf.mxu1  ;;  %v1332_v12 = vadd.f32 %v8216_v3, %v10277_v58  ;;  %v10333_v62 = vadd.f32 %v1565_v5, %v1329_v4  ;;  %v8928_v5 = vld [vmem:[#allocation3 + $0x80] sm:$0xff]  }
 0x14e   : > { %v10335_v0 = vpop.f32.mrf.mxu0  ;;  %8515 = vmatprep.subr.bf16.mxu0 %v8928_v5  ;;  %8452 = vmatpush3.bf16.msra.mxu1 %v8929_v63 }
 0x14f   : > { %v10330_v22 = vpop.f32.mrf.mxu1  ;;  %v10337_v19 = vadd.f32 %v8252_v47, %v1332_v12  ;;  %8516 = vmatpush3.bf16.msra.mxu0 %v8928_v5 }
 0x150   : > { %v8219_v30 = vpop.f32.mrf.mxu0  ;;  %8565 = vmatprep.subr.bf16.mxu0 %v10402_v54 }
 0x151   : > { %v8255_v16 = vpop.f32.mrf.mxu1  ;;  %v1335_v50 = vadd.f32 %v8219_v30, %v10283_v15 }
 0x152   : > { %v1302_v58 = vpop.f32.mrf.mxu0 }
 0x153   : > { %v1581_v38 = vpop.f32.mrf.mxu1  ;;  %v1333_v48 = vadd.f32 %v1302_v58, %v10285_v32  ;;  %v10341_v43 = vadd.f32 %v8255_v16, %v1335_v50 }
 0x154   : > { %v8220_v1 = vpop.f32.mrf.mxu0 }
 0x155   : > { %v8256_v59 = vpop.f32.mrf.mxu1  ;;  %v1336_v51 = vadd.f32 %v8220_v1, %v10289_v28  ;;  %v10346_v45 = vadd.f32 %v1581_v38, %v1333_v48 }
 0x156   : > { %v10350_v37 = vpop.f32.mrf.mxu0 }
 0x157   : > { %v10343_v36 = vpop.f32.mrf.mxu1  ;;  %v10352_v41 = vadd.f32 %v8256_v59, %v1336_v51 }
 0x158   : > { %v8275_v34 = vpop.f32.mrf.mxu0 }
 0x159   : > { %v10348_v15 = vpop.f32.mrf.mxu1  ;;  %v10357_v60 = vadd.f32 %v8275_v34, %v10293_v35 }
 0x15a   : > { %v2025_v28 = vpop.f32.mrf.mxu0 }
 0x15b   : > { %v10354_v32 = vpop.f32.mrf.mxu1  ;;  %v10362_v21 = vadd.f32 %v2025_v28, %v10297_v49 }
 0x15c   : > { %v8276_v4 = vpop.f32.mrf.mxu0 }
 0x15d   : > { %v10359_v47 = vpop.f32.mrf.mxu1  ;;  %v10367_v3 = vadd.f32 %v8276_v4, %v10301_v2 }
 0x15e   : > { %v10371_v35 = vpop.f32.mrf.mxu0 }
 0x15f   : > { %v10364_v53 = vpop.f32.mrf.mxu1 }
 0x160   : > { %v8279_v24 = vpop.f32.mrf.mxu0 }
 0x161   : > { %v10369_v12 = vpop.f32.mrf.mxu1  ;;  %v10376_v20 = vadd.f32 %v8279_v24, %v10303_v57 }
 0x162   : > { %v2041_v38 = vpop.f32.mrf.mxu0 }
 0x163   : > { %v10373_v16 = vpop.f32.mrf.mxu1  ;;  %v10381_v30 = vadd.f32 %v2041_v38, %v10307_v18 }
 0x164   : > { %v8280_v50 = vpop.f32.mrf.mxu0 }
 0x165   : > { %v10378_v49 = vpop.f32.mrf.mxu1  ;;  %v10386_v59 = vadd.f32 %v8280_v50, %v10311_v61 }
 0x166   : > { %v10388_v58 = vpop.f32.mrf.mxu0 }
 0x167   : > { %v10383_v2 = vpop.f32.mrf.mxu1 }
 0x168   : > { %v8283_v55 = vpop.f32.mrf.mxu0 }
 0x169   : > { %v10390_v6 = vpop.f32.mrf.mxu1  ;;  %v10393_v57 = vadd.f32 %v8283_v55, %v10315_v56  ;;  %v8931_v55 = vld [vmem:[#allocation3 + $0x38] sm:$0xff]  }
 0x16a   : > { %v2057_v1 = vpop.f32.mrf.mxu0  ;;  %8469 = vmatprep.subr.bf16.mxu1 %v8931_v55 }
 0x16b   : > { %v10395_v48 = vpop.f32.mrf.mxu1  ;;  %v10398_v18 = vadd.f32 %v2057_v1, %v10320_v42 }
 0x16c   : > { %v8284_v61 = vpop.f32.mrf.mxu0 }
 0x16d   : > { %v10400_v51 = vpop.f32.mrf.mxu1  ;;  %v10405_v5 = vadd.f32 %v8284_v61, %v10324_v29 }
 0x16e   : > { %v10408_v34 = vpop.f32.mrf.mxu0 }
 0x16f   : > { %v10410_v56 = vpop.f32.mrf.mxu1 }
 0x170   : > { %v8287_v28 = vpop.f32.mrf.mxu0 }
 0x171   : > { %v10412_v63 = vpop.f32.mrf.mxu1  ;;  %v10415_v42 = vadd.f32 %v8287_v28, %v10328_v7 }
 0x172   : > { %v2073_v4 = vpop.f32.mrf.mxu0 }
 0x173   : > { %v10417_v24 = vpop.f32.mrf.mxu1  ;;  %v10420_v38 = vadd.f32 %v2073_v4, %v10333_v62 }
 0x174   : > { %v8288_v29 = vpop.f32.mrf.mxu0 }
 0x175   : > { %v10422_v50 = vpop.f32.mrf.mxu1  ;;  %v10425_v1 = vadd.f32 %v8288_v29, %v10337_v19 }
 0x176   : > { %11807 = vst [vmem:[#allocation12_spill] sm:$0xff] %v10422_v50  ;;  %v10427_v61 = vpop.f32.mrf.mxu0 }
 0x177   : > { %11808 = vst [vmem:[#allocation13_spill] sm:$0xff] %v10425_v1  ;;  %v10429_v39 = vpop.f32.mrf.mxu1 }
 0x178   : > { %11809 = vst [vmem:[#allocation14_spill] sm:$0xff] %v10429_v39 }
 0x179   : > { %v8291_v7 = vpop.f32.mrf.mxu0 }
 0x17a   : > { %v10432_v28 = vadd.f32 %v8291_v7, %v10341_v43 }
 0x17b   : > { %v2089_v62 = vpop.f32.mrf.mxu0 }
 0x17c   : > { %11810 = vst [vmem:[#allocation15_spill] sm:$0xff] %v10432_v28  ;;  %v10437_v4 = vadd.f32 %v2089_v62, %v10346_v45 }
 0x17d   : > { %v10434_v54 = vpop.f32.mrf.mxu1  ;;  %v8292_v50 = vpop.f32.mrf.mxu0 }
 0x17e   : > { %11811 = vst [vmem:[#allocation16_spill] sm:$0xff] %v10434_v54  ;;  %11812 = vst [vmem:[#allocation17_spill] sm:$0xff] %v10437_v4  ;;  %v10442_v19 = vadd.f32 %v8292_v50, %v10352_v41 }
 0x17f   : > { %v10439_v14 = vpop.f32.mrf.mxu1  ;;  %v10446_v55 = vpop.f32.mrf.mxu0 }
 0x180   : > { %11813 = vst [vmem:[#allocation18_spill] sm:$0xff] %v10439_v14  ;;  %11814 = vst [vmem:[#allocation19_spill] sm:$0xff] %v10442_v19 }
 0x181   : > { %v10444_v29 = vpop.f32.mrf.mxu1  ;;  %v10450_v43 = vpop.f32.mrf.mxu0 }
 0x182   : > { %11815 = vst [vmem:[#allocation20_spill] sm:$0xff] %v10444_v29 }
 0x183   : > { %v10448_v39 = vpop.f32.mrf.mxu1  ;;  %v10452_v7 = vpop.f32.mrf.mxu0 }
 0x184   : > { %11816 = vst [vmem:[#allocation21_spill] sm:$0xff] %v10448_v39 }
 0x185   : > { %v10454_v54 = vpop.f32.mrf.mxu1  ;;  %v10456_v45 = vpop.f32.mrf.mxu0 }
 0x186   : > { %11817 = vst [vmem:[#allocation22_spill] sm:$0xff] %v10454_v54 }
 0x187   : > { %v10458_v62 = vpop.f32.mrf.mxu1  ;;  %v10460_v14 = vpop.f32.mrf.mxu0 }
 0x188   : > { %11818 = vst [vmem:[#allocation23_spill] sm:$0xff] %v10458_v62  ;;  %11819 = vst [vmem:[#allocation24_spill] sm:$0xff] %v10460_v14 }
 0x189   : > { %v10462_v41 = vpop.f32.mrf.mxu1  ;;  %v10464_v50 = vpop.f32.mrf.mxu0 }
 0x18a   : > { %11820 = vst [vmem:[#allocation25_spill] sm:$0xff] %v10462_v41  ;;  %11821 = vst [vmem:[#allocation26_spill] sm:$0xff] %v10464_v50 }
 0x18b   : > { %v10466_v29 = vpop.f32.mrf.mxu1  ;;  %v10468_v39 = vpop.f32.mrf.mxu0 }
 0x18c   : > { %11822 = vst [vmem:[#allocation27_spill] sm:$0xff] %v10466_v29 }
 0x18d   : > { %v10470_v19 = vpop.f32.mrf.mxu0 }
 0x18e   : > { %11823 = vst [vmem:[#allocation28_spill] sm:$0xff] %v10470_v19  ;;  %v10472_v4 = vpop.f32.mrf.mxu1 }
 0x18f   : > { %11824 = vst [vmem:[#allocation29_spill] sm:$0xff] %v10472_v4  ;;  %v10474_v54 = vpop.f32.mrf.mxu0  ;;  %v921_v4 = vadd.f32 %v10257_v11, %v10255_v10  ;;  %v969_v10 = vadd.f32 %v10279_v46, %v10281_v13  ;;  %v985_v11 = vadd.f32 %v10287_v44, %v10291_v52 }
 0x190   : > { %v10476_v28 = vpop.f32.mrf.mxu1 }
 0x191   : > { %11825 = vst [vmem:[#allocation30_spill] sm:$0xff] %v10476_v28  ;;  %v10478_v1 = vpop.f32.mrf.mxu0  ;;  %v937_v28 = vadd.f32 %v10261_v9, %v10259_v8  ;;  %v10513_v8 = vstv %s7520_s11 }
 0x192   : > { %11826 = vst [vmem:[#allocation31_spill] sm:$0xff] %v10478_v1  ;;  %v10480_v62 = vpop.f32.mrf.mxu1  ;;  %v10529_v44 = vadd.s32 1, %v10513_v8  ;;  %vm3666_vm8 = vcmp.ge.s32.totalorder %v10513_v8, 0  ;;  %vm3676_vm9 = vcmp.lt.s32.totalorder %v10513_v8, 16 }
 0x193   : > { %11827 = vst [vmem:[#allocation32_spill] sm:$0xff] %v10480_v62  ;;  %v10482_v14 = vpop.f32.mrf.mxu0  ;;  %vm10688_vm1 = vmand %vm3666_vm8, %vm3676_vm9 }
 0x194   : > { %11828 = vst [vmem:[#allocation33_spill] sm:$0xff] %v10482_v14  ;;  %v10484_v41 = vpop.f32.mrf.mxu1  ;;  %vm3667_vm6 = vcmp.ge.s32.totalorder %v10529_v44, 0  ;;  %vm3677_vm7 = vcmp.lt.s32.totalorder %v10529_v44, 16 }
 0x195   : > { %11829 = vst [vmem:[#allocation34_spill] sm:$0xff] %v10484_v41  ;;  %v10486_v50 = vpop.f32.mrf.mxu0  ;;  %v1318_v41 = vadd.f32 %v10299_v40, %v921_v4  ;;  %vm10671_vm0 = vmand %vm3667_vm6, %vm3677_vm7 }
 0x196   : > { %11830 = vst [vmem:[#allocation35_spill] sm:$0xff] %v10486_v50  ;;  %v953_v50 = vadd.f32 %v10271_v26, %v10269_v33  ;;  %v1330_v26 = vadd.f32 %v10335_v0, %v969_v10  ;;  %v10539_v0 = vadd.s32 5, %v10513_v8  ;;  %vm10728_vm7 = vmand %vm3836_vm12, %vm3837_vm13 }
 0x197   : > { %v10489_v29 = vpop.f32.mrf.mxu1  ;;  %v10491_v19 = vpop.f32.mrf.mxu0  ;;  %v1597_v33 = vadd.f32 %v10295_v31, %v1318_v41  ;;  %v10536_v31 = vadd.s32 2, %v10513_v8 }
 0x198   : > { %11831 = vst [vmem:[#allocation36_spill] sm:$0xff] %v10489_v29  ;;  %11832 = vst [vmem:[#allocation37_spill] sm:$0xff] %v10491_v19  ;;  %v1322_v29 = vadd.f32 %v10309_v27, %v937_v28  ;;  %v1326_v9 = vadd.f32 %v10322_v23, %v953_v50  ;;  %v1334_v27 = vadd.f32 %v10350_v37, %v985_v11  ;;  %v10533_v23 = vadd.s32 3, %v10513_v8 }
 0x199   : > { %v10497_v1 = vpop.f32.mrf.mxu1  ;;  %v10499_v62 = vpop.f32.mrf.mxu0  ;;  %v2105_v52 = vadd.f32 %v10371_v35, %v1597_v33  ;;  %v10548_v50 = vadd.s32 4, %v10513_v8  ;;  %v10551_v35 = vadd.s32 7, %v10513_v8  ;;  %v1609_v10 = vadd.f32 %v10330_v22, %v1330_v26 }
 0x19a   : > { %v1601_v28 = vadd.f32 %v10305_v17, %v1322_v29  ;;  %v1605_v17 = vadd.f32 %v10317_v25, %v1326_v9  ;;  %v1613_v11 = vadd.f32 %v10343_v36, %v1334_v27  ;;  %v10556_v33 = vadd.s32 6, %v10513_v8 }
 0x19b   : > { %v10505_v14 = vpop.f32.mrf.mxu1  ;;  %v10507_v19 = vpop.f32.mrf.mxu0  ;;  %11833 = vst [vmem:[#allocation38_spill] sm:$0xff] %v10548_v50  ;;  %11834 = vst [vmem:[#allocation39_spill] sm:$0xff] %v10551_v35  ;;  %v10559_v25 = vadd.s32 9, %v10513_v8  ;;  %v2452_v9 = vadd.f32 %v10354_v32, %v10362_v21  ;;  %v10571_v22 = vadd.s32 8, %v10513_v8  ;;  %v2455_v36 = vadd.f32 %v10359_v47, %v10367_v3 }
 0x19c   : > { %v2109_v37 = vadd.f32 %v10388_v58, %v1601_v28  ;;  %v2454_v58 = vadd.f32 %v10348_v15, %v10357_v60  ;;  %v2113_v28 = vadd.f32 %v10408_v34, %v1605_v17  ;;  %v2453_v26 = vadd.f32 %v10364_v53, %v2105_v52  ;;  %v11843_v52 = vld [vmem:[#allocation19_spill] sm:$0xff] }
 0x19d   : > { %v10516_v40 = vpop.f32.mrf.mxu1  ;;  %v10518_v4 = vpop.f32.mrf.mxu0  ;;  %v2458_v15 = vadd.f32 %v10369_v12, %v10376_v20  ;;  %v2117_v60 = vadd.f32 %v10427_v61, %v1609_v10  ;;  %v2456_v32 = vadd.f32 %v10373_v16, %v10381_v30  ;;  %v2459_v21 = vadd.f32 %v10378_v49, %v10386_v59  ;;  %v11838_v61 = vld [vmem:[#allocation24_spill] sm:$0xff] }
 0x19e   : > { %v2457_v34 = vadd.f32 %v10383_v2, %v2109_v37  ;;  %v2733_v27 = vadd.f32 %v10450_v43, %v2454_v58  ;;  %v2462_v47 = vadd.f32 %v10390_v6, %v10393_v57  ;;  %v2460_v53 = vadd.f32 %v10395_v48, %v10398_v18  ;;  %v11835_v57 = vld [vmem:[#allocation13_spill] sm:$0xff]  ;;  %v11836_v48 = vld [vmem:[#allocation12_spill] sm:$0xff] }
 0x19f   : > { %v10524_v46 = vpop.f32.mrf.mxu1  ;;  %v10526_v13 = vpop.f32.mrf.mxu0  ;;  %v2463_v3 = vadd.f32 %v10400_v51, %v10405_v5  ;;  %v2121_v12 = vadd.f32 %v10446_v55, %v1613_v11  ;;  %v2461_v20 = vadd.f32 %v10410_v56, %v2113_v28  ;;  %v2466_v49 = vadd.f32 %v10412_v63, %v10415_v42  ;;  %v11837_v51 = vld [vmem:[#allocation14_spill] sm:$0xff]  ;;  %v11839_v56 = vld [vmem:[#allocation15_spill] sm:$0xff]  ;;  %v11840_v63 = vld [vmem:[#allocation16_spill] sm:$0xff] }
 0x1a0   : > { %v2731_v30 = vadd.f32 %v10452_v7, %v2452_v9  ;;  %v2734_v2 = vadd.f32 %v10456_v45, %v2455_v36  ;;  %v2464_v6 = vadd.f32 %v10417_v24, %v10420_v38  ;;  %v2467_v18 = vadd.f32 %v11836_v48, %v11835_v57  ;;  %v11841_v43 = vld [vmem:[#allocation17_spill] sm:$0xff]  ;;  %v11842_v7 = vld [vmem:[#allocation18_spill] sm:$0xff]  ;;  %v11844_v37 = vld [vmem:[#allocation20_spill] sm:$0xff] }
 0x1a1   : > { %v10543_v29 = vpop.f32.mrf.mxu1  ;;  %v10545_v41 = vpop.f32.mrf.mxu0  ;;  %v2465_v5 = vadd.f32 %v11837_v51, %v2117_v60  ;;  %v2732_v55 = vadd.f32 %v11838_v61, %v2453_v26  ;;  %v2470_v42 = vadd.f32 %v11840_v63, %v11839_v56  ;;  %v2468_v45 = vadd.f32 %v11842_v7, %v11841_v43  ;;  %v11845_v38 = vld [vmem:[#allocation22_spill] sm:$0xff]  ;;  %v11846_v11 = vld [vmem:[#allocation21_spill] sm:$0xff]  ;;  %v11848_v26 = vld [vmem:[#allocation28_spill] sm:$0xff] }
 0x1a2   : > { %v2471_v24 = vadd.f32 %v11844_v37, %v11843_v52  ;;  %v3241_v10 = vadd.f32 %v11845_v38, %v2733_v27  ;;  %v2469_v58 = vadd.f32 %v11846_v11, %v2121_v12  ;;  %v11847_v9 = vld [vmem:[#allocation26_spill] sm:$0xff]  ;;  %v2735_v36 = vadd.f32 %v10468_v39, %v2456_v32  ;;  %v11849_v61 = vld [vmem:[#allocation23_spill] sm:$0xff]  ;;  %v11850_v63 = vld [vmem:[#allocation25_spill] sm:$0xff] }
 0x1a3   : > { %v10566_v50 = vpop.f32.mrf.mxu1  ;;  %v10568_v35 = vpop.f32.mrf.mxu0  ;;  %v2737_v28 = vadd.f32 %v11847_v9, %v2458_v15  ;;  %v2738_v60 = vadd.f32 %v11848_v26, %v2459_v21  ;;  %v10629_v51 = vld [vmem:[%s11784_s2] ss:$0 sm:$0xff]  ;;  %v3239_v56 = vadd.f32 %v11849_v61, %v2731_v30  ;;  %v3242_v27 = vadd.f32 %v11850_v63, %v2734_v2  ;;  %v11851_v15 = vld [vmem:[#allocation27_spill] sm:$0xff]  ;;  %v11853_v21 = vld [vmem:[#allocation33_spill] sm:$0xff] }
 0x1a4   : > { %v2736_v12 = vadd.f32 %v10474_v54, %v2457_v34  ;;  %v3240_v7 = vadd.f32 %v11851_v15, %v2732_v55  ;;  %v11852_v39 = vld [vmem:[#allocation31_spill] sm:$0xff]  ;;  %v2739_v52 = vadd.f32 %v11853_v21, %v2460_v53  ;;  %vm3669_vm10 = vcmp.ge.s32.totalorder %v10533_v23, 0  ;;  %v11855_v9 = vld [vmem:[#allocation37_spill] sm:$0xff]  ;;  %v11858_v26 = vld [vmem:[#allocation32_spill] sm:$0xff] }
 0x1a5   : > { %v10585_v17 = vpop.f32.mrf.mxu0  ;;  %v10594_v16 = vpop.f32.mrf.mxu1  ;;  %v2741_v32 = vadd.f32 %v11852_v39, %v2462_v47  ;;  %v11854_v37 = vld [vmem:[#allocation35_spill] sm:$0xff]  ;;  %vm3679_vm11 = vcmp.lt.s32.totalorder %v10533_v23, 16  ;;  %v2740_v30 = vadd.f32 %v11855_v9, %v2461_v20  ;;  %v2745_v2 = vadd.f32 %v10499_v62, %v2466_v49  ;;  %v11856_v55 = vld [vmem:[#allocation29_spill] sm:$0xff]  ;;  %v11859_v62 = vld [vmem:[#allocation34_spill] sm:$0xff] }
 0x1a6   : > { %v2742_v38 = vadd.f32 %v11854_v37, %v2463_v3  ;;  %v3245_v47 = vadd.f32 %v11856_v55, %v2737_v28  ;;  %v3246_v3 = vadd.f32 %v11858_v26, %v2738_v60  ;;  %vm3668_vm14 = vcmp.ge.s32.totalorder %v10536_v31, 0  ;;  %v11860_v28 = vld [vmem:[#allocation36_spill] sm:$0xff]  ;;  %vm10717_vm6 = vmand %vm3669_vm10, %vm3679_vm11 }
 0x1a7   : > { %v10603_v59 = vpop.f32.mrf.mxu0  ;;  %vm3678_vm15 = vcmp.lt.s32.totalorder %v10536_v31, 16  ;;  %v3244_v20 = vadd.f32 %v11859_v62, %v2736_v12  ;;  %v2746_v49 = vadd.f32 %v10518_v4, %v2467_v18  ;;  %v10653_v15 = vadd.f32 %v11860_v28, %v2741_v32  ;;  %v11871_v62 = vld [vmem:[#allocation38_spill] sm:$0xff] }
 0x1a8   : > { %v10624_v57 = vpop.f32.mrf.mxu1  ;;  %v10662_v39 = vadd.f32 %v10516_v40, %v2740_v30  ;;  %v10665_v12 = vadd.f32 %v10524_v46, %v2745_v2  ;;  %v2744_v40 = vadd.f32 %v10526_v13, %v2465_v5  ;;  %v2750_v5 = vadd.f32 %v10585_v17, %v2471_v24  ;;  %vm10738_vm8 = vmand %vm3668_vm14, %vm3678_vm15 }
 0x1a9   : > { %v8419_v48 = vpop.f32.mrf.mxu0  ;;  %vm3671_vm3 = vcmp.ge.s32.totalorder %v10539_v0, 0  ;;  %vm3681_vm4 = vcmp.lt.s32.totalorder %v10539_v0, 16  ;;  %vm3670_vm9 = vcmp.ge.s32.totalorder %v11871_v62, 0  ;;  %vm3680_vm10 = vcmp.lt.s32.totalorder %v11871_v62, 16 }
 0x1aa   : > { %v3589_v43 = vadd.f32 %v8419_v48, %v3241_v10  ;;  %v11857_v10 = vld [vmem:[#allocation30_spill] sm:$0xff]  ;;  %v2743_v48 = vadd.f32 %v10507_v19, %v2464_v6  ;;  %v3224_v61 = vpop.f32.mrf.mxu1  ;;  %v10659_v19 = vadd.f32 %v10505_v14, %v2742_v38  ;;  %vm10770_vm13 = vmand %vm3671_vm3, %vm3681_vm4  ;;  %vm3672_vm14 = vcmp.ge.s32.totalorder %v10556_v33, 0 }
 0x1ab   : > { %v3508_v11 = vpop.f32.mrf.mxu0  ;;  %v3243_v53 = vadd.f32 %v11857_v10, %v2735_v36  ;;  %v10656_v36 = vadd.f32 %v10497_v1, %v2739_v52  ;;  %v10682_v52 = vadd.f32 %v10566_v50, %v2746_v49  ;;  %vm3682_vm15 = vcmp.lt.s32.totalorder %v10556_v33, 16 }
 0x1ac   : > { %v3616_v54 = vadd.f32 %v10629_v51, %v3589_v43  ;;  %v3587_v34 = vadd.f32 %v3508_v11, %v3239_v56  ;;  %v10677_v18 = vadd.f32 %v10543_v29, %v2743_v48  ;;  %v8400_v46 = vpop.f32.mrf.mxu1  ;;  %vm3685_vm3 = vcmp.lt.s32.totalorder %v10559_v25, 16 }
 0x1ad   : > { %v8420_v63 = vpop.f32.mrf.mxu0  ;;  %v10724_v55 = vadd.f32 %v8400_v46, %v2750_v5 }
 0x1ae   : > { %v3614_v56 = vadd.f32 %v10629_v51, %v3587_v34  ;;  %v3590_v43 = vadd.f32 %v8420_v63, %v3242_v27  ;;  %v3636_v6 = vmax.f32 %v3616_v54, 0.0  ;;  %v2749_v27 = vadd.f32 %v10545_v41, %v2470_v42 }
 0x1af   : > { %v3511_v60 = vpop.f32.mrf.mxu0  ;;  %v2747_v41 = vadd.f32 %v10568_v35, %v2468_v45  ;;  %v2748_v42 = vadd.f32 %v10603_v59, %v2469_v58  ;;  %v10704_v35 = vadd.f32 %v10594_v16, %v2744_v40  ;;  %v3227_v59 = vpop.f32.mrf.mxu1 }
 0x1b0   : > { %v3617_v1 = vadd.f32 %v10629_v51, %v3590_v43  ;;  %v3588_v14 = vadd.f32 %v3511_v60, %v3240_v7  ;;  %v3634_v32 = vmax.f32 %v3614_v56, 0.0  ;;  %v3718_v50 = vsel %vm10671_vm0, %v3636_v6, 0.0 }
 0x1b1   : > { %v8423_v21 = vpop.f32.mrf.mxu0  ;;  %v10707_v17 = vadd.f32 %v10624_v57, %v2749_v27  ;;  %v10722_v34 = vadd.f32 %v3224_v61, %v2747_v41  ;;  %v10732_v26 = vadd.f32 %v3227_v59, %v2748_v42 }
 0x1b2   : > { %v3637_v29 = vmax.f32 %v3617_v1, 0.0  ;;  %v3615_v7 = vadd.f32 %v10629_v51, %v3588_v14  ;;  %v3593_v13 = vadd.f32 %v8423_v21, %v3245_v47  ;;  %v3716_v45 = vsel %vm10688_vm1, %v3634_v32, 0.0  ;;  %v11872_v32 = vld [vmem:[#allocation39_spill] sm:$0xff] }
 0x1b3   : > { %v3524_v37 = vpop.f32.mrf.mxu0  ;;  %vm3673_vm11 = vcmp.ge.s32.totalorder %v11872_v32, 0  ;;  %vm3683_vm12 = vcmp.lt.s32.totalorder %v11872_v32, 16 }
 0x1b4   : > { %v3719_v8 = vsel %vm10671_vm0, %v3637_v29, 0.0  ;;  %v3635_v38 = vmax.f32 %v3615_v7, 0.0  ;;  %v3620_v11 = vadd.f32 %v10629_v51, %v3593_v13  ;;  %v3591_v9 = vadd.f32 %v3524_v37, %v3243_v53  ;;  %vm10789_vm0 = vmand %vm3670_vm9, %vm3680_vm10 }
 0x1b5   : > { %v3737_v24 = vpack.c.bf16 %v3719_v8, %v3718_v50  ;;  %v8424_v58 = vpop.f32.mrf.mxu0  ;;  %vm10808_vm4 = vmand %vm3673_vm11, %vm3683_vm12 }
 0x1b6   : > { %v3717_v30 = vsel %vm10688_vm1, %v3635_v38, 0.0  ;;  %v3640_v2 = vmax.f32 %v3620_v11, 0.0  ;;  %v3618_v57 = vadd.f32 %v10629_v51, %v3591_v9  ;;  %v3594_v54 = vadd.f32 %v8424_v58, %v3246_v3  ;;  %vm10832_vm9 = vmand %vm3672_vm14, %vm3682_vm15 }
 0x1b7   : > { %v3754_v47 = vshrl.u32 %v3737_v24, 16  ;;  %v3736_v53 = vpack.c.bf16 %v3717_v30, %v3716_v45  ;;  %v3527_v23 = vpop.f32.mrf.mxu0  ;;  %v3757_v56 = vshll.u32 %v3737_v24, 16  ;;  %vm3675_vm1 = vcmp.ge.s32.totalorder %v10559_v25, 0 }
 0x1b8   : > { %v3638_v48 = vmax.f32 %v3618_v57, 0.0  ;;  %v3621_v61 = vadd.f32 %v10629_v51, %v3594_v54  ;;  %v3592_v63 = vadd.f32 %v3527_v23, %v3244_v20  ;;  %v3722_v28 = vsel %vm10717_vm6, %v3640_v2, 0.0  ;;  %vm10854_vm10 = vmand %vm3675_vm1, %vm3685_vm3 }
 0x1b9   : > { %v3756_v49 = vrot.slane %v3754_v47, 7  ;;  %v3747_v43 = vshrl.u32 %v3736_v53, 16  ;;  %v8427_v6 = vpop.f32.mrf.mxu0  ;;  %v3750_v60 = vshll.u32 %v3736_v53, 16 }
 0x1ba   : > { %v3641_v31 = vmax.f32 %v3621_v61, 0.0  ;;  %v3619_v4 = vadd.f32 %v10629_v51, %v3592_v63  ;;  %v3597_v1 = vadd.f32 %v8427_v6, %v10653_v15  ;;  %v3720_v27 = vsel %vm10738_vm8, %v3638_v48, 0.0 }
 0x1bb   : > { %v3759_v14 = vor.u32 %v3757_v56, %v3756_v49  ;;  %v3850_v20 = vsel %vm10728_vm7, %v3756_v49, 0  ;;  %v3749_v40 = vrot.slane %v3747_v43, 7  ;;  %v3540_v46 = vpop.f32.mrf.mxu0 }
 0x1bc   : > { %v7526_v21 = vcombine.low %v3850_v20, %v3850_v20  ;;  %v3723_v44 = vsel %vm10717_vm6, %v3641_v31, 0.0  ;;  %v3639_v29 = vmax.f32 %v3619_v4, 0.0  ;;  %v3624_v15 = vadd.f32 %v10629_v51, %v3597_v1 }
 0x1bd   : > { %v3840_v7 = vsel %vm10728_vm7, 0, %v3759_v14  ;;  %v3752_v13 = vor.u32 %v3750_v60, %v3749_v40  ;;  %v3849_v41 = vsel %vm10728_vm7, %v3749_v40, 0  ;;  %v3739_v5 = vpack.c.bf16 %v3723_v44, %v3722_v28  ;;  %v8428_v42 = vpop.f32.mrf.mxu0 }
 0x1be   : > { %v7524_v50 = vcombine.low %v3840_v7, %v3840_v7  ;;  %v7525_v37 = vcombine.high %v3840_v7, %v3840_v7  ;;  %3974 = vst [vmem:[#allocation2 + $0x14] sm:$0x1] %v7526_v21  ;;  %v7523_v8 = vcombine.low %v3849_v41, %v3849_v41  ;;  %v3721_v38 = vsel %vm10738_vm8, %v3639_v29, 0.0 }
 0x1bf   : > { %v3839_v11 = vsel %vm10728_vm7, 0, %v3752_v13  ;;  %v3768_v9 = vshrl.u32 %v3739_v5, 16  ;;  %v3771_v59 = vshll.u32 %v3739_v5, 16  ;;  %v3738_v45 = vpack.c.bf16 %v3721_v38, %v3720_v27  ;;  %v3543_v58 = vpop.f32.mrf.mxu0 }
 0x1c0   : > { %3972 = vst [vmem:[#allocation2 + $0xc] sm:$0xf] %v7524_v50  ;;  %3973 = vst [vmem:[#allocation2 + $0x10] sm:$0xf] %v7525_v37  ;;  %v7521_v30 = vcombine.low %v3839_v11, %v3839_v11  ;;  %v7522_v2 = vcombine.high %v3839_v11, %v3839_v11  ;;  %v3644_v16 = vmax.f32 %v3624_v15, 0.0  ;;  %v3595_v57 = vadd.f32 %v3540_v46, %v10656_v36 }
 0x1c1   : > { %3971 = vst [vmem:[#allocation2 + $0x8] sm:$0x1] %v7523_v8  ;;  %v3770_v54 = vrot.slane %v3768_v9, 7  ;;  %v3761_v47 = vshrl.u32 %v3738_v45, 16  ;;  %v3764_v0 = vshll.u32 %v3738_v45, 16  ;;  %v3598_v53 = vadd.f32 %v8428_v42, %v10659_v19  ;;  %v8431_v23 = vpop.f32.mrf.mxu0 }
 0x1c2   : > { %3969 = vst [vmem:[#allocation2] sm:$0xf] %v7521_v30  ;;  %3970 = vst [vmem:[#allocation2 + $0x4] sm:$0xf] %v7522_v2  ;;  %v3726_v48 = vsel %vm10770_vm13, %v3644_v16, 0.0  ;;  %v3622_v3 = vadd.f32 %v10629_v51, %v3595_v57  ;;  %v3596_v61 = vadd.f32 %v3543_v58, %v10662_v39  ;;  %v3601_v36 = vadd.f32 %v8431_v23, %v10665_v12 }
 0x1c3   : > { %v3773_v63 = vor.u32 %v3771_v59, %v3770_v54  ;;  %v3852_v49 = vsel %vm10728_vm7, %v3770_v54, 0  ;;  %v3763_v56 = vrot.slane %v3761_v47, 7  ;;  %v3625_v43 = vadd.f32 %v10629_v51, %v3598_v53  ;;  %v3556_v28 = vpop.f32.mrf.mxu0 }
 0x1c4   : > { %v7532_v6 = vcombine.low %v3852_v49, %v3852_v49  ;;  %v3642_v39 = vmax.f32 %v3622_v3, 0.0  ;;  %v3623_v12 = vadd.f32 %v10629_v51, %v3596_v61  ;;  %v3628_v60 = vadd.f32 %v10629_v51, %v3601_v36 }
 0x1c5   : > { %v3842_v62 = vsel %vm10728_vm7, 0, %v3773_v63  ;;  %v3766_v31 = vor.u32 %v3764_v0, %v3763_v56  ;;  %v3851_v4 = vsel %vm10728_vm7, %v3763_v56, 0  ;;  %v3645_v1 = vmax.f32 %v3625_v43, 0.0  ;;  %v8432_v14 = vpop.f32.mrf.mxu0 }
 0x1c6   : > { %v7530_v20 = vcombine.low %v3842_v62, %v3842_v62  ;;  %v7531_v40 = vcombine.high %v3842_v62, %v3842_v62  ;;  %3980 = vst [vmem:[#allocation2 + $0x2c] sm:$0x1] %v7532_v6  ;;  %v7529_v27 = vcombine.low %v3851_v4, %v3851_v4  ;;  %v3724_v46 = vsel %vm10789_vm0, %v3642_v39, 0.0 }
 0x1c7   : > { %v3841_v44 = vsel %vm10728_vm7, 0, %v3766_v31  ;;  %v3727_v29 = vsel %vm10770_vm13, %v3645_v1, 0.0  ;;  %v3643_v15 = vmax.f32 %v3623_v12, 0.0  ;;  %v3648_v7 = vmax.f32 %v3628_v60, 0.0  ;;  %v3559_v13 = vpop.f32.mrf.mxu0  ;;  %v10864_v25 = vld [vmem:[#allocation2 + $0xc] sm:$0xe] }
 0x1c8   : > { %3978 = vst [vmem:[#allocation2 + $0x24] sm:$0xf] %v7530_v20  ;;  %3979 = vst [vmem:[#allocation2 + $0x28] sm:$0xf] %v7531_v40  ;;  %v7527_v41 = vcombine.low %v3841_v44, %v3841_v44  ;;  %v7528_v5 = vcombine.high %v3841_v44, %v3841_v44  ;;  %v3741_v42 = vpack.c.bf16 %v3727_v29, %v3726_v48  ;;  %vm3674_vm6 = vcmp.ge.s32.totalorder %v10571_v22, 0 }
 0x1c9   : > { %3977 = vst [vmem:[#allocation2 + $0x20] sm:$0x1] %v7529_v27  ;;  %v3599_v32 = vadd.f32 %v3556_v28, %v10677_v18  ;;  %v3725_v50 = vsel %vm10789_vm0, %v3643_v15, 0.0  ;;  %v3730_v37 = vsel %vm10808_vm4, %v3648_v7, 0.0  ;;  %v3602_v8 = vadd.f32 %v8432_v14, %v10682_v52  ;;  %v8435_v11 = vpop.f32.mrf.mxu0  ;;  %v10823_v9 = vld [vmem:[#allocation2] sm:$0xe] }
 0x1ca   : > { %v3600_v38 = vadd.f32 %v3559_v13, %v10704_v35  ;;  %3975 = vst [vmem:[#allocation2 + $0x18] sm:$0xf] %v7527_v41  ;;  %3976 = vst [vmem:[#allocation2 + $0x1c] sm:$0xf] %v7528_v5  ;;  %v3782_v59 = vshrl.u32 %v3741_v42, 16  ;;  %v3785_v45 = vshll.u32 %v3741_v42, 16  ;;  %v3740_v24 = vpack.c.bf16 %v3725_v50, %v3724_v46 }
 0x1cb   : > { %v3626_v18 = vadd.f32 %v10629_v51, %v3599_v32  ;;  %vm3684_vm8 = vcmp.lt.s32.totalorder %v10571_v22, 16  ;;  %v3629_v35 = vadd.f32 %v10629_v51, %v3602_v8  ;;  %v3605_v30 = vadd.f32 %v8435_v11, %v10707_v17  ;;  %v3572_v2 = vpop.f32.mrf.mxu0  ;;  %v10862_v14 = vld [vmem:[#allocation2 + $0x8] sm:$0x1]  ;;  %v10870_v21 = vld [vmem:[#allocation2 + $0x4] sm:$0xf] }
 0x1cc   : > { %v3627_v58 = vadd.f32 %v10629_v51, %v3600_v38  ;;  %v7583_v16 = vrot.slane %v10823_v9, 9  ;;  %v3784_v57 = vrot.slane %v3782_v59, 7  ;;  %v3775_v54 = vshrl.u32 %v3740_v24, 16  ;;  %vm10879_vm11 = vmand %vm3674_vm6, %vm3684_vm8  ;;  %v10892_v52 = vld [vmem:[#allocation2 + $0x14] sm:$0x1] }
 0x1cd   : > { %v3778_v47 = vshll.u32 %v3740_v24, 16  ;;  %v3646_v0 = vmax.f32 %v3626_v18, 0.0  ;;  %v3649_v53 = vmax.f32 %v3629_v35, 0.0  ;;  %v3632_v33 = vadd.f32 %v10629_v51, %v3605_v30  ;;  %v8436_v3 = vpop.f32.mrf.mxu0 }
 0x1ce   : > { %v3647_v23 = vmax.f32 %v3627_v58, 0.0  ;;  %v3603_v48 = vadd.f32 %v3572_v2, %v10722_v34  ;;  %v3787_v61 = vor.u32 %v3785_v45, %v3784_v57  ;;  %v3854_v36 = vsel %vm10728_vm7, %v3784_v57, 0  ;;  %v10898_v57 = vld [vmem:[#allocation2 + $0x10] sm:$0xf] }
 0x1cf   : > { %v3777_v63 = vrot.slane %v3775_v54, 7  ;;  %v3728_v17 = vsel %vm10832_vm9, %v3646_v0, 0.0  ;;  %v7538_v49 = vcombine.low %v3854_v36, %v3854_v36  ;;  %v3731_v56 = vsel %vm10808_vm4, %v3649_v53, 0.0  ;;  %v3575_v1 = vpop.f32.mrf.mxu0 }
 0x1d0   : > { %v3729_v19 = vsel %vm10832_vm9, %v3647_v23, 0.0  ;;  %v3652_v43 = vmax.f32 %v3632_v33, 0.0  ;;  %v3844_v28 = vsel %vm10728_vm7, 0, %v3787_v61  ;;  %v3743_v12 = vpack.c.bf16 %v3731_v56, %v3730_v37 }
 0x1d1   : > { %v3780_v6 = vor.u32 %v3778_v47, %v3777_v63  ;;  %v3853_v39 = vsel %vm10728_vm7, %v3777_v63, 0  ;;  %v7536_v60 = vcombine.low %v3844_v28, %v3844_v28  ;;  %v7537_v62 = vcombine.high %v3844_v28, %v3844_v28  ;;  %3986 = vst [vmem:[#allocation2 + $0x44] sm:$0x1] %v7538_v49 }
 0x1d2   : > { %v7535_v31 = vcombine.low %v3853_v39, %v3853_v39  ;;  %v3742_v4 = vpack.c.bf16 %v3729_v19, %v3728_v17  ;;  %v3796_v40 = vshrl.u32 %v3743_v12, 16  ;;  %v3799_v27 = vshll.u32 %v3743_v12, 16 }
 0x1d3   : > { %v3843_v20 = vsel %vm10728_vm7, 0, %v3780_v6  ;;  %v3734_v46 = vsel %vm10854_vm10, %v3652_v43, 0.0  ;;  %3984 = vst [vmem:[#allocation2 + $0x3c] sm:$0xf] %v7536_v60  ;;  %3985 = vst [vmem:[#allocation2 + $0x40] sm:$0xf] %v7537_v62  ;;  %v3630_v41 = vadd.f32 %v10629_v51, %v3603_v48  ;;  %v3606_v5 = vadd.f32 %v8436_v3, %v10724_v55 }
 0x1d4   : > { %v7533_v44 = vcombine.low %v3843_v20, %v3843_v20  ;;  %v7534_v29 = vcombine.high %v3843_v20, %v3843_v20  ;;  %3983 = vst [vmem:[#allocation2 + $0x38] sm:$0x1] %v7535_v31  ;;  %v3789_v15 = vshrl.u32 %v3742_v4, 16  ;;  %v3792_v7 = vshll.u32 %v3742_v4, 16 }
 0x1d5   : > { %v3798_v13 = vrot.slane %v3796_v40, 7  ;;  %v3604_v42 = vadd.f32 %v3575_v1, %v10732_v26  ;;  %v4644_v37 = vrot.slane %v10870_v21, 5  ;;  %v4647_v8 = vrot.slane %v10862_v14, 5 }
 0x1d6   : > { %3981 = vst [vmem:[#allocation2 + $0x30] sm:$0xf] %v7533_v44  ;;  %3982 = vst [vmem:[#allocation2 + $0x34] sm:$0xf] %v7534_v29  ;;  %v3791_v32 = vrot.slane %v3789_v15, 7  ;;  %v7584_v38 = vrot.slane %v10864_v25, 9  ;;  %v3633_v59 = vadd.f32 %v10629_v51, %v3606_v5 }
 0x1d7   : > { %v3801_v55 = vor.u32 %v3799_v27, %v3798_v13  ;;  %v3856_v26 = vsel %vm10728_vm7, %v3798_v13, 0  ;;  %v3650_v11 = vmax.f32 %v3630_v41, 0.0  ;;  %v3631_v18 = vadd.f32 %v10629_v51, %v3604_v42  ;;  %v10902_v51 = vld [vmem:[#allocation2] sm:$0xf]  ;;  %v8932_v13 = vld [vmem:[#allocation3 + $0x130] sm:$0xff]  }
 0x1d8   : > { %v7544_v45 = vcombine.low %v3856_v26, %v3856_v26  ;;  %v3794_v24 = vor.u32 %v3792_v7, %v3791_v32  ;;  %v3855_v22 = vsel %vm10728_vm7, %v3791_v32, 0  ;;  %v3653_v2 = vmax.f32 %v3633_v59, 0.0  ;;  %v11886_v59 = vld [vmem:[#allocation11_spill] sm:$0xff] }
 0x1d9   : > { %v3846_v35 = vsel %vm10728_vm7, 0, %v3801_v55  ;;  %v7541_v58 = vcombine.low %v3855_v22, %v3855_v22  ;;  %v3732_v30 = vsel %vm10879_vm11, %v3650_v11, 0.0  ;;  %v3651_v53 = vmax.f32 %v3631_v18, 0.0  ;;  %v4620_v22 = vld [vmem:[#allocation2 + $0x18] sm:$0xe] }
 0x1da   : > { %v7542_v54 = vcombine.low %v3846_v35, %v3846_v35  ;;  %v7543_v47 = vcombine.high %v3846_v35, %v3846_v35  ;;  %3992 = vst [vmem:[#allocation2 + $0x5c] sm:$0x1] %v7544_v45  ;;  %v3845_v0 = vsel %vm10728_vm7, 0, %v3794_v24  ;;  %v3735_v48 = vsel %vm10854_vm10, %v3653_v2, 0.0  ;;  %v10936_v24 = vld [vmem:[#allocation2 + $0x1c] sm:$0xf] }
 0x1db   : > { %v7539_v23 = vcombine.low %v3845_v0, %v3845_v0  ;;  %v7540_v33 = vcombine.high %v3845_v0, %v3845_v0  ;;  %3989 = vst [vmem:[#allocation2 + $0x50] sm:$0x1] %v7541_v58  ;;  %v4645_v61 = vsel %vm9577_vm5, %v7583_v16, %v4644_v37  ;;  %v3745_v36 = vpack.c.bf16 %v3735_v48, %v3734_v46  ;;  %v10948_v48 = vld [vmem:[#allocation2 + $0x2c] sm:$0x1] }
 0x1dc   : > { %3990 = vst [vmem:[#allocation2 + $0x54] sm:$0xf] %v7542_v54  ;;  %3991 = vst [vmem:[#allocation2 + $0x58] sm:$0xf] %v7543_v47  ;;  %v3733_v63 = vsel %vm10879_vm11, %v3651_v53, 0.0  ;;  %v4646_v17 = vrot.slane %v4644_v37, 4 }
 0x1dd   : > { %v4651_v49 = vrot.slane %v10898_v57, 5  ;;  %3987 = vst [vmem:[#allocation2 + $0x48] sm:$0xf] %v7539_v23  ;;  %3988 = vst [vmem:[#allocation2 + $0x4c] sm:$0xf] %v7540_v33  ;;  %v3744_v56 = vpack.c.bf16 %v3733_v63, %v3732_v30  ;;  %v4654_v19 = vrot.slane %v10892_v52, 5 }
 0x1de   : > { %v4040_v43 = vshrl.u32 %v10902_v51, 16  ;;  %v4043_v9 = vshll.u32 %v10902_v51, 16  ;;  %v3810_v34 = vshrl.u32 %v3745_v36, 16  ;;  %v3813_v16 = vshll.u32 %v3745_v36, 16  ;;  %v10940_v54 = vld [vmem:[#allocation2 + $0x20] sm:$0x1] }
 0x1df   : > { %v4648_v28 = vsel %vm9577_vm5, %v4646_v17, %v4647_v8  ;;  %v4652_v6 = vsel %vm9577_vm5, %v7584_v38, %v4651_v49  ;;  %v3803_v39 = vshrl.u32 %v3744_v56, 16  ;;  %v3806_v12 = vshll.u32 %v3744_v56, 16  ;;  %v10931_v38 = vld [vmem:[#allocation2 + $0xc] sm:$0xf]  ;;  %v8934_v47 = vld [vmem:[#allocation3 + $0x128] sm:$0xff]  }
 0x1e0   : > { %v7591_v60 = vcombine.low %v4645_v61, %v4648_v28  ;;  %v4653_v62 = vrot.slane %v4651_v49, 4  ;;  %v3812_v31 = vrot.slane %v3810_v34, 7  ;;  %v4042_v4 = vrot.slane %v4040_v43, 4  ;;  %v10946_v33 = vld [vmem:[#allocation2 + $0x28] sm:$0xf] }
 0x1e1   : > { %v4045_v1 = vrot.slane %v4043_v9, 5  ;;  %v4049_v25 = vshll.u32 %v10870_v21, 16  ;;  %v3805_v20 = vrot.slane %v3803_v39, 7  ;;  %v4053_v27 = vshrl.u32 %v10870_v21, 16  ;;  %v4621_v49 = vld [vmem:[#allocation2 + $0x24] sm:$0xe] }
 0x1e2   : > { %8517 = vmatprep.mubr.bf16.mxu0 %v7591_v60  ;;  %v4655_v40 = vsel %vm9577_vm5, %v4653_v62, %v4654_v19  ;;  %v4059_v46 = vshll.u32 %v10862_v14, 16  ;;  %v3815_v44 = vor.u32 %v3813_v16, %v3812_v31  ;;  %v3858_v29 = vsel %vm10728_vm7, %v3812_v31, 0  ;;  %v10952_v34 = vld [vmem:[#allocation2 + $0x18] sm:$0xf] }
 0x1e3   : > { %v7592_v15 = vcombine.low %v4652_v6, %v4655_v40  ;;  %v4046_v7 = vor.u32 %v4045_v1, %v4042_v4  ;;  %v7550_v41 = vcombine.low %v3858_v29, %v3858_v29  ;;  %v3808_v5 = vor.u32 %v3806_v12, %v3805_v20  ;;  %v10965_v29 = vld [vmem:[#allocation2 + $0x24] sm:$0xf] }
 0x1e4   : > { %v3857_v42 = vsel %vm10728_vm7, %v3805_v20, 0  ;;  %v4051_v32 = vrot.slane %v4049_v25, 5  ;;  %v3848_v50 = vsel %vm10728_vm7, 0, %v3815_v44  ;;  %v4055_v14 = vrot.slane %v4053_v27, 4 }
 0x1e5   : > { %v7547_v37 = vcombine.low %v3857_v42, %v3857_v42  ;;  %8518 = vmatmul.mubr.bf16.vlgmr.msra.gmra.mxu0 %v7592_v15  ;;  %v4047_v8 = vrot.slane %v4046_v7, 4  ;;  %v7548_v55 = vcombine.low %v3848_v50, %v3848_v50  ;;  %v7549_v26 = vcombine.high %v3848_v50, %v3848_v50  ;;  %3998 = vst [vmem:[#allocation2 + $0x74] sm:$0x1] %v7550_v41  ;;  %v8938_v15 = vld [vmem:[#allocation3 + $0x118] sm:$0xff]   ;;  %v8933_v50 = vld [vmem:[#allocation3 + $0x30] sm:$0xff]  }
 0x1e6   : > { %v3847_v11 = vsel %vm10728_vm7, 0, %v3808_v5  ;;  %8566 = vmatpush3.bf16.msra.mxu0 %v11886_v59  ;;  %v4061_v45 = vrot.slane %v4059_v46, 5  ;;  %v4056_v2 = vor.u32 %v4055_v14, %v4051_v32  ;;  %v4064_v10 = vshrl.u32 %v10931_v38, 16  ;;  %v4622_v14 = vld [vmem:[#allocation2 + $0x30] sm:$0xe] }
 0x1e7   : > { %v7545_v18 = vcombine.low %v3847_v11, %v3847_v11  ;;  %v7546_v35 = vcombine.high %v3847_v11, %v3847_v11  ;;  %3995 = vst [vmem:[#allocation2 + $0x68] sm:$0x1] %v7547_v37  ;;  %v4052_v30 = vsel %vm9350_vm2, %v4047_v8, %v4051_v32  ;;  %8567 = vmatprep.subr.bf16.mxu0 %v8932_v13  ;;  %3996 = vst [vmem:[#allocation2 + $0x6c] sm:$0xf] %v7548_v55 }
 0x1e8   : > { %3997 = vst [vmem:[#allocation2 + $0x70] sm:$0xf] %v7549_v26  ;;  %v4067_v0 = vshll.u32 %v10931_v38, 16  ;;  %v4073_v53 = vshll.u32 %v10898_v57, 16  ;;  %v4077_v23 = vshrl.u32 %v10898_v57, 16  ;;  %v4057_v61 = vrot.slane %v4056_v2, 4 }
 0x1e9   : > { %3993 = vst [vmem:[#allocation2 + $0x60] sm:$0xf] %v7545_v18  ;;  %3994 = vst [vmem:[#allocation2 + $0x64] sm:$0xf] %v7546_v35  ;;  %v4083_v36 = vshll.u32 %v10892_v52, 16  ;;  %v7585_v63 = vrot.slane %v4620_v22, 9 }
 0x1ea   : > { %v4658_v17 = vrot.slane %v10936_v24, 5  ;;  %v4066_v56 = vrot.slane %v4064_v10, 4  ;;  %v4069_v19 = vrot.slane %v4067_v0, 5  ;;  %v4075_v43 = vrot.slane %v4073_v53, 5  ;;  %8568 = vmatpush3.bf16.msra.mxu0 %v8932_v13  ;;  %v8936_v52 = vld [vmem:[#allocation3 + $0x120] sm:$0xff]   ;;  %v8940_v22 = vld [vmem:[#allocation3 + $0x110] sm:$0xff]  }
 0x1eb   : > { %v4079_v9 = vrot.slane %v4077_v23, 4  ;;  %v4062_v16 = vsel %vm9350_vm2, %v4057_v61, %v4061_v45  ;;  %v4085_v28 = vrot.slane %v4083_v36, 5  ;;  %8569 = vmatprep.subr.bf16.mxu0 %v8934_v47  ;;  %v4661_v31 = vrot.slane %v10940_v54, 5  ;;  %v10978_v45 = vld [vmem:[#allocation2 + $0x34] sm:$0xf] }
 0x1ec   : > { %v4659_v6 = vsel %vm9577_vm5, %v7585_v63, %v4658_v17  ;;  %v4660_v39 = vrot.slane %v4658_v17, 4  ;;  %v7551_v12 = vcombine.low %v4052_v30, %v4062_v16  ;;  %v4070_v60 = vor.u32 %v4069_v19, %v4066_v56  ;;  %v4623_v10 = vld [vmem:[#allocation2 + $0x3c] sm:$0xe]  ;;  %v9010_v36 = vld [vmem:[#allocation3 + $0x38] sm:$0xff]   ;;  %v10989_v19 = vld [vmem:[#allocation2 + $0x44] sm:$0x1] }
 0x1ed   : > { %v4080_v62 = vor.u32 %v4079_v9, %v4075_v43  ;;  %v7586_v4 = vrot.slane %v4621_v49, 9  ;;  %v4665_v1 = vrot.slane %v10946_v33, 5  ;;  %v4668_v25 = vrot.slane %v10948_v48, 5 }
 0x1ee   : > { %v4088_v20 = vshrl.u32 %v10952_v34, 16  ;;  %8453 = vmatprep.mubr.bf16.mxu1 %v7551_v12  ;;  %v4071_v40 = vrot.slane %v4070_v60, 4  ;;  %v4662_v46 = vsel %vm9577_vm5, %v4660_v39, %v4661_v31  ;;  %8570 = vmatpush3.bf16.msra.mxu0 %v8934_v47  ;;  %v4091_v44 = vshll.u32 %v10952_v34, 16  ;;  %v10981_v47 = vld [vmem:[#allocation2 + $0x38] sm:$0x1] }
 0x1ef   : > { %v4081_v27 = vrot.slane %v4080_v62, 4  ;;  %v7593_v7 = vcombine.low %v4659_v6, %v4662_v46  ;;  %v4666_v13 = vsel %vm9577_vm5, %v7586_v4, %v4665_v1  ;;  %v4667_v41 = vrot.slane %v4665_v1, 4  ;;  %8571 = vmatprep.subr.bf16.mxu0 %v8936_v52  ;;  %v8935_v6 = vld [vmem:[#allocation3 + $0x28] sm:$0xff]  }
 0x1f0   : > { %v4090_v5 = vrot.slane %v4088_v20, 4  ;;  %v4076_v42 = vsel %vm9350_vm2, %v4071_v40, %v4075_v43  ;;  %v4093_v37 = vrot.slane %v4091_v44, 5  ;;  %v4097_v8 = vshll.u32 %v10936_v24, 16  ;;  %v10991_v43 = vld [vmem:[#allocation2 + $0x30] sm:$0xf] }
 0x1f1   : > { %v4086_v32 = vsel %vm9350_vm2, %v4081_v27, %v4085_v28  ;;  %8521 = vmatprep.mubr.bf16.mxu0 %v7593_v7  ;;  %v4669_v26 = vsel %vm9577_vm5, %v4667_v41, %v4668_v25  ;;  %v4101_v11 = vshrl.u32 %v10936_v24, 16  ;;  %v4107_v59 = vshll.u32 %v10940_v54, 16  ;;  %v10985_v54 = vld [vmem:[#allocation2 + $0x40] sm:$0xf]  ;;  %v11000_v44 = vld [vmem:[#allocation2 + $0x3c] sm:$0xf] }
 0x1f2   : > { %v7552_v55 = vcombine.low %v4076_v42, %v4086_v32  ;;  %v7594_v18 = vcombine.low %v4666_v13, %v4669_v26  ;;  %v4094_v35 = vor.u32 %v4093_v37, %v4090_v5  ;;  %v4099_v30 = vrot.slane %v4097_v8, 5  ;;  %8572 = vmatpush3.bf16.msra.mxu0 %v8936_v52  ;;  %v8942_v25 = vld [vmem:[#allocation3 + $0x108] sm:$0xff]   ;;  %v8937_v13 = vld [vmem:[#allocation3 + $0x20] sm:$0xff]  }
 0x1f3   : > { %v4112_v2 = vshrl.u32 %v10965_v29, 16  ;;  %v4103_v0 = vrot.slane %v4101_v11, 4  ;;  %v4109_v53 = vrot.slane %v4107_v59, 5  ;;  %v4115_v23 = vshll.u32 %v10965_v29, 16  ;;  %8573 = vmatprep.subr.bf16.mxu0 %v8938_v15  ;;  %v8944_v8 = vld [vmem:[#allocation3 + $0x100] sm:$0xff]  }
 0x1f4   : > { %8454 = vmatmul.mubr.bf16.vlgmr.msra.gmra.mxu1 %v7552_v55  ;;  %v4121_v61 = vshll.u32 %v10946_v33, 16  ;;  %8522 = vmatmul.mubr.bf16.gmra.mxu0 %v7594_v18  ;;  %v4095_v63 = vrot.slane %v4094_v35, 4  ;;  %v4125_v49 = vshrl.u32 %v10946_v33, 16  ;;  %v4131_v56 = vshll.u32 %v10948_v48, 16 }
 0x1f5   : > { %8470 = vmatpush3.bf16.msra.mxu1 %v9010_v36  ;;  %v4114_v17 = vrot.slane %v4112_v2, 4  ;;  %v4104_v9 = vor.u32 %v4103_v0, %v4099_v30  ;;  %v4117_v16 = vrot.slane %v4115_v23, 5  ;;  %v7587_v39 = vrot.slane %v4622_v14, 9  ;;  %v11017_v2 = vld [vmem:[#allocation2 + $0x4c] sm:$0xf] }
 0x1f6   : > { %8471 = vmatprep.subr.bf16.mxu1 %v8933_v50  ;;  %v4123_v28 = vrot.slane %v4121_v61, 5  ;;  %v4100_v52 = vsel %vm9350_vm2, %v4095_v63, %v4099_v30  ;;  %v4127_v12 = vrot.slane %v4125_v49, 4  ;;  %v4133_v60 = vrot.slane %v4131_v56, 5  ;;  %8574 = vmatpush3.bf16.msra.mxu0 %v8938_v15  ;;  %v11023_v56 = vld [vmem:[#allocation3 + $0x1b8] sm:$0xff]  }
 0x1f7   : > { %v4672_v62 = vrot.slane %v10978_v45, 5  ;;  %v4105_v31 = vrot.slane %v4104_v9, 4  ;;  %v4118_v48 = vor.u32 %v4117_v16, %v4114_v17  ;;  %v4675_v4 = vrot.slane %v10981_v47, 5  ;;  %8575 = vmatprep.subr.bf16.mxu0 %v8940_v22 }
 0x1f8   : > { %v7588_v1 = vrot.slane %v4623_v10, 9  ;;  %v4128_v20 = vor.u32 %v4127_v12, %v4123_v28  ;;  %v4679_v46 = vrot.slane %v10985_v54, 5  ;;  %v4682_v41 = vrot.slane %v10989_v19, 5  ;;  %v4624_v10 = vld [vmem:[#allocation2 + $0x48] sm:$0xe] }
 0x1f9   : > { %8472 = vmatpush3.bf16.msra.mxu1 %v8933_v50  ;;  %v4673_v40 = vsel %vm9577_vm5, %v7587_v39, %v4672_v62  ;;  %v4674_v27 = vrot.slane %v4672_v62, 4  ;;  %v4110_v15 = vsel %vm9350_vm2, %v4105_v31, %v4109_v53  ;;  %v4119_v7 = vrot.slane %v4118_v48, 4  ;;  %v11027_v39 = vld [vmem:[#allocation2 + $0x50] sm:$0x1]  ;;  %v11031_v31 = vld [vmem:[#allocation2 + $0x58] sm:$0xf] }
 0x1fa   : > { %8473 = vmatprep.subr.bf16.mxu1 %v8935_v6  ;;  %v4136_v5 = vshrl.u32 %v10991_v43, 16  ;;  %v7553_v42 = vcombine.low %v4100_v52, %v4110_v15  ;;  %v4129_v32 = vrot.slane %v4128_v20, 4  ;;  %v4680_v37 = vsel %vm9577_vm5, %v7588_v1, %v4679_v46  ;;  %8576 = vmatpush3.bf16.msra.mxu0 %v8940_v22  ;;  %v8939_v22 = vld [vmem:[#allocation3 + $0x18] sm:$0xff]   ;;  %v8941_v52 = vld [vmem:[#allocation3 + $0x10] sm:$0xff]  }
 0x1fb   : > { %v4676_v50 = vsel %vm9577_vm5, %v4674_v27, %v4675_v4  ;;  %v4124_v14 = vsel %vm9350_vm2, %v4119_v7, %v4123_v28  ;;  %v4681_v26 = vrot.slane %v4679_v46, 4  ;;  %8577 = vmatprep.subr.bf16.mxu0 %v8942_v25  ;;  %v4139_v18 = vshll.u32 %v10991_v43, 16  ;;  %v4625_v48 = vld [vmem:[#allocation2 + $0x54] sm:$0xe] }
 0x1fc   : > { %v7595_v55 = vcombine.low %v4673_v40, %v4676_v50  ;;  %v4138_v11 = vrot.slane %v4136_v5, 4  ;;  %8457 = vmatprep.mubr.bf16.mxu1 %v7553_v42  ;;  %v4134_v59 = vsel %vm9350_vm2, %v4129_v32, %v4133_v60  ;;  %v4145_v35 = vshll.u32 %v10978_v45, 16  ;;  %v11037_v5 = vld [vmem:[#allocation2 + $0x5c] sm:$0x1]  ;;  %v5151_v42 = vld [vmem:[#allocation2 + $0xc] sm:$0xf] }
 0x1fd   : > { %8474 = vmatpush3.bf16.msra.mxu1 %v8935_v6  ;;  %v4149_v30 = vshrl.u32 %v10978_v45, 16  ;;  %v7554_v0 = vcombine.low %v4124_v14, %v4134_v59  ;;  %v4683_v53 = vsel %vm9577_vm5, %v4681_v26, %v4682_v41  ;;  %v4155_v23 = vshll.u32 %v10981_v47, 16  ;;  %v11047_v59 = vld [vmem:[#allocation2 + $0x10] sm:$0xf] }
 0x1fe   : > { %8525 = vmatprep.mubr.bf16.mxu0 %v7595_v55  ;;  %8475 = vmatprep.subr.bf16.mxu1 %v8937_v13  ;;  %v4160_v61 = vshrl.u32 %v11000_v44, 16  ;;  %v7596_v36 = vcombine.low %v4680_v37, %v4683_v53  ;;  %v4141_v63 = vrot.slane %v4139_v18, 5  ;;  %v4147_v17 = vrot.slane %v4145_v35, 5  ;;  %v8943_v18 = vld [vmem:[#allocation3 + $0x8] sm:$0xff]  }
 0x1ff   : > { %v4151_v49 = vrot.slane %v4149_v30, 4  ;;  %8578 = vmatpush3.bf16.msra.mxu0 %v8942_v25  ;;  %8458 = vmatmul.mubr.bf16.gmra.mxu1 %v7554_v0  ;;  %v4157_v9 = vrot.slane %v4155_v23, 5  ;;  %v4163_v28 = vshll.u32 %v11000_v44, 16  ;;  %v4169_v6 = vshll.u32 %v10985_v54, 16  ;;  %v11050_v0 = vld [vmem:[#allocation2 + $0x14] sm:$0x1] }
 0x200   : > { %v4162_v16 = vrot.slane %v4160_v61, 4  ;;  %8579 = vmatprep.subr.bf16.mxu0 %v8944_v8  ;;  %8526 = vmatmul.mubr.bf16.gmra.mxu0 %v7596_v36  ;;  %v4142_v47 = vor.u32 %v4141_v63, %v4138_v11  ;;  %v4173_v60 = vshrl.u32 %v10985_v54, 16  ;;  %v4179_v62 = vshll.u32 %v10989_v19, 16  ;;  %v11056_v63 = vld [vmem:[#allocation2 + $0x48] sm:$0xf] }
 0x201   : > { %8476 = vmatpush3.bf16.msra.mxu1 %v8937_v13  ;;  %v4152_v12 = vor.u32 %v4151_v49, %v4147_v17  ;;  %v4165_v4 = vrot.slane %v4163_v28, 5  ;;  %v4171_v1 = vrot.slane %v4169_v6, 5  ;;  %v7589_v25 = vrot.slane %v4624_v10, 9 }
 0x202   : > { %8477 = vmatprep.subr.bf16.mxu1 %v8939_v22  ;;  %v4686_v20 = vrot.slane %v11017_v2, 5  ;;  %v4143_v40 = vrot.slane %v4142_v47, 4  ;;  %v4175_v46 = vrot.slane %v4173_v60, 4  ;;  %v4181_v15 = vrot.slane %v4179_v62, 5  ;;  %v8946_v60 = vld [vmem:[#allocation3] sm:$0xff]  }
 0x203   : > { %v4153_v27 = vrot.slane %v4152_v12, 4  ;;  %8580 = vmatpush3.bf16.msra.mxu0 %v8944_v8  ;;  %v4166_v7 = vor.u32 %v4165_v4, %v4162_v16  ;;  %v4689_v19 = vrot.slane %v11027_v39, 5  ;;  %v7590_v8 = vrot.slane %v4625_v48, 9 }
 0x204   : > { %v4687_v13 = vsel %vm9577_vm5, %v7589_v25, %v4686_v20  ;;  %v4688_v41 = vrot.slane %v4686_v20, 4  ;;  %8629 = vmatprep.subr.bf16.mxu0 %v11023_v56  ;;  %v4148_v32 = vsel %vm9350_vm2, %v4143_v40, %v4147_v17  ;;  %v4176_v37 = vor.u32 %v4175_v46, %v4171_v1 }
 0x205   : > { %v4158_v50 = vsel %vm9350_vm2, %v4153_v27, %v4157_v9  ;;  %8478 = vmatpush3.bf16.msra.mxu1 %v8939_v22  ;;  %v4167_v55 = vrot.slane %v4166_v7, 4  ;;  %v4693_v11 = vrot.slane %v11031_v31, 5  ;;  %v4696_v10 = vrot.slane %v11037_v5, 5 }
 0x206   : > { %v7555_v14 = vcombine.low %v4148_v32, %v4158_v50  ;;  %v4690_v26 = vsel %vm9577_vm5, %v4688_v41, %v4689_v19  ;;  %8479 = vmatprep.subr.bf16.mxu1 %v8941_v52  ;;  %v4177_v35 = vrot.slane %v4176_v37, 4  ;;  %v5176_v53 = vshrl.u32 %v5151_v42, 16  ;;  %v11072_v32 = vld [vmem:[#allocation3 + $0xf8] sm:$0xff]  }
 0x207   : > { %v7597_v30 = vcombine.low %v4687_v13, %v4690_v26  ;;  %v4172_v22 = vsel %vm9350_vm2, %v4167_v55, %v4171_v1  ;;  %v4694_v23 = vsel %vm9577_vm5, %v7590_v8, %v4693_v11  ;;  %v4695_v61 = vrot.slane %v4693_v11, 4 }
 0x208   : > { %8461 = vmatprep.mubr.bf16.mxu1 %v7555_v14  ;;  %v5179_v36 = vshll.u32 %v5151_v42, 16  ;;  %v4182_v17 = vsel %vm9350_vm2, %v4177_v35, %v4181_v15  ;;  %v5178_v49 = vrot.slane %v5176_v53, 4  ;;  %v5185_v9 = vshll.u32 %v11047_v59, 16 }
 0x209   : > { %8529 = vmatprep.mubr.bf16.mxu0 %v7597_v30  ;;  %8480 = vmatpush3.bf16.msra.mxu1 %v8941_v52  ;;  %v5189_v16 = vshrl.u32 %v11047_v59, 16  ;;  %v7556_v28 = vcombine.low %v4172_v22, %v4182_v17  ;;  %v4697_v6 = vsel %vm9577_vm5, %v4695_v61, %v4696_v10  ;;  %v5195_v12 = vshll.u32 %v11050_v0, 16  ;;  %v11066_v52 = vld [vmem:[#allocation2 + $0x54] sm:$0xf]  ;;  %v5154_v22 = vld [vmem:[#allocation2 + $0x18] sm:$0xf] }
 0x20a   : > { %v5181_v47 = vrot.slane %v5179_v36, 5  ;;  %8481 = vmatprep.subr.bf16.mxu1 %v8943_v18  ;;  %v7598_v62 = vcombine.low %v4694_v23, %v4697_v6  ;;  %v5187_v48 = vrot.slane %v5185_v9, 5  ;;  %v4184_v1 = vshrl.u32 %v11056_v63, 16  ;;  %v11083_v17 = vld [vmem:[#allocation2 + $0x1c] sm:$0xf] }
 0x20b   : > { %v5191_v4 = vrot.slane %v5189_v16, 4  ;;  %8462 = vmatmul.mubr.bf16.gmra.mxu1 %v7556_v28  ;;  %v4187_v20 = vshll.u32 %v11056_v63, 16  ;;  %v4193_v40 = vshll.u32 %v11017_v2, 16  ;;  %v5197_v46 = vrot.slane %v5195_v12, 5  ;;  %v11088_v12 = vld [vmem:[#allocation2 + $0x20] sm:$0x1] }
 0x20c   : > { %v5182_v25 = vor.u32 %v5181_v47, %v5178_v49  ;;  %8530 = vmatmul.mubr.bf16.gmra.mxu0 %v7598_v62  ;;  %v4186_v15 = vrot.slane %v4184_v1, 4  ;;  %v4197_v7 = vshrl.u32 %v11017_v2, 16  ;;  %v4208_v42 = vshrl.u32 %v11066_v52, 16 }
 0x20d   : > { %v5192_v27 = vor.u32 %v5191_v4, %v5187_v48  ;;  %8482 = vmatpush3.bf16.msra.mxu1 %v8943_v18  ;;  %v4189_v41 = vrot.slane %v4187_v20, 5  ;;  %v4195_v19 = vrot.slane %v4193_v40, 5  ;;  %v4203_v8 = vshll.u32 %v11027_v39, 16 }
 0x20e   : > { %v5183_v13 = vrot.slane %v5182_v25, 4  ;;  %8483 = vmatprep.subr.bf16.mxu1 %v8946_v60  ;;  %v4199_v37 = vrot.slane %v4197_v7, 4  ;;  %v4211_v14 = vshll.u32 %v11066_v52, 16  ;;  %v4210_v11 = vrot.slane %v4208_v42, 4  ;;  %v5157_v25 = vld [vmem:[#allocation2 + $0x24] sm:$0xf] }
 0x20f   : > { %v5193_v50 = vrot.slane %v5192_v27, 4  ;;  %v4190_v26 = vor.u32 %v4189_v41, %v4186_v15  ;;  %v4217_v18 = vshll.u32 %v11031_v31, 16  ;;  %v4221_v53 = vshrl.u32 %v11031_v31, 16  ;;  %v11094_v15 = vld [vmem:[#allocation2 + $0x28] sm:$0xf] }
 0x210   : > { %v5188_v55 = vsel %vm9350_vm2, %v5183_v13, %v5187_v48  ;;  %v4200_v30 = vor.u32 %v4199_v37, %v4195_v19  ;;  %v4213_v10 = vrot.slane %v4211_v14, 5  ;;  %v4227_v36 = vshll.u32 %v11037_v5, 16  ;;  %v11099_v37 = vld [vmem:[#allocation2 + $0x2c] sm:$0x1] }
 0x211   : > { %v5198_v35 = vsel %vm9350_vm2, %v5193_v50, %v5197_v46  ;;  %8484 = vmatpush3.bf16.msra.mxu1 %v8946_v60  ;;  %v4191_v39 = vrot.slane %v4190_v26, 4  ;;  %v4219_v61 = vrot.slane %v4217_v18, 5  ;;  %v4205_v9 = vrot.slane %v4203_v8, 5 }
 0x212   : > { %v7623_v23 = vcombine.low %v5188_v55, %v5198_v35  ;;  %8533 = vmatprep.subr.bf16.mxu1 %v11072_v32  ;;  %v4201_v49 = vrot.slane %v4200_v30, 4  ;;  %v4214_v16 = vor.u32 %v4213_v10, %v4210_v11  ;;  %v4223_v28 = vrot.slane %v4221_v53, 4 }
 0x213   : > { %v4196_v6 = vsel %vm9350_vm2, %v4191_v39, %v4195_v19  ;;  %v4229_v47 = vrot.slane %v4227_v36, 5  ;;  %v5200_v60 = vshrl.u32 %v5154_v22, 16  ;;  %v5203_v62 = vshll.u32 %v5154_v22, 16  ;;  %v5160_v22 = vld [vmem:[#allocation2 + $0x30] sm:$0xf] }
 0x214   : > { %8581 = vmatprep.mubr.bf16.mxu0 %v7623_v23  ;;  %v4206_v5 = vsel %vm9350_vm2, %v4201_v49, %v4205_v9  ;;  %v4215_v48 = vrot.slane %v4214_v16, 4  ;;  %v4224_v4 = vor.u32 %v4223_v28, %v4219_v61  ;;  %v5209_v1 = vshll.u32 %v11083_v17, 16  ;;  %v11108_v49 = vld [vmem:[#allocation2 + $0x34] sm:$0xf] }
 0x215   : > { %v7557_v20 = vcombine.low %v4196_v6, %v4206_v5  ;;  %v5202_v40 = vrot.slane %v5200_v60, 4  ;;  %v5205_v27 = vrot.slane %v5203_v62, 5  ;;  %v5213_v46 = vshrl.u32 %v11083_v17, 16  ;;  %v11114_v60 = vld [vmem:[#allocation2 + $0x38] sm:$0x1] }
 0x216   : > { %v4220_v7 = vsel %vm9350_vm2, %v4215_v48, %v4219_v61  ;;  %v4225_v13 = vrot.slane %v4224_v4, 4  ;;  %v5211_v41 = vrot.slane %v5209_v1, 5  ;;  %v5219_v19 = vshll.u32 %v11088_v12, 16 }
 0x217   : > { %8465 = vmatprep.mubr.bf16.mxu1 %v7557_v20  ;;  %v5206_v42 = vor.u32 %v5205_v27, %v5202_v40  ;;  %v5215_v50 = vrot.slane %v5213_v46, 4  ;;  %v5224_v8 = vshrl.u32 %v5157_v25, 16  ;;  %v5227_v14 = vshll.u32 %v5157_v25, 16  ;;  %v5163_v25 = vld [vmem:[#allocation2 + $0x3c] sm:$0xf] }
 0x218   : > { %v4230_v55 = vsel %vm9350_vm2, %v4225_v13, %v4229_v47  ;;  %v7567_v26 = vcombine.low %v10902_v51, %v10870_v21  ;;  %v5233_v11 = vshll.u32 %v11094_v15, 16  ;;  %v5237_v18 = vshrl.u32 %v11094_v15, 16 }
 0x219   : > { %v7558_v35 = vcombine.low %v4220_v7, %v4230_v55  ;;  %v5207_v30 = vrot.slane %v5206_v42, 4  ;;  %v5216_v10 = vor.u32 %v5215_v50, %v5211_v41  ;;  %v5226_v53 = vrot.slane %v5224_v8, 4  ;;  %v11127_v8 = vld [vmem:[#allocation2 + $0x44] sm:$0x1] }
 0x21a   : > { %v5229_v23 = vrot.slane %v5227_v14, 5  ;;  %v5235_v39 = vrot.slane %v5233_v11, 5  ;;  %v5239_v61 = vrot.slane %v5237_v18, 4  ;;  %v5243_v36 = vshll.u32 %v11099_v37, 16  ;;  %v8952_v18 = vld [vmem:[#allocation3 + $0xf0] sm:$0xff]  }
 0x21b   : > { %8466 = vmatmul.mubr.bf16.gmra.mxu1 %v7558_v35  ;;  %v5212_v21 = vsel %vm9350_vm2, %v5207_v30, %v5211_v41  ;;  %v5217_v51 = vrot.slane %v5216_v10, 4  ;;  %v5221_v9 = vrot.slane %v5219_v19, 5  ;;  %v7568_v16 = vcombine.low %v10931_v38, %v10898_v57  ;;  %v8950_v57 = vld [vmem:[#allocation3 + $0x1b0] sm:$0xff]   ;;  %v11121_v19 = vld [vmem:[#allocation2 + $0x40] sm:$0xf] }
 0x21c   : > { %8485 = vmatprep.mubr.bf16.mxu1 %v7567_v26  ;;  %v5230_v28 = vor.u32 %v5229_v23, %v5226_v53  ;;  %v5240_v6 = vor.u32 %v5239_v61, %v5235_v39  ;;  %v5245_v47 = vrot.slane %v5243_v36, 5  ;;  %v5248_v62 = vshrl.u32 %v5160_v22, 16  ;;  %v8953_v10 = vld [vmem:[#allocation3 + $0x1a8] sm:$0xff]   ;;  %v5166_v61 = vld [vmem:[#allocation2 + $0x48] sm:$0xf] }
 0x21d   : > { %v5222_v5 = vsel %vm9350_vm2, %v5217_v51, %v5221_v9  ;;  %v5251_v48 = vshll.u32 %v5160_v22, 16  ;;  %v5257_v4 = vshll.u32 %v11108_v49, 16  ;;  %v5261_v1 = vshrl.u32 %v11108_v49, 16 }
 0x21e   : > { %v7624_v20 = vcombine.low %v5212_v21, %v5222_v5  ;;  %v5231_v40 = vrot.slane %v5230_v28, 4  ;;  %v5241_v27 = vrot.slane %v5240_v6, 4  ;;  %v5250_v38 = vrot.slane %v5248_v62, 4  ;;  %v11138_v6 = vld [vmem:[#allocation2 + $0x4c] sm:$0xf] }
 0x21f   : > { %v5253_v46 = vrot.slane %v5251_v48, 5  ;;  %v5259_v7 = vrot.slane %v5257_v4, 5  ;;  %v5263_v13 = vrot.slane %v5261_v1, 4  ;;  %v5267_v41 = vshll.u32 %v11114_v60, 16  ;;  %v5169_v4 = vld [vmem:[#allocation2 + $0x54] sm:$0xf] }
 0x220   : > { %8582 = vmatmul.mubr.bf16.vlgmr.msra.gmra.mxu0 %v7624_v20  ;;  %v5236_v42 = vsel %vm9350_vm2, %v5231_v40, %v5235_v39  ;;  %v5246_v50 = vsel %vm9350_vm2, %v5241_v27, %v5245_v47  ;;  %v5272_v14 = vshrl.u32 %v5163_v25, 16  ;;  %v5275_v55 = vshll.u32 %v5163_v25, 16  ;;  %v11140_v47 = vld [vmem:[#allocation2 + $0x50] sm:$0x1] }
 0x221   : > { %v7625_v26 = vcombine.low %v5236_v42, %v5246_v50  ;;  %8630 = vmatpush3.bf16.msra.mxu0 %v11023_v56  ;;  %v7569_v11 = vcombine.low %v10952_v34, %v10936_v24  ;;  %v5254_v35 = vor.u32 %v5253_v46, %v5250_v38  ;;  %v5264_v30 = vor.u32 %v5263_v13, %v5259_v7  ;;  %v11149_v46 = vld [vmem:[#allocation2 + $0x58] sm:$0xf] }
 0x222   : > { %8631 = vmatprep.subr.bf16.mxu0 %v8950_v57  ;;  %v5274_v53 = vrot.slane %v5272_v14, 4  ;;  %v5277_v22 = vrot.slane %v5275_v55, 5  ;;  %v5281_v23 = vshll.u32 %v11121_v19, 16  ;;  %v5285_v39 = vshrl.u32 %v11121_v19, 16 }
 0x223   : > { %8585 = vmatprep.mubr.bf16.mxu0 %v7625_v26  ;;  %8486 = vmatmul.mubr.bf16.vlgmr.msra.gmra.mxu1 %v7568_v16  ;;  %v5255_v36 = vrot.slane %v5254_v35, 4  ;;  %v5265_v21 = vrot.slane %v5264_v30, 4  ;;  %v5269_v56 = vrot.slane %v5267_v41, 5  ;;  %v5291_v51 = vshll.u32 %v11127_v8, 16  ;;  %v8958_v35 = vld [vmem:[#allocation3 + $0xe0] sm:$0xff]   ;;  %v8959_v30 = vld [vmem:[#allocation3 + $0x198] sm:$0xff]  }
 0x224   : > { %8489 = vmatprep.mubr.bf16.mxu1 %v7569_v11  ;;  %8534 = vmatpush3.bf16.msra.mxu1 %v11072_v32  ;;  %v5278_v24 = vor.u32 %v5277_v22, %v5274_v53  ;;  %v5283_v34 = vrot.slane %v5281_v23, 5  ;;  %v5287_v9 = vrot.slane %v5285_v39, 4  ;;  %v7570_v28 = vcombine.low %v10965_v29, %v10946_v33  ;;  %v8955_v32 = vld [vmem:[#allocation3 + $0xe8] sm:$0xff]   ;;  %v8956_v29 = vld [vmem:[#allocation3 + $0x1a0] sm:$0xff]  }
 0x225   : > { %8632 = vmatpush3.bf16.msra.mxu0 %v8950_v57  ;;  %8535 = vmatprep.subr.bf16.mxu1 %v8952_v18  ;;  %v5260_v16 = vsel %vm9350_vm2, %v5255_v36, %v5259_v7  ;;  %v5270_v62 = vsel %vm9350_vm2, %v5265_v21, %v5269_v56  ;;  %v5293_v5 = vrot.slane %v5291_v51, 5  ;;  %v5296_v48 = vshrl.u32 %v5166_v61, 16  ;;  %v11157_v53 = vld [vmem:[#allocation2 + $0x5c] sm:$0x1]  ;;  %v11161_v51 = vld [vmem:[#allocation2 + $0x64] sm:$0xf] }
 0x226   : > { %v7626_v1 = vcombine.low %v5260_v16, %v5270_v62  ;;  %8633 = vmatprep.subr.bf16.mxu0 %v8953_v10  ;;  %v5279_v25 = vrot.slane %v5278_v24, 4  ;;  %v5288_v33 = vor.u32 %v5287_v9, %v5283_v34  ;;  %v5299_v20 = vshll.u32 %v5166_v61, 16 }
 0x227   : > { %v5298_v40 = vrot.slane %v5296_v48, 4  ;;  %v5305_v27 = vshll.u32 %v11138_v6, 16  ;;  %v5309_v57 = vshrl.u32 %v11138_v6, 16  ;;  %v5315_v38 = vshll.u32 %v11140_v47, 16 }
 0x228   : > { %8586 = vmatmul.mubr.bf16.gmra.mxu0 %v7626_v1  ;;  %8536 = vmatpush3.bf16.msra.mxu1 %v8952_v18  ;;  %v5284_v7 = vsel %vm9350_vm2, %v5279_v25, %v5283_v34  ;;  %v5289_v13 = vrot.slane %v5288_v33, 4  ;;  %v5301_v41 = vrot.slane %v5299_v20, 5  ;;  %v5320_v42 = vshrl.u32 %v5169_v4, 16 }
 0x229   : > { %8634 = vmatpush3.bf16.msra.mxu0 %v8953_v10  ;;  %8537 = vmatprep.subr.bf16.mxu1 %v8955_v32  ;;  %v7571_v50 = vcombine.low %v10991_v43, %v10978_v45  ;;  %v5307_v14 = vrot.slane %v5305_v27, 5  ;;  %v5311_v55 = vrot.slane %v5309_v57, 4  ;;  %v5323_v26 = vshll.u32 %v5169_v4, 16  ;;  %v5172_v43 = vld [vmem:[#allocation2 + $0x60] sm:$0xf] }
 0x22a   : > { %v5294_v11 = vsel %vm9350_vm2, %v5289_v13, %v5293_v5  ;;  %8635 = vmatprep.subr.bf16.mxu0 %v8956_v29  ;;  %v5302_v18 = vor.u32 %v5301_v41, %v5298_v40  ;;  %v5322_v22 = vrot.slane %v5320_v42, 4  ;;  %v5329_v23 = vshll.u32 %v11149_v46, 16  ;;  %v8964_v13 = vld [vmem:[#allocation3 + $0xd0] sm:$0xff]  }
 0x22b   : > { %v7627_v10 = vcombine.low %v5284_v7, %v5294_v11  ;;  %8490 = vmatmul.mubr.bf16.gmra.mxu1 %v7570_v28  ;;  %v5312_v39 = vor.u32 %v5311_v55, %v5307_v14  ;;  %v5325_v61 = vrot.slane %v5323_v26, 5  ;;  %v5333_v45 = vshrl.u32 %v11149_v46, 16  ;;  %v8961_v28 = vld [vmem:[#allocation3 + $0xd8] sm:$0xff]   ;;  %v8965_v26 = vld [vmem:[#allocation3 + $0x188] sm:$0xff]   ;;  %v5577_v11 = vld [vmem:[#allocation2 + $0xc] sm:$0xe] }
 0x22c   : > { %8493 = vmatprep.mubr.bf16.mxu1 %v7571_v50  ;;  %8538 = vmatpush3.bf16.msra.mxu1 %v8955_v32  ;;  %v5303_v36 = vrot.slane %v5302_v18, 4  ;;  %v5317_v21 = vrot.slane %v5315_v38, 5  ;;  %v5331_v56 = vrot.slane %v5329_v23, 5  ;;  %v5339_v16 = vshll.u32 %v11157_v53, 16  ;;  %v8962_v32 = vld [vmem:[#allocation3 + $0x190] sm:$0xff]   ;;  %v8968_v23 = vld [vmem:[#allocation3 + $0xc8] sm:$0xff]  }
 0x22d   : > { %8589 = vmatprep.mubr.bf16.mxu0 %v7627_v10  ;;  %8636 = vmatpush3.bf16.msra.mxu0 %v8956_v29  ;;  %v5313_v24 = vrot.slane %v5312_v39, 4  ;;  %v5326_v34 = vor.u32 %v5325_v61, %v5322_v22  ;;  %v5335_v9 = vrot.slane %v5333_v45, 4  ;;  %v7572_v5 = vcombine.low %v11000_v44, %v10985_v54  ;;  %v11170_v29 = vld [vmem:[#allocation2 + $0x68] sm:$0x1]  ;;  %v8969_v45 = vld [vmem:[#allocation3 + $0x180] sm:$0xff]  }
 0x22e   : > { %8539 = vmatprep.subr.bf16.mxu1 %v8958_v35  ;;  %v5308_v62 = vsel %vm9350_vm2, %v5303_v36, %v5307_v14  ;;  %8637 = vmatprep.subr.bf16.mxu0 %v8959_v30  ;;  %v5344_v48 = vshrl.u32 %v5172_v43, 16  ;;  %v5347_v4 = vshll.u32 %v5172_v43, 16  ;;  %v5353_v20 = vshll.u32 %v11161_v51, 16 }
 0x22f   : > { %v5318_v1 = vsel %vm9350_vm2, %v5313_v24, %v5317_v21  ;;  %v5327_v25 = vrot.slane %v5326_v34, 4  ;;  %v5336_v33 = vor.u32 %v5335_v9, %v5331_v56  ;;  %v5357_v38 = vshrl.u32 %v11161_v51, 16  ;;  %v5578_v24 = vld [vmem:[#allocation2 + $0x18] sm:$0xe] }
 0x230   : > { %v7628_v40 = vcombine.low %v5308_v62, %v5318_v1  ;;  %8540 = vmatpush3.bf16.msra.mxu1 %v8958_v35  ;;  %v5346_v27 = vrot.slane %v5344_v48, 4  ;;  %v5349_v57 = vrot.slane %v5347_v4, 5  ;;  %v5341_v7 = vrot.slane %v5339_v16, 5  ;;  %v8966_v16 = vld [vmem:[#allocation2 + $0x18] sm:$0xff]   ;;  %v8973_v62 = vld [vmem:[#allocation3 + $0x238] sm:$0xff]  }
 0x231   : > { %v5332_v54 = vsel %vm9350_vm2, %v5327_v25, %v5331_v56  ;;  %v5337_v44 = vrot.slane %v5336_v33, 4  ;;  %8638 = vmatpush3.bf16.msra.mxu0 %v8959_v30  ;;  %8541 = vmatprep.subr.bf16.mxu1 %v8961_v28  ;;  %v5355_v41 = vrot.slane %v5353_v20, 5  ;;  %v7573_v42 = vcombine.low %v11056_v63, %v11017_v2  ;;  %v8976_v1 = vld [vmem:[#allocation3 + $0x178] sm:$0xff]  }
 0x232   : > { %8590 = vmatmul.mubr.bf16.gmra.mxu0 %v7628_v40  ;;  %8639 = vmatprep.subr.bf16.mxu0 %v8962_v32  ;;  %v5350_v50 = vor.u32 %v5349_v57, %v5346_v27  ;;  %v5359_v14 = vrot.slane %v5357_v38, 4  ;;  %v5363_v55 = vshll.u32 %v11170_v29, 16  ;;  %v7639_v10 = vrot.slane %v5577_v11, 9  ;;  %v5581_v38 = vld [vmem:[#allocation2 + $0x3c] sm:$0xe] }
 0x233   : > { %v5342_v35 = vsel %vm9350_vm2, %v5337_v44, %v5341_v7  ;;  %8494 = vmatmul.mubr.bf16.gmra.mxu1 %v7572_v5  ;;  %v5611_v2 = vrot.slane %v11047_v59, 5  ;;  %v5614_v36 = vrot.slane %v11050_v0, 5  ;;  %v7574_v56 = vcombine.low %v11066_v52, %v11031_v31  ;;  %v5579_v0 = vld [vmem:[#allocation2 + $0x24] sm:$0xe]  ;;  %v8970_v52 = vld [vmem:[#allocation2 + $0xc] sm:$0xff]   ;;  %v8975_v44 = vld [vmem:[#allocation2 + $0x18] sm:$0xff]  }
 0x234   : > { %v7629_v18 = vcombine.low %v5332_v54, %v5342_v35  ;;  %8497 = vmatprep.mubr.bf16.mxu1 %v7573_v42  ;;  %8542 = vmatpush3.bf16.msra.mxu1 %v8961_v28  ;;  %v5351_v30 = vrot.slane %v5350_v50, 4  ;;  %v5360_v22 = vor.u32 %v5359_v14, %v5355_v41  ;;  %v5365_v61 = vrot.slane %v5363_v55, 5  ;;  %v8971_v28 = vld [vmem:[#allocation3 + $0xc0] sm:$0xff]   ;;  %v8972_v54 = vld [vmem:[#allocation2 + $0x24] sm:$0xff]  }
 0x235   : > { %8640 = vmatpush3.bf16.msra.mxu0 %v8962_v32  ;;  %8543 = vmatprep.subr.bf16.mxu1 %v8964_v13  ;;  %v5613_v43 = vrot.slane %v5611_v2, 4  ;;  %v11191_v34 = vsel %vm9577_vm5, %v7639_v10, %v5611_v2  ;;  %v7640_v5 = vrot.slane %v5578_v24, 9  ;;  %v5618_v32 = vrot.slane %v11083_v17, 5  ;;  %v8977_v7 = vld [vmem:[#allocation3 + $0x230] sm:$0xff]  }
 0x236   : > { %8593 = vmatprep.mubr.bf16.mxu0 %v7629_v18  ;;  %v5356_v63 = vsel %vm9350_vm2, %v5351_v30, %v5355_v41  ;;  %v5361_v39 = vrot.slane %v5360_v22, 4  ;;  %8641 = vmatprep.subr.bf16.mxu0 %v8965_v26  ;;  %v7641_v48 = vrot.slane %v5579_v0, 9  ;;  %v5625_v4 = vrot.slane %v11094_v15, 5  ;;  %v5580_v15 = vld [vmem:[#allocation2 + $0x30] sm:$0xe]  ;;  %v8978_v14 = vld [vmem:[#allocation2 + $0x24] sm:$0xff]  }
 0x237   : > { %v11195_v9 = vsel %vm9577_vm5, %v5613_v43, %v5614_v36  ;;  %v5620_v25 = vrot.slane %v5618_v32, 4  ;;  %v5621_v33 = vrot.slane %v11088_v12, 5  ;;  %v5628_v40 = vrot.slane %v11099_v37, 5  ;;  %v8974_v41 = vld [vmem:[#allocation2 + $0x30] sm:$0xff]   ;;  %v8979_v55 = vld [vmem:[#allocation3 + $0x170] sm:$0xff]   ;;  %v8981_v30 = vld [vmem:[#allocation3 + $0x228] sm:$0xff]  }
 0x238   : > { %v5366_v21 = vsel %vm9350_vm2, %v5361_v39, %v5365_v61  ;;  %8544 = vmatpush3.bf16.msra.mxu1 %v8964_v13  ;;  %v7647_v31 = vcombine.low %v11191_v34, %v11195_v9  ;;  %v5627_v20 = vrot.slane %v5625_v4, 4  ;;  %v11205_v27 = vsel %vm9577_vm5, %v7640_v5, %v5618_v32  ;;  %v8984_v39 = vld [vmem:[#allocation3 + $0x168] sm:$0xff]   ;;  %v8983_v43 = vld [vmem:[#allocation2 + $0x30] sm:$0xff]   ;;  %v8985_v36 = vld [vmem:[#allocation3 + $0x220] sm:$0xff]  }
 0x239   : > { %v7630_v59 = vcombine.low %v5356_v63, %v5366_v21  ;;  %8642 = vmatpush3.bf16.msra.mxu0 %v8965_v26  ;;  %8545 = vmatprep.subr.bf16.mxu1 %v8968_v23  ;;  %v11209_v17 = vsel %vm9577_vm5, %v5620_v25, %v5621_v33  ;;  %v11215_v12 = vsel %vm9577_vm5, %v7641_v48, %v5625_v4  ;;  %v7642_v42 = vrot.slane %v5580_v15, 9  ;;  %v5583_v63 = vld [vmem:[#allocation2 + $0x54] sm:$0xe]  ;;  %v8982_v24 = vld [vmem:[#allocation2 + $0x48] sm:$0xff]   ;;  %v8986_v5 = vld [vmem:[#allocation2 + $0x3c] sm:$0xff]  }
 0x23a   : > { %8643 = vmatprep.subr.bf16.mxu0 %v8969_v45  ;;  %v7648_v57 = vcombine.low %v11205_v27, %v11209_v17  ;;  %v11219_v37 = vsel %vm9577_vm5, %v5627_v20, %v5628_v40  ;;  %v5632_v50 = vrot.slane %v11108_v49, 5  ;;  %v7643_v26 = vrot.slane %v5581_v38, 9  ;;  %v11250_v32 = vld [vmem:[#allocation2 + $0x1c] sm:$0xf]  ;;  %v8989_v4 = vld [vmem:[#allocation3 + $0x218] sm:$0xff]   ;;  %v9004_v17 = vld [vmem:[#allocation3 + $0x1e8] sm:$0xff]  }
 0x23b   : > { %8594 = vmatmul.mubr.bf16.gmra.mxu0 %v7630_v59  ;;  %8498 = vmatmul.mubr.bf16.gmra.mxu1 %v7574_v56  ;;  %v7649_v13 = vcombine.low %v11215_v12, %v11219_v37  ;;  %v5639_v11 = vrot.slane %v11121_v19, 5  ;;  %v5635_v18 = vrot.slane %v11114_v60, 5  ;;  %v5582_v19 = vld [vmem:[#allocation2 + $0x48] sm:$0xe]  ;;  %v5646_v56 = vrot.slane %v11138_v6, 5 }
 0x23c   : > { %8645 = vmatprep.mubr.bf16.mxu0 %v8966_v16  ;;  %8546 = vmatpush3.bf16.msra.mxu1 %v8968_v23  ;;  %v5634_v35 = vrot.slane %v5632_v50, 4  ;;  %v5642_v23 = vrot.slane %v11127_v8, 5  ;;  %v11229_v49 = vsel %vm9577_vm5, %v7642_v42, %v5632_v50  ;;  %v7644_v21 = vrot.slane %v5582_v19, 9  ;;  %v5584_v16 = vld [vmem:[#allocation2 + $0x60] sm:$0xe]  ;;  %v8993_v42 = vld [vmem:[#allocation3 + $0x210] sm:$0xff]  }
 0x23d   : > { %8549 = vmatprep.mubr.bf16.mxu1 %v8970_v52  ;;  %8644 = vmatpush3.bf16.msra.mxu0 %v8969_v45  ;;  %v5641_v22 = vrot.slane %v5639_v11, 4  ;;  %v11239_v2 = vsel %vm9577_vm5, %v7643_v26, %v5639_v11  ;;  %v8980_v45 = vld [vmem:[#allocation2 + $0x3c] sm:$0xff]   ;;  %v7645_v59 = vrot.slane %v5583_v63, 9  ;;  %v5653_v0 = vrot.slane %v11149_v46, 5  ;;  %v6544_v26 = vld [vmem:[#allocation2 + $0x18] sm:$0xe] }
 0x23e   : > { %8547 = vmatprep.subr.bf16.mxu1 %v8971_v28  ;;  %8693 = vmatprep.subr.bf16.mxu0 %v8973_v62  ;;  %v11233_v10 = vsel %vm9577_vm5, %v5634_v35, %v5635_v18  ;;  %v5649_v52 = vrot.slane %v11140_v47, 5  ;;  %v5656_v6 = vrot.slane %v11157_v53, 5  ;;  %v11255_v46 = vsel %vm9577_vm5, %v7644_v21, %v5646_v56  ;;  %v8995_v35 = vld [vmem:[#allocation3 + $0x150] sm:$0xff]   ;;  %v8998_v21 = vld [vmem:[#allocation2 + $0x60] sm:$0xff]  }
 0x23f   : > { %v7650_v60 = vcombine.low %v11229_v49, %v11233_v10  ;;  %v11243_v8 = vsel %vm9577_vm5, %v5641_v22, %v5642_v23  ;;  %v5655_v48 = vrot.slane %v5653_v0, 4  ;;  %v7646_v47 = vrot.slane %v5584_v16, 9  ;;  %v11290_v22 = vld [vmem:[#allocation2 + $0x34] sm:$0xf]  ;;  %v8997_v23 = vld [vmem:[#allocation3 + $0x208] sm:$0xff]   ;;  %v9000_v16 = vld [vmem:[#allocation3 + $0x200] sm:$0xff]  }
 0x240   : > { %8548 = vmatpush3.bf16.msra.mxu1 %v8971_v28  ;;  %v7651_v61 = vcombine.low %v11239_v2, %v11243_v8  ;;  %v8987_v28 = vld [vmem:[#allocation3 + $0x160] sm:$0xff]   ;;  %v5660_v25 = vrot.slane %v11161_v51, 5  ;;  %v11266_v53 = vsel %vm9577_vm5, %v7645_v59, %v5653_v0  ;;  %v6578_v40 = vrot.slane %v11250_v32, 5  ;;  %v8999_v0 = vld [vmem:[#allocation3 + $0x148] sm:$0xff]   ;;  %v9006_v10 = vld [vmem:[#allocation3 + $0x1d8] sm:$0xff]  }
 0x241   : > { %8597 = vmatprep.subr.bf16.mxu1 %v8976_v1  ;;  %v11270_v20 = vsel %vm9577_vm5, %v5655_v48, %v5656_v6  ;;  %v5663_v38 = vrot.slane %v11170_v29, 5  ;;  %v11286_v29 = vld [vmem:[#allocation2 + $0x28] sm:$0xf]  ;;  %v7695_v19 = vrot.slane %v6544_v26, 9  ;;  %v11303_v48 = vld [vmem:[#allocation2 + $0x40] sm:$0xf] }
 0x242   : > { %v7653_v15 = vcombine.low %v11266_v53, %v11270_v20  ;;  %v5662_v51 = vrot.slane %v5660_v25, 4  ;;  %v11278_v50 = vsel %vm9577_vm5, %v7646_v47, %v5660_v25  ;;  %v6580_v18 = vrot.slane %v6578_v40, 4  ;;  %v11305_v6 = vld [vmem:[#allocation2 + $0x4c] sm:$0xf] }
 0x243   : > { %8646 = vmatmul.mubr.bf16.vlgmr.msra.gmra.mxu0 %v8972_v54  ;;  %8550 = vmatmul.mubr.bf16.vlgmr.msra.gmra.mxu1 %v8975_v44  ;;  %v8988_v54 = vld [vmem:[#allocation2 + $0x54] sm:$0xff]   ;;  %v8991_v44 = vld [vmem:[#allocation2 + $0x48] sm:$0xff]   ;;  %v6579_v59 = vsel %vm9577_vm5, %v7695_v19, %v6578_v40  ;;  %v11322_v19 = vld [vmem:[#allocation2 + $0x50] sm:$0x1]  ;;  %v6156_v12 = vshrl.u32 %v11250_v32, 16 }
 0x244   : > { %8649 = vmatprep.mubr.bf16.mxu0 %v8974_v41  ;;  %8694 = vmatpush3.bf16.msra.mxu0 %v8973_v62  ;;  %v5648_v62 = vrot.slane %v5646_v56, 4  ;;  %v8992_v41 = vld [vmem:[#allocation3 + $0x158] sm:$0xff]   ;;  %v11297_v56 = vld [vmem:[#allocation2 + $0x2c] sm:$0x1] }
 0x245   : > { %8695 = vmatprep.subr.bf16.mxu0 %v8977_v7  ;;  %8553 = vmatprep.mubr.bf16.mxu1 %v8978_v14  ;;  %v11282_v14 = vsel %vm9577_vm5, %v5662_v51, %v5663_v38  ;;  %v6588_v25 = vrot.slane %v11297_v56, 5 }
 0x246   : > { %8598 = vmatpush3.bf16.msra.mxu1 %v8976_v1  ;;  %v11259_v1 = vsel %vm9577_vm5, %v5648_v62, %v5649_v52  ;;  %v7654_v11 = vcombine.low %v11278_v50, %v11282_v14  ;;  %v6546_v62 = vld [vmem:[#allocation2 + $0x30] sm:$0xe] }
 0x247   : > { %8599 = vmatprep.subr.bf16.mxu1 %v8979_v55  ;;  %v7652_v33 = vcombine.low %v11255_v46, %v11259_v1  ;;  %v7697_v40 = vrot.slane %v6546_v62, 9 }
 0x248   : > { %8696 = vmatpush3.bf16.msra.mxu0 %v8977_v7  ;;  %v8990_v7 = vld [vmem:[#allocation2 + $0x60] sm:$0xff]  }
 0x249   : > { %8697 = vmatprep.subr.bf16.mxu0 %v8981_v30 }
 0x24a   : > { %8600 = vmatpush3.bf16.msra.mxu1 %v8979_v55  ;;  %v11284_v55 = vld [vmem:[#allocation2 + $0x20] sm:$0x1] }
 0x24b   : > { %8650 = vmatmul.mubr.bf16.gmra.mxu0 %v8980_v45  ;;  %8554 = vmatmul.mubr.bf16.gmra.mxu1 %v8983_v43  ;;  %v6581_v63 = vrot.slane %v11284_v55, 5  ;;  %v8996_v45 = vld [vmem:[#allocation2 + $0x6c] sm:$0xff]   ;;  %v6162_v2 = vshll.u32 %v11284_v55, 16 }
 0x24c   : > { %8653 = vmatprep.mubr.bf16.mxu0 %v8982_v24  ;;  %8698 = vmatpush3.bf16.msra.mxu0 %v8981_v30  ;;  %v8994_v30 = vld [vmem:[#allocation2 + $0x54] sm:$0xff]   ;;  %v6545_v24 = vld [vmem:[#allocation2 + $0x24] sm:$0xe] }
 0x24d   : > { %8601 = vmatprep.subr.bf16.mxu1 %v8984_v39  ;;  %8699 = vmatprep.subr.bf16.mxu0 %v8985_v36  ;;  %v6582_v43 = vsel %vm9577_vm5, %v6580_v18, %v6581_v63  ;;  %v7696_v47 = vrot.slane %v6545_v24, 9  ;;  %v6548_v18 = vld [vmem:[#allocation2 + $0x48] sm:$0xe] }
 0x24e   : > { %8557 = vmatprep.mubr.bf16.mxu1 %v8986_v5  ;;  %8602 = vmatpush3.bf16.msra.mxu1 %v8984_v39  ;;  %v6585_v39 = vrot.slane %v11286_v29, 5  ;;  %v7703_v52 = vcombine.low %v6579_v59, %v6582_v43  ;;  %v11301_v5 = vld [vmem:[#allocation2 + $0x38] sm:$0x1]  ;;  %v7699_v43 = vrot.slane %v6548_v18, 9  ;;  %v6609_v59 = vrot.slane %v11322_v19, 5 }
 0x24f   : > { %8603 = vmatprep.subr.bf16.mxu1 %v8987_v28  ;;  %v6551_v18 = vld [vmem:[#allocation2 + $0x6c] sm:$0xe] }
 0x250   : > { %8700 = vmatpush3.bf16.msra.mxu0 %v8985_v36  ;;  %v6592_v36 = vrot.slane %v11290_v22, 5 }
 0x251   : > { %8701 = vmatprep.subr.bf16.mxu0 %v8989_v4 }
 0x252   : > { %8604 = vmatpush3.bf16.msra.mxu1 %v8987_v28  ;;  %v6587_v28 = vrot.slane %v6585_v39, 4  ;;  %v6594_v51 = vrot.slane %v6592_v36, 4  ;;  %v6593_v34 = vsel %vm9577_vm5, %v7697_v40, %v6592_v36  ;;  %v6118_v36 = vld [vmem:[#allocation2 + $0x18] sm:$0xf]  ;;  %v6121_v40 = vld [vmem:[#allocation2 + $0x24] sm:$0xf] }
 0x253   : > { %8654 = vmatmul.mubr.bf16.gmra.mxu0 %v8988_v54  ;;  %8558 = vmatmul.mubr.bf16.gmra.mxu1 %v8991_v44  ;;  %v6595_v54 = vrot.slane %v11301_v5, 5  ;;  %v6599_v44 = vrot.slane %v11303_v48, 5 }
 0x254   : > { %8657 = vmatprep.mubr.bf16.mxu0 %v8990_v7  ;;  %8702 = vmatpush3.bf16.msra.mxu0 %v8989_v4  ;;  %v9001_v4 = vld [vmem:[#allocation3 + $0x140] sm:$0xff]   ;;  %v6589_v38 = vsel %vm9577_vm5, %v6587_v28, %v6588_v25  ;;  %v6606_v7 = vrot.slane %v11305_v6, 5 }
 0x255   : > { %8605 = vmatprep.subr.bf16.mxu1 %v8992_v41  ;;  %8703 = vmatprep.subr.bf16.mxu0 %v8993_v42  ;;  %v6596_v26 = vsel %vm9577_vm5, %v6594_v51, %v6595_v54  ;;  %v6143_v54 = vshrl.u32 %v6118_v36, 16 }
 0x256   : > { %8561 = vmatprep.mubr.bf16.mxu1 %v8994_v30  ;;  %8606 = vmatpush3.bf16.msra.mxu1 %v8992_v41  ;;  %v6547_v41 = vld [vmem:[#allocation2 + $0x3c] sm:$0xe]  ;;  %v6608_v63 = vrot.slane %v6606_v7, 4  ;;  %v6607_v27 = vsel %vm9577_vm5, %v7699_v43, %v6606_v7 }
 0x257   : > { %8607 = vmatprep.subr.bf16.mxu1 %v8995_v35  ;;  %v7698_v9 = vrot.slane %v6547_v41, 9  ;;  %v6152_v41 = vshll.u32 %v11250_v32, 16 }
 0x258   : > { %8704 = vmatpush3.bf16.msra.mxu0 %v8993_v42  ;;  %v6586_v42 = vsel %vm9577_vm5, %v7696_v47, %v6585_v39  ;;  %v9003_v39 = vld [vmem:[#allocation3 + $0x1f0] sm:$0xff]   ;;  %v6549_v47 = vld [vmem:[#allocation2 + $0x54] sm:$0xe] }
 0x259   : > { %8705 = vmatprep.subr.bf16.mxu0 %v8997_v23  ;;  %v7704_v30 = vcombine.low %v6586_v42, %v6589_v38  ;;  %v6600_v28 = vsel %vm9577_vm5, %v7698_v9, %v6599_v44  ;;  %v6550_v38 = vld [vmem:[#allocation2 + $0x60] sm:$0xe]  ;;  %v7700_v42 = vrot.slane %v6549_v47, 9  ;;  %v6176_v9 = vshll.u32 %v11286_v29, 16 }
 0x25a   : > { %8608 = vmatpush3.bf16.msra.mxu1 %v8995_v35  ;;  %v9002_v35 = vld [vmem:[#allocation3 + $0x1f8] sm:$0xff]  }
 0x25b   : > { %8658 = vmatmul.mubr.bf16.gmra.mxu0 %v8996_v45  ;;  %8562 = vmatmul.mubr.bf16.gmra.mxu1 %v8998_v21  ;;  %v7705_v45 = vcombine.low %v6593_v34, %v6596_v26  ;;  %v11326_v21 = vld [vmem:[#allocation2 + $0x58] sm:$0xf]  ;;  %v11356_v26 = vld [vmem:[#allocation2 + $0x68] sm:$0x1]  ;;  %v6170_v34 = vshll.u32 %v6121_v40, 16 }
 0x25c   : > { %8706 = vmatpush3.bf16.msra.mxu0 %v8997_v23  ;;  %8709 = vmatprep.mubr.bf16.mxu0 %v7703_v52  ;;  %v11320_v23 = vld [vmem:[#allocation2 + $0x44] sm:$0x1]  ;;  %v6610_v52 = vsel %vm9577_vm5, %v6608_v63, %v6609_v59  ;;  %v6145_v59 = vrot.slane %v6143_v54, 4  ;;  %v6623_v47 = vrot.slane %v11356_v26, 5 }
 0x25d   : > { %8609 = vmatprep.subr.bf16.mxu1 %v8999_v0  ;;  %8707 = vmatprep.subr.bf16.mxu0 %v9000_v16  ;;  %v6602_v24 = vrot.slane %v11320_v23, 5 }
 0x25e   : > { %8610 = vmatpush3.bf16.msra.mxu1 %v8999_v0  ;;  %8613 = vmatprep.mubr.bf16.mxu1 %v7647_v31  ;;  %v6601_v31 = vrot.slane %v6599_v44, 4  ;;  %v11330_v0 = vld [vmem:[#allocation2 + $0x64] sm:$0xf]  ;;  %v6146_v44 = vshll.u32 %v6118_v36, 16 }
 0x25f   : > { %8611 = vmatprep.subr.bf16.mxu1 %v9001_v4  ;;  %v6620_v25 = vrot.slane %v11330_v0, 5 }
 0x260   : > { %8708 = vmatpush3.bf16.msra.mxu0 %v9000_v16  ;;  %v11332_v16 = vld [vmem:[#allocation2 + $0x70] sm:$0xf]  ;;  %v6603_v62 = vsel %vm9577_vm5, %v6601_v31, %v6602_v24  ;;  %v6180_v31 = vshrl.u32 %v11286_v29, 16  ;;  %v9005_v24 = vld [vmem:[#allocation3 + $0x1e0] sm:$0xff]   ;;  %v6148_v36 = vrot.slane %v6146_v44, 5  ;;  %v7702_v29 = vrot.slane %v6551_v18, 9 }
 0x261   : > { %v6627_v51 = vrot.slane %v11332_v16, 5  ;;  %v7706_v37 = vcombine.low %v6600_v28, %v6603_v62  ;;  %v6622_v32 = vrot.slane %v6620_v25, 4  ;;  %v11362_v28 = vrot.slane %v6152_v41, 5  ;;  %v6124_v44 = vld [vmem:[#allocation2 + $0x30] sm:$0xf] }
 0x262   : > { %8612 = vmatpush3.bf16.msra.mxu1 %v9001_v4  ;;  %v11343_v4 = vld [vmem:[#allocation2 + $0x5c] sm:$0x1]  ;;  %v6158_v62 = vrot.slane %v6156_v12, 4  ;;  %v6182_v54 = vrot.slane %v6180_v31, 4  ;;  %v6149_v12 = vor.u32 %v6148_v36, %v6145_v59  ;;  %v6191_v8 = vshrl.u32 %v6124_v44, 16 }
 0x263   : > { %8710 = vmatmul.mubr.bf16.vlgmr.msra.gmra.mxu0 %v7704_v30  ;;  %8661 = vmatprep.subr.bf16.mxu1 %v9002_v35  ;;  %v6616_v7 = vrot.slane %v11343_v4, 5  ;;  %v6167_v30 = vshrl.u32 %v6121_v40, 16  ;;  %v6629_v43 = vrot.slane %v6627_v51, 4  ;;  %v6172_v40 = vrot.slane %v6170_v34, 5  ;;  %v9007_v34 = vld [vmem:[#allocation3 + $0x1d0] sm:$0xff]  }
 0x264   : > { %8713 = vmatprep.mubr.bf16.mxu0 %v7705_v45  ;;  %v7701_v45 = vrot.slane %v6550_v38, 9  ;;  %v11371_v38 = vrot.slane %v6176_v9, 5  ;;  %v6624_v49 = vsel %vm9577_vm5, %v6622_v32, %v6623_v47  ;;  %v6127_v31 = vld [vmem:[#allocation2 + $0x3c] sm:$0xf]  ;;  %v6150_v55 = vrot.slane %v6149_v12, 4 }
 0x265   : > { %8614 = vmatmul.mubr.bf16.vlgmr.msra.gmra.mxu1 %v7648_v57  ;;  %v6613_v57 = vrot.slane %v11326_v21, 5  ;;  %v6186_v32 = vshll.u32 %v11297_v56, 16  ;;  %v6224_v56 = vshll.u32 %v11303_v48, 16  ;;  %v6228_v47 = vshrl.u32 %v11303_v48, 16 }
 0x266   : > { %8617 = vmatprep.mubr.bf16.mxu1 %v7649_v13  ;;  %8662 = vmatpush3.bf16.msra.mxu1 %v9002_v35  ;;  %v7707_v13 = vcombine.low %v6607_v27, %v6610_v52  ;;  %v11358_v35 = vld [vmem:[#allocation2 + $0x74] sm:$0x1]  ;;  %v6169_v27 = vrot.slane %v6167_v30, 4  ;;  %v6621_v41 = vsel %vm9577_vm5, %v7701_v45, %v6620_v25  ;;  %v6183_v18 = vor.u32 %v6182_v54, %v11371_v38 }
 0x267   : > { %8663 = vmatprep.subr.bf16.mxu1 %v9003_v39  ;;  %v6615_v63 = vrot.slane %v6613_v57, 4  ;;  %v6614_v52 = vsel %vm9577_vm5, %v7700_v42, %v6613_v57  ;;  %v6628_v42 = vsel %vm9577_vm5, %v7702_v29, %v6627_v51  ;;  %v7709_v30 = vcombine.low %v6621_v41, %v6624_v49 }
 0x268   : > { %v6164_v45 = vrot.slane %v6162_v2, 5  ;;  %v6184_v36 = vrot.slane %v6183_v18, 4  ;;  %v6155_v46 = vsel %vm9350_vm2, %v6150_v55, %v11362_v28  ;;  %v6188_v1 = vrot.slane %v6186_v32, 5  ;;  %v6136_v18 = vld [vmem:[#allocation2 + $0x60] sm:$0xf] }
 0x269   : > { %v6617_v57 = vsel %vm9577_vm5, %v6615_v63, %v6616_v7  ;;  %v6173_v7 = vor.u32 %v6172_v40, %v6169_v27  ;;  %v9008_v27 = vld [vmem:[#allocation3 + $0x1c8] sm:$0xff]   ;;  %v6252_v40 = vshrl.u32 %v11305_v6, 16  ;;  %v6210_v48 = vshll.u32 %v11301_v5, 16 }
 0x26a   : > { %8664 = vmatpush3.bf16.msra.mxu1 %v9003_v39  ;;  %v6630_v39 = vrot.slane %v11358_v35, 5  ;;  %v7708_v25 = vcombine.low %v6614_v52, %v6617_v57  ;;  %v6218_v52 = vshll.u32 %v6127_v31, 16  ;;  %v11416_v41 = vrot.slane %v6224_v56, 5 }
 0x26b   : > { %8714 = vmatmul.mubr.bf16.gmra.mxu0 %v7706_v37  ;;  %8665 = vmatprep.subr.bf16.mxu1 %v9004_v17  ;;  %v6159_v37 = vor.u32 %v6158_v62, %v11362_v28  ;;  %v6215_v62 = vshrl.u32 %v6127_v31, 16  ;;  %v6189_v28 = vsel %vm9350_vm2, %v6184_v36, %v6188_v1  ;;  %v6254_v5 = vrot.slane %v6252_v40, 4 }
 0x26c   : > { %8717 = vmatprep.mubr.bf16.mxu0 %v7707_v13  ;;  %v6204_v13 = vshrl.u32 %v11290_v22, 16  ;;  %v6220_v57 = vrot.slane %v6218_v52, 5  ;;  %v6276_v31 = vshrl.u32 %v11326_v21, 16  ;;  %v6258_v55 = vshll.u32 %v11322_v19, 16 }
 0x26d   : > { %8618 = vmatmul.mubr.bf16.gmra.mxu1 %v7650_v60  ;;  %v6631_v60 = vsel %vm9577_vm5, %v6629_v43, %v6630_v39  ;;  %v6160_v63 = vrot.slane %v6159_v37, 4  ;;  %v6193_v43 = vrot.slane %v6191_v8, 4  ;;  %v6133_v37 = vld [vmem:[#allocation2 + $0x54] sm:$0xf]  ;;  %v6296_v32 = vshll.u32 %v11330_v0, 16 }
 0x26e   : > { %8621 = vmatprep.mubr.bf16.mxu1 %v7651_v61  ;;  %8666 = vmatpush3.bf16.msra.mxu1 %v9004_v17  ;;  %v6194_v61 = vshll.u32 %v6124_v44, 16  ;;  %v6200_v17 = vshll.u32 %v11290_v22, 16  ;;  %v7710_v9 = vcombine.low %v6628_v42, %v6631_v60  ;;  %v6130_v22 = vld [vmem:[#allocation2 + $0x48] sm:$0xf]  ;;  %v6206_v59 = vrot.slane %v6204_v13, 4  ;;  %v9009_v60 = vld [vmem:[#allocation3 + $0x1c0] sm:$0xff]  }
 0x26f   : > { %8667 = vmatprep.subr.bf16.mxu1 %v9005_v24  ;;  %v6239_v29 = vshrl.u32 %v6130_v22, 16  ;;  %v6242_v39 = vshll.u32 %v6130_v22, 16  ;;  %v6165_v53 = vsel %vm9350_vm2, %v6160_v63, %v6164_v45  ;;  %v6217_v44 = vrot.slane %v6215_v62, 4 }
 0x270   : > { %v6196_v3 = vrot.slane %v6194_v61, 5  ;;  %v11392_v51 = vrot.slane %v6200_v17, 5  ;;  %v7679_v2 = vcombine.low %v6155_v46, %v6165_v53  ;;  %v6212_v17 = vrot.slane %v6210_v48, 5 }
 0x271   : > { %v6241_v49 = vrot.slane %v6239_v29, 4  ;;  %v6221_v13 = vor.u32 %v6220_v57, %v6217_v44  ;;  %v6287_v63 = vshrl.u32 %v6136_v18, 16  ;;  %v6290_v45 = vshll.u32 %v6136_v18, 16 }
 0x272   : > { %8668 = vmatpush3.bf16.msra.mxu1 %v9005_v24  ;;  %v6174_v24 = vrot.slane %v6173_v7, 4  ;;  %v6197_v20 = vor.u32 %v6196_v3, %v6193_v43  ;;  %v6263_v7 = vshrl.u32 %v6133_v37, 16  ;;  %v6300_v22 = vshrl.u32 %v11330_v0, 16 }
 0x273   : > { %8718 = vmatmul.mubr.bf16.gmra.mxu0 %v7708_v25  ;;  %8669 = vmatprep.subr.bf16.mxu1 %v9006_v10  ;;  %v6222_v43 = vrot.slane %v6221_v13, 4  ;;  %v6278_v62 = vrot.slane %v6276_v31, 4  ;;  %v6289_v19 = vrot.slane %v6287_v63, 4  ;;  %v6298_v29 = vrot.slane %v6296_v32, 5 }
 0x274   : > { %8721 = vmatprep.mubr.bf16.mxu0 %v7709_v30  ;;  %v6179_v54 = vsel %vm9350_vm2, %v6174_v24, %v11371_v38  ;;  %v6198_v38 = vrot.slane %v6197_v20, 4  ;;  %v6320_v48 = vshll.u32 %v11332_v16, 16 }
 0x275   : > { %8622 = vmatmul.mubr.bf16.gmra.mxu1 %v7652_v33  ;;  %v6248_v33 = vshll.u32 %v11305_v6, 16  ;;  %v6230_v6 = vrot.slane %v6228_v47, 4  ;;  %v7680_v61 = vcombine.low %v6179_v54, %v6189_v28  ;;  %v6292_v47 = vrot.slane %v6290_v45, 5 }
 0x276   : > { %8625 = vmatprep.mubr.bf16.mxu1 %v7653_v15  ;;  %8670 = vmatpush3.bf16.msra.mxu1 %v9006_v10  ;;  %v6207_v15 = vor.u32 %v6206_v59, %v11392_v51  ;;  %v6244_v10 = vrot.slane %v6242_v39, 5  ;;  %v6203_v50 = vsel %vm9350_vm2, %v6198_v38, %v11392_v51  ;;  %v6265_v59 = vrot.slane %v6263_v7, 4 }
 0x277   : > { %8671 = vmatprep.subr.bf16.mxu1 %v9007_v34  ;;  %v11418_v12 = vrot.slane %v6248_v33, 5  ;;  %v6231_v25 = vor.u32 %v6230_v6, %v11416_v41  ;;  %v6302_v39 = vrot.slane %v6300_v22, 4  ;;  %v6227_v0 = vsel %vm9350_vm2, %v6222_v43, %v11416_v41 }
 0x278   : > { %v6208_v8 = vrot.slane %v6207_v15, 4  ;;  %v6245_v42 = vor.u32 %v6244_v10, %v6241_v49  ;;  %v6324_v54 = vshrl.u32 %v11332_v16, 16  ;;  %v6293_v28 = vor.u32 %v6292_v47, %v6289_v19 }
 0x279   : > { %v6255_v30 = vor.u32 %v6254_v5, %v11418_v12  ;;  %v6303_v44 = vor.u32 %v6302_v39, %v6298_v29  ;;  %v6282_v41 = vshll.u32 %v11343_v4, 16  ;;  %v6330_v7 = vshll.u32 %v11358_v35, 16 }
 0x27a   : > { %8672 = vmatpush3.bf16.msra.mxu1 %v9007_v34  ;;  %v6266_v34 = vshll.u32 %v6133_v37, 16  ;;  %v6213_v14 = vsel %vm9350_vm2, %v6208_v8, %v6212_v17  ;;  %v6246_v3 = vrot.slane %v6245_v42, 4  ;;  %v6322_v37 = vrot.slane %v6320_v48, 5 }
 0x27b   : > { %8722 = vmatmul.mubr.bf16.gmra.mxu0 %v7710_v9  ;;  %8673 = vmatprep.subr.bf16.mxu1 %v9008_v27  ;;  %v6272_v9 = vshll.u32 %v11326_v21, 16  ;;  %v6232_v21 = vrot.slane %v6231_v25, 4  ;;  %v6256_v24 = vrot.slane %v6255_v30, 4  ;;  %v7681_v52 = vcombine.low %v6203_v50, %v6213_v14 }
 0x27c   : > { %v6268_v51 = vrot.slane %v6266_v34, 5  ;;  %v6251_v1 = vsel %vm9350_vm2, %v6246_v3, %v11418_v12  ;;  %v6294_v38 = vrot.slane %v6293_v28, 4  ;;  %v6304_v8 = vrot.slane %v6303_v44, 4 }
 0x27d   : > { %8626 = vmatmul.mubr.bf16.gmra.mxu1 %v7654_v11  ;;  %v6234_v11 = vshll.u32 %v11320_v23, 16  ;;  %v6274_v36 = vrot.slane %v6272_v9, 5  ;;  %v6260_v23 = vrot.slane %v6258_v55, 5  ;;  %v6332_v31 = vrot.slane %v6330_v7, 5 }
 0x27e   : > { %8674 = vmatpush3.bf16.msra.mxu1 %v9008_v27  ;;  %8677 = vmatprep.mubr.bf16.mxu1 %v7679_v2  ;;  %v6139_v27 = vld [vmem:[#allocation2 + $0x6c] sm:$0xf]  ;;  %v6269_v40 = vor.u32 %v6268_v51, %v6265_v59  ;;  %v6326_v2 = vrot.slane %v6324_v54, 4 }
 0x27f   : > { %8675 = vmatprep.subr.bf16.mxu1 %v9009_v60  ;;  %v6236_v56 = vrot.slane %v6234_v11, 5  ;;  %v6261_v33 = vsel %vm9350_vm2, %v6256_v24, %v6260_v23  ;;  %v6279_v53 = vor.u32 %v6278_v62, %v6274_v36  ;;  %v6311_v20 = vshrl.u32 %v6139_v27, 16 }
 0x280   : > { %v6314_v15 = vshll.u32 %v6139_v27, 16  ;;  %v7683_v6 = vcombine.low %v6251_v1, %v6261_v33  ;;  %v6270_v49 = vrot.slane %v6269_v40, 4  ;;  %v6327_v25 = vor.u32 %v6326_v2, %v6322_v37 }
 0x281   : > { %v6237_v46 = vsel %vm9350_vm2, %v6232_v21, %v6236_v56  ;;  %v6280_v10 = vrot.slane %v6279_v53, 4  ;;  %v6313_v12 = vrot.slane %v6311_v20, 4 }
 0x282   : > { %8676 = vmatpush3.bf16.msra.mxu1 %v9009_v60  ;;  %v7682_v57 = vcombine.low %v6227_v0, %v6237_v46  ;;  %v6306_v60 = vshll.u32 %v11356_v26, 16  ;;  %v6316_v5 = vrot.slane %v6314_v15, 5  ;;  %v6275_v17 = vsel %vm9350_vm2, %v6270_v49, %v6274_v36 }
 0x283   : > { %v6299_v26 = vsel %vm9350_vm2, %v6294_v38, %v6298_v29  ;;  %v6328_v9 = vrot.slane %v6327_v25, 4 }
 0x284   : > { %v6308_v16 = vrot.slane %v6306_v60, 5  ;;  %v6317_v13 = vor.u32 %v6316_v5, %v6313_v12 }
 0x285   : > { %8678 = vmatmul.mubr.bf16.vlgmr.msra.gmra.mxu1 %v7680_v61  ;;  %v6284_v61 = vrot.slane %v6282_v41, 5  ;;  %v6333_v14 = vsel %vm9350_vm2, %v6328_v9, %v6332_v31 }
 0x286   : > { %8681 = vmatprep.mubr.bf16.mxu1 %v7681_v52  ;;  %v6309_v42 = vsel %vm9350_vm2, %v6304_v8, %v6308_v16  ;;  %v6318_v34 = vrot.slane %v6317_v13, 4 }
 0x287   : > { %v6285_v4 = vsel %vm9350_vm2, %v6280_v10, %v6284_v61  ;;  %v7685_v30 = vcombine.low %v6299_v26, %v6309_v42 }
 0x288   : > { %v7684_v18 = vcombine.low %v6275_v17, %v6285_v4  ;;  %v6323_v50 = vsel %vm9350_vm2, %v6318_v34, %v6322_v37 }
 0x289   : > { %v7686_v11 = vcombine.low %v6323_v50, %v6333_v14 }
 0x28d   : > { %8682 = vmatmul.mubr.bf16.gmra.mxu1 %v7682_v57 }
 0x28e   : > { %8685 = vmatprep.mubr.bf16.mxu1 %v7683_v6 }
 0x295   : > { %8686 = vmatmul.mubr.bf16.gmra.mxu1 %v7684_v18 }
 0x296   : > { %8689 = vmatprep.mubr.bf16.mxu1 %v7685_v30 }
 0x29d   : > { %8690 = vmatmul.mubr.bf16.gmra.mxu1 %v7686_v11 }
 0x2a5   : > { %v8519_v55 = vpop.f32.mrf.mxu0 }
 0x2a7   : > { %v4829_v63 = vpop.f32.mrf.mxu0 }
 0x2a9   : > { %v8520_v45 = vpop.f32.mrf.mxu0 }
 0x2ab   : > { %v4832_v32 = vpop.f32.mrf.mxu0 }
 0x2b4   : > { %v8455_v35 = vpop.f32.mrf.mxu1  ;;  %v8523_v22 = vpop.f32.mrf.mxu0 }
 0x2b6   : > { %v4362_v43 = vpop.f32.mrf.mxu1  ;;  %v4845_v21 = vpop.f32.mrf.mxu0 }
 0x2b8   : > { %v8456_v3 = vpop.f32.mrf.mxu1  ;;  %v8524_v59 = vpop.f32.mrf.mxu0 }
 0x2ba   : > { %v4365_v24 = vpop.f32.mrf.mxu1  ;;  %v4848_v51 = vpop.f32.mrf.mxu0 }
 0x2bf   : > { %v8459_v36 = vpop.f32.mrf.mxu1 }
 0x2c0   : > { %v8527_v62 = vpop.f32.mrf.mxu0 }
 0x2c1   : > { %v4378_v52 = vpop.f32.mrf.mxu1 }
 0x2c2   : > { %v4861_v58 = vpop.f32.mrf.mxu0 }
 0x2c3   : > { %v8460_v56 = vpop.f32.mrf.mxu1 }
 0x2c4   : > { %v8528_v19 = vpop.f32.mrf.mxu0 }
 0x2c5   : > { %v4381_v23 = vpop.f32.mrf.mxu1 }
 0x2c6   : > { %v4864_v29 = vpop.f32.mrf.mxu0 }
 0x2cb   : > { %v8463_v47 = vpop.f32.mrf.mxu1 }
 0x2cc   : > { %v11463_v27 = vpop.f32.mrf.mxu0 }
 0x2cd   : > { %v4394_v39 = vpop.f32.mrf.mxu1 }
 0x2ce   : > { %v11465_v46 = vpop.f32.mrf.mxu0 }
 0x2cf   : > { %v8464_v0 = vpop.f32.mrf.mxu1 }
 0x2d0   : > { %v11467_v33 = vpop.f32.mrf.mxu0 }
 0x2d1   : > { %v4397_v1 = vpop.f32.mrf.mxu1 }
 0x2d2   : > { %v11469_v53 = vpop.f32.mrf.mxu0 }
 0x2db   : > { %v8467_v40 = vpop.f32.mrf.mxu1 }
 0x2dd   : > { %v4410_v20 = vpop.f32.mrf.mxu1 }
 0x2df   : > { %v8468_v15 = vpop.f32.mrf.mxu1 }
 0x2e0   : > { %v11471_v48 = vpop.f32.mrf.mxu0 }
 0x2e1   : > { %v4413_v54 = vpop.f32.mrf.mxu1 }
 0x2e2   : > { %v11473_v28 = vpop.f32.mrf.mxu0 }
 0x2e3   : > { %v8487_v44 = vpop.f32.mrf.mxu1 }
 0x2e4   : > { %v4564_v57 = vadd.f32 %v8487_v44, %v8455_v35  ;;  %v11475_v41 = vpop.f32.mrf.mxu0 }
 0x2e5   : > { %v4555_v6 = vpop.f32.mrf.mxu1 }
 0x2e6   : > { %v4556_v49 = vadd.f32 %v4555_v6, %v4362_v43  ;;  %v11477_v10 = vpop.f32.mrf.mxu0  ;;  %v11479_v60 = vadd.f32 %v8519_v55, %v4564_v57 }
 0x2e7   : > { %v8488_v12 = vpop.f32.mrf.mxu1 }
 0x2e8   : > { %v4567_v5 = vadd.f32 %v8488_v12, %v8456_v3  ;;  %v11481_v37 = vpop.f32.mrf.mxu0  ;;  %v11483_v2 = vadd.f32 %v4829_v63, %v4556_v49 }
 0x2e9   : > { %v4558_v38 = vpop.f32.mrf.mxu1 }
 0x2ea   : > { %v4559_v8 = vadd.f32 %v4558_v38, %v4365_v24  ;;  %v11485_v61 = vpop.f32.mrf.mxu0  ;;  %v11487_v16 = vadd.f32 %v8520_v45, %v4567_v5 }
 0x2eb   : > { %v8491_v17 = vpop.f32.mrf.mxu1 }
 0x2ec   : > { %v4580_v4 = vadd.f32 %v8491_v17, %v8459_v36  ;;  %v11489_v13 = vpop.f32.mrf.mxu0  ;;  %v11491_v25 = vadd.f32 %v4832_v32, %v4559_v8 }
 0x2ed   : > { %v4571_v26 = vpop.f32.mrf.mxu1 }
 0x2ee   : > { %v4572_v42 = vadd.f32 %v4571_v26, %v4378_v52  ;;  %v11493_v7 = vpop.f32.mrf.mxu0  ;;  %v11495_v18 = vadd.f32 %v8523_v22, %v4580_v4 }
 0x2ef   : > { %v8492_v30 = vpop.f32.mrf.mxu1 }
 0x2f0   : > { %v4583_v34 = vadd.f32 %v8492_v30, %v8460_v56  ;;  %v11497_v9 = vadd.f32 %v4845_v21, %v4572_v42 }
 0x2f1   : > { %v4574_v31 = vpop.f32.mrf.mxu1 }
 0x2f2   : > { %v11499_v50 = vpop.f32.mrf.mxu0  ;;  %v4575_v14 = vadd.f32 %v4574_v31, %v4381_v23  ;;  %v11501_v11 = vadd.f32 %v8524_v59, %v4583_v34 }
 0x2f3   : > { %v8495_v55 = vpop.f32.mrf.mxu1 }
 0x2f4   : > { %v11503_v63 = vpop.f32.mrf.mxu0  ;;  %v4596_v45 = vadd.f32 %v8495_v55, %v8463_v47  ;;  %v11505_v32 = vadd.f32 %v4848_v51, %v4575_v14 }
 0x2f5   : > { %v4587_v35 = vpop.f32.mrf.mxu1 }
 0x2f6   : > { %v11507_v43 = vpop.f32.mrf.mxu0  ;;  %v4588_v22 = vadd.f32 %v4587_v35, %v4394_v39  ;;  %v11509_v3 = vadd.f32 %v8527_v62, %v4596_v45 }
 0x2f7   : > { %11888 = vst [vmem:[#allocation13_spill] sm:$0xff] %v11507_v43  ;;  %v8496_v21 = vpop.f32.mrf.mxu1 }
 0x2f8   : > { %v11511_v24 = vpop.f32.mrf.mxu0  ;;  %v4599_v36 = vadd.f32 %v8496_v21, %v8464_v0  ;;  %v11513_v52 = vadd.f32 %v4861_v58, %v4588_v22 }
 0x2f9   : > { %11889 = vst [vmem:[#allocation12_spill] sm:$0xff] %v11511_v24  ;;  %v4590_v59 = vpop.f32.mrf.mxu1 }
 0x2fa   : > { %v4591_v56 = vadd.f32 %v4590_v59, %v4397_v1  ;;  %v11515_v23 = vadd.f32 %v8528_v19, %v4599_v36 }
 0x2fb   : > { %v11517_v44 = vpop.f32.mrf.mxu0  ;;  %v8499_v51 = vpop.f32.mrf.mxu1 }
 0x2fc   : > { %11890 = vst [vmem:[#allocation14_spill] sm:$0xff] %v11517_v44  ;;  %v4612_v47 = vadd.f32 %v8499_v51, %v8467_v40  ;;  %v11519_v57 = vadd.f32 %v4864_v29, %v4591_v56 }
 0x2fd   : > { %v11521_v6 = vpop.f32.mrf.mxu0  ;;  %v4603_v62 = vpop.f32.mrf.mxu1 }
 0x2fe   : > { %11891 = vst [vmem:[#allocation24_spill] sm:$0xff] %v11521_v6  ;;  %v4604_v39 = vadd.f32 %v4603_v62, %v4410_v20  ;;  %v11524_v49 = vadd.f32 %v11463_v27, %v4612_v47 }
 0x2ff   : > { %v11526_v0 = vpop.f32.mrf.mxu0  ;;  %v8500_v58 = vpop.f32.mrf.mxu1 }
 0x300   : > { %11892 = vst [vmem:[#allocation15_spill] sm:$0xff] %v11526_v0  ;;  %v4615_v12 = vadd.f32 %v8500_v58, %v8468_v15  ;;  %v11529_v19 = vadd.f32 %v11465_v46, %v4604_v39 }
 0x301   : > { %v11531_v1 = vpop.f32.mrf.mxu0  ;;  %v4606_v5 = vpop.f32.mrf.mxu1 }
 0x302   : > { %11893 = vst [vmem:[#allocation16_spill] sm:$0xff] %v11529_v19  ;;  %11894 = vst [vmem:[#allocation17_spill] sm:$0xff] %v11531_v1  ;;  %v4607_v40 = vadd.f32 %v4606_v5, %v4413_v54  ;;  %v11534_v29 = vadd.f32 %v11467_v33, %v4615_v12 }
 0x303   : > { %v11536_v38 = vpop.f32.mrf.mxu0  ;;  %v8551_v20 = vpop.f32.mrf.mxu1 }
 0x304   : > { %11895 = vst [vmem:[#allocation18_spill] sm:$0xff] %v11534_v29  ;;  %v11539_v27 = vadd.f32 %v11469_v53, %v4607_v40  ;;  %v5137_v24 = vadd.f32 %v8551_v20, %v11479_v60 }
 0x305   : > { %v11541_v8 = vpop.f32.mrf.mxu0  ;;  %v5072_v17 = vpop.f32.mrf.mxu1 }
 0x306   : > { %11896 = vst [vmem:[#allocation19_spill] sm:$0xff] %v11539_v27  ;;  %v5135_v19 = vadd.f32 %v5072_v17, %v11483_v2 }
 0x307   : > { %v11543_v15 = vpop.f32.mrf.mxu0  ;;  %v8552_v46 = vpop.f32.mrf.mxu1 }
 0x308   : > { %v5138_v43 = vadd.f32 %v8552_v46, %v11487_v16 }
 0x309   : > { %v11545_v4 = vpop.f32.mrf.mxu0  ;;  %v5075_v26 = vpop.f32.mrf.mxu1 }
 0x30b   : > { %v11547_v42 = vpop.f32.mrf.mxu0  ;;  %v8555_v54 = vpop.f32.mrf.mxu1 }
 0x30c   : > { %v5141_v2 = vadd.f32 %v8555_v54, %v11495_v18 }
 0x30d   : > { %v11549_v33 = vpop.f32.mrf.mxu0  ;;  %v5088_v30 = vpop.f32.mrf.mxu1 }
 0x30e   : > { %v5139_v16 = vadd.f32 %v5088_v30, %v11497_v9 }
 0x30f   : > { %v11551_v34 = vpop.f32.mrf.mxu0  ;;  %v8556_v31 = vpop.f32.mrf.mxu1 }
 0x310   : > { %11897 = vst [vmem:[#allocation20_spill] sm:$0xff] %v11551_v34  ;;  %v5565_v54 = vadd.f32 %v11485_v61, %v5139_v16 }
 0x311   : > { %v11553_v53 = vpop.f32.mrf.mxu0  ;;  %v5091_v14 = vpop.f32.mrf.mxu1 }
 0x312   : > { %11898 = vst [vmem:[#allocation22_spill] sm:$0xff] %v11553_v53  ;;  %v5140_v9 = vadd.f32 %v5091_v14, %v11505_v32 }
 0x313   : > { %v11555_v55 = vpop.f32.mrf.mxu0  ;;  %v8559_v45 = vpop.f32.mrf.mxu1 }
 0x314   : > { %11899 = vst [vmem:[#allocation21_spill] sm:$0xff] %v11555_v55 }
 0x315   : > { %v11557_v35 = vpop.f32.mrf.mxu0  ;;  %v11559_v22 = vpop.f32.mrf.mxu1 }
 0x316   : > { %11900 = vst [vmem:[#allocation26_spill] sm:$0xff] %v11557_v35 }
 0x317   : > { %v11561_v21 = vpop.f32.mrf.mxu0  ;;  %v11563_v36 = vpop.f32.mrf.mxu1 }
 0x318   : > { %11901 = vst [vmem:[#allocation28_spill] sm:$0xff] %v11561_v21 }
 0x319   : > { %v11565_v59 = vpop.f32.mrf.mxu0  ;;  %v11567_v56 = vpop.f32.mrf.mxu1 }
 0x31a   : > { %11902 = vst [vmem:[#allocation23_spill] sm:$0xff] %v11565_v59 }
 0x31b   : > { %v11569_v51 = vpop.f32.mrf.mxu0  ;;  %v11571_v47 = vpop.f32.mrf.mxu1 }
 0x31c   : > { %11903 = vst [vmem:[#allocation25_spill] sm:$0xff] %v11569_v51  ;;  %11904 = vst [vmem:[#allocation27_spill] sm:$0xff] %v11571_v47 }
 0x31d   : > { %v11573_v62 = vpop.f32.mrf.mxu0  ;;  %v11575_v39 = vpop.f32.mrf.mxu1 }
 0x31e   : > { %11905 = vst [vmem:[#allocation31_spill] sm:$0xff] %v11573_v62  ;;  %11906 = vst [vmem:[#allocation33_spill] sm:$0xff] %v11575_v39 }
 0x31f   : > { %v11577_v58 = vpop.f32.mrf.mxu1  ;;  %v11579_v12 = vpop.f32.mrf.mxu0 }
 0x320   : > { %11907 = vst [vmem:[#allocation35_spill] sm:$0xff] %v11577_v58  ;;  %11908 = vst [vmem:[#allocation37_spill] sm:$0xff] %v11579_v12 }
 0x321   : > { %v11581_v5 = vpop.f32.mrf.mxu1  ;;  %v11583_v40 = vpop.f32.mrf.mxu0 }
 0x322   : > { %11909 = vst [vmem:[#allocation29_spill] sm:$0xff] %v11581_v5  ;;  %11910 = vst [vmem:[#allocation30_spill] sm:$0xff] %v11583_v40 }
 0x323   : > { %v8711_v0 = vpop.f32.mrf.mxu0 }
 0x325   : > { %v8615_v1 = vpop.f32.mrf.mxu1  ;;  %v6763_v51 = vpop.f32.mrf.mxu0 }
 0x327   : > { %v5796_v59 = vpop.f32.mrf.mxu1  ;;  %v8712_v29 = vpop.f32.mrf.mxu0 }
 0x329   : > { %v8616_v21 = vpop.f32.mrf.mxu1  ;;  %v11585_v44 = vpop.f32.mrf.mxu0 }
 0x32b   : > { %v5799_v6 = vpop.f32.mrf.mxu1  ;;  %v11591_v5 = vpop.f32.mrf.mxu0 }
 0x32c   : > { %11913 = vst [vmem:[#allocation36_spill] sm:$0xff] %v11591_v5  ;;  %v5136_v5 = vadd.f32 %v5075_v26, %v11491_v25  ;;  %v5567_v26 = vadd.f32 %v11481_v37, %v5141_v2  ;;  %v5143_v37 = vadd.f32 %v11559_v22, %v11513_v52  ;;  %v5566_v52 = vadd.f32 %v11493_v7, %v5140_v9  ;;  %v11918_v2 = vld [vmem:[#allocation13_spill] sm:$0xff] }
 0x32d   : > { %v8619_v35 = vpop.f32.mrf.mxu1  ;;  %v11599_v53 = vpop.f32.mrf.mxu0 }
 0x32e   : > { %v5865_v30 = vadd.f32 %v8619_v35, %v5567_v26 }
 0x32f   : > { %v5812_v27 = vpop.f32.mrf.mxu1  ;;  %v11609_v60 = vpop.f32.mrf.mxu0 }
 0x331   : > { %v8620_v62 = vpop.f32.mrf.mxu1 }
 0x333   : > { %v5815_v55 = vpop.f32.mrf.mxu1  ;;  %v11920_v26 = vld [vmem:[#allocation36_spill] sm:$0xff] }
 0x335   : > { %v11587_v58 = vpop.f32.mrf.mxu1 }
 0x336   : > { %11911 = vst [vmem:[#allocation32_spill] sm:$0xff] %v11587_v58  ;;  %v5563_v58 = vadd.f32 %v11471_v48, %v5137_v24  ;;  %v5562_v24 = vadd.f32 %v11477_v10, %v5136_v5 }
 0x337   : > { %v11589_v12 = vpop.f32.mrf.mxu1 }
 0x338   : > { %11912 = vst [vmem:[#allocation34_spill] sm:$0xff] %v11589_v12  ;;  %v5861_v12 = vadd.f32 %v8615_v1, %v5563_v58  ;;  %v11620_v1 = vpop.f32.mrf.mxu0 }
 0x339   : > { %v11593_v40 = vpop.f32.mrf.mxu1 }
 0x33a   : > { %11914 = vst [vmem:[#allocation38_spill] sm:$0xff] %v11593_v40  ;;  %v5561_v40 = vadd.f32 %v11473_v28, %v5135_v19  ;;  %v6104_v25 = vadd.f32 %v11536_v38, %v5861_v12  ;;  %v5860_v19 = vadd.f32 %v5799_v6, %v5562_v24 }
 0x33b   : > { %v11596_v39 = vpop.f32.mrf.mxu1 }
 0x33c   : > { %v5859_v17 = vadd.f32 %v5796_v59, %v5561_v40  ;;  %v6108_v59 = vadd.f32 %v11547_v42, %v5865_v30  ;;  %v5144_v42 = vadd.f32 %v11567_v56, %v11519_v57  ;;  %v11923_v30 = vld [vmem:[#allocation16_spill] sm:$0xff] }
 0x33d   : > { %v11601_v34 = vpop.f32.mrf.mxu1  ;;  %v11917_v40 = vld [vmem:[#allocation32_spill] sm:$0xff] }
 0x33e   : > { %11915 = vst [vmem:[#allocation39_spill] sm:$0xff] %v11601_v34  ;;  %v5564_v34 = vadd.f32 %v11475_v41, %v5138_v43  ;;  %v6102_v18 = vadd.f32 %v11541_v8, %v5859_v17  ;;  %v5142_v41 = vadd.f32 %v8556_v31, %v11501_v11  ;;  %v5145_v43 = vadd.f32 %v8559_v45, %v11509_v3  ;;  %v11631_v8 = vpop.f32.mrf.mxu0  ;;  %v11636_v11 = vld [vmem:[%s11786_s4] ss:$0 sm:$0xff] }
 0x33f   : > { %v11605_v47 = vpop.f32.mrf.mxu1  ;;  %v6103_v31 = vadd.f32 %v11545_v4, %v5860_v19  ;;  %v5864_v4 = vadd.f32 %v5815_v55, %v5566_v52  ;;  %v11916_v55 = vld [vmem:[#allocation27_spill] sm:$0xff]  ;;  %v11919_v19 = vld [vmem:[#allocation34_spill] sm:$0xff] }
 0x340   : > { %v5862_v48 = vadd.f32 %v8616_v21, %v5564_v34  ;;  %v5863_v21 = vadd.f32 %v5812_v27, %v5565_v54  ;;  %v5571_v27 = vadd.f32 %v11499_v50, %v5145_v43  ;;  %v11647_v12 = vpop.f32.mrf.mxu0 }
 0x341   : > { %v11611_v20 = vpop.f32.mrf.mxu1 }
 0x342   : > { %v6105_v6 = vadd.f32 %v11543_v15, %v5862_v48  ;;  %v5568_v15 = vadd.f32 %v11489_v13, %v5142_v41  ;;  %v11922_v41 = vld [vmem:[#allocation22_spill] sm:$0xff] }
 0x343   : > { %v11616_v46 = vpop.f32.mrf.mxu1 }
 0x345   : > { %v8679_v28 = vpop.f32.mrf.mxu1 }
 0x346   : > { %v6530_v58 = vadd.f32 %v8679_v28, %v6104_v25  ;;  %v8720_v28 = vpop.f32.mrf.mxu0 }
 0x347   : > { %v6465_v10 = vpop.f32.mrf.mxu1 }
 0x348   : > { %v6828_v38 = vadd.f32 %v8711_v0, %v6530_v58  ;;  %v6528_v34 = vadd.f32 %v6465_v10, %v6102_v18  ;;  %v5146_v0 = vadd.f32 %v11563_v36, %v11515_v23  ;;  %v5569_v23 = vadd.f32 %v11503_v63, %v5143_v37  ;;  %v11921_v18 = vld [vmem:[#allocation20_spill] sm:$0xff] }
 0x349   : > { %v8680_v32 = vpop.f32.mrf.mxu1  ;;  %v6106_v36 = vadd.f32 %v11549_v33, %v5863_v21  ;;  %v5869_v63 = vadd.f32 %v11917_v40, %v5571_v27  ;;  %v11926_v21 = vld [vmem:[#allocation12_spill] sm:$0xff]  ;;  %v11928_v27 = vld [vmem:[#allocation21_spill] sm:$0xff] }
 0x34a   : > { %v6826_v61 = vadd.f32 %v6763_v51, %v6528_v34  ;;  %v6531_v3 = vadd.f32 %v8680_v32, %v6105_v6  ;;  %v6851_v45 = vadd.f32 %v11636_v11, %v6828_v38  ;;  %v5866_v51 = vadd.f32 %v8620_v62, %v5568_v15  ;;  %v11924_v38 = vld [vmem:[#allocation33_spill] sm:$0xff]  ;;  %v11925_v6 = vld [vmem:[#allocation38_spill] sm:$0xff] }
 0x34b   : > { %v6468_v14 = vpop.f32.mrf.mxu1  ;;  %v5149_v62 = vadd.f32 %v11916_v55, %v11524_v49  ;;  %v5572_v17 = vadd.f32 %v11918_v2, %v5146_v0  ;;  %v6107_v49 = vadd.f32 %v11922_v41, %v5864_v4  ;;  %v5147_v34 = vadd.f32 %v11924_v38, %v11923_v30  ;;  %v6798_v4 = vpop.f32.mrf.mxu0 }
 0x34c   : > { %v6829_v35 = vadd.f32 %v8712_v29, %v6531_v3  ;;  %v6529_v22 = vadd.f32 %v6468_v14, %v6103_v31  ;;  %v6849_v7 = vadd.f32 %v11636_v11, %v6826_v61  ;;  %v6867_v16 = vmax.f32 %v6851_v45, 0.0  ;;  %v11927_v31 = vld [vmem:[#allocation14_spill] sm:$0xff]  ;;  %v11930_v45 = vld [vmem:[#allocation35_spill] sm:$0xff] }
 0x34d   : > { %v8683_v13 = vpop.f32.mrf.mxu1  ;;  %v6109_v57 = vadd.f32 %v11921_v18, %v5866_v51  ;;  %v5870_v37 = vadd.f32 %v11925_v6, %v5572_v17  ;;  %v5570_v32 = vadd.f32 %v11926_v21, %v5144_v42  ;;  %v5575_v0 = vadd.f32 %v11927_v31, %v5149_v62  ;;  %v11929_v14 = vld [vmem:[#allocation18_spill] sm:$0xff]  ;;  %v11934_v62 = vld [vmem:[#allocation24_spill] sm:$0xff]  ;;  %v11940_v21 = vld [vmem:[#allocation25_spill] sm:$0xff] }
 0x34e   : > { %v6852_v50 = vadd.f32 %v11636_v11, %v6829_v35  ;;  %v6827_v29 = vadd.f32 %v11585_v44, %v6529_v22  ;;  %v6534_v5 = vadd.f32 %v8683_v13, %v6108_v59  ;;  %v5867_v44 = vadd.f32 %v11919_v19, %v5569_v23  ;;  %v11931_v22 = vld [vmem:[#allocation19_spill] sm:$0xff]  ;;  %v11932_v59 = vld [vmem:[#allocation29_spill] sm:$0xff]  ;;  %v11935_v17 = vld [vmem:[#allocation28_spill] sm:$0xff] }
 0x34f   : > { %v6481_v33 = vpop.f32.mrf.mxu1  ;;  %v6865_v9 = vmax.f32 %v6849_v7, 0.0  ;;  %v5150_v35 = vadd.f32 %v11930_v45, %v11929_v14  ;;  %v5148_v51 = vadd.f32 %v11932_v59, %v11931_v22  ;;  %v5868_v55 = vadd.f32 %v11596_v39, %v5570_v32  ;;  %v11937_v19 = vld [vmem:[#allocation15_spill] sm:$0xff] }
 0x350   : > { %v6868_v48 = vmax.f32 %v6852_v50, 0.0  ;;  %v6850_v24 = vadd.f32 %v11636_v11, %v6827_v29  ;;  %v6532_v25 = vadd.f32 %v6481_v33, %v6106_v36  ;;  %v6832_v58 = vadd.f32 %v11920_v26, %v6534_v5  ;;  %v11933_v5 = vld [vmem:[#allocation26_spill] sm:$0xff] }
 0x351   : > { %v8684_v56 = vpop.f32.mrf.mxu1  ;;  %v6110_v42 = vadd.f32 %v11933_v5, %v5867_v44  ;;  %v5573_v40 = vadd.f32 %v11934_v62, %v5147_v34  ;;  %v6113_v33 = vadd.f32 %v11935_v17, %v5870_v37  ;;  %v5576_v26 = vadd.f32 %v11937_v19, %v5150_v35  ;;  %v11938_v44 = vld [vmem:[#allocation17_spill] sm:$0xff] }
 0x352   : > { %v7768_v43 = vpack.c.bf16 %v6868_v48, %v6867_v16  ;;  %v6866_v54 = vmax.f32 %v6850_v24, 0.0  ;;  %v6830_v10 = vadd.f32 %v11599_v53, %v6532_v25  ;;  %v6535_v61 = vadd.f32 %v8684_v56, %v6109_v57  ;;  %v11936_v16 = vld [vmem:[#allocation39_spill] sm:$0xff] }
 0x353   : > { %v6484_v3 = vpop.f32.mrf.mxu1  ;;  %v6112_v53 = vadd.f32 %v11928_v27, %v5869_v63  ;;  %v6855_v23 = vadd.f32 %v11636_v11, %v6832_v58  ;;  %v5574_v58 = vadd.f32 %v11938_v44, %v5148_v51  ;;  %v5871_v56 = vadd.f32 %v11605_v47, %v5573_v40 }
 0x354   : > { %7800 = vst [vmem:[%s11673_s14 + $0x8] sm:$0xff] %v7768_v43   ;;  %v7763_v15 = vpack.c.bf16 %v6866_v54, %v6865_v9  ;;  %v6533_v52 = vadd.f32 %v6484_v3, %v6107_v49  ;;  %v6833_v13 = vadd.f32 %v11609_v60, %v6535_v61  ;;  %v6853_v7 = vadd.f32 %v11636_v11, %v6830_v10  ;;  %v11939_v10 = vld [vmem:[#allocation23_spill] sm:$0xff] }
 0x355   : > { %v8687_v36 = vpop.f32.mrf.mxu1  ;;  %v5873_v60 = vadd.f32 %v11936_v16, %v5575_v0  ;;  %v6871_v39 = vmax.f32 %v6855_v23, 0.0  ;;  %v5874_v43 = vadd.f32 %v11611_v20, %v5576_v26  ;;  %v6111_v30 = vadd.f32 %v11939_v10, %v5868_v55 }
 0x356   : > { %7764 = vst [vmem:[%s11673_s14] sm:$0xff] %v7763_v15   ;;  %v6831_v50 = vadd.f32 %v11620_v1, %v6533_v52  ;;  %v6538_v29 = vadd.f32 %v8687_v36, %v6112_v53  ;;  %v6856_v63 = vadd.f32 %v11636_v11, %v6833_v13  ;;  %v8723_v1 = vpop.f32.mrf.mxu0  ;;  %v6869_v41 = vmax.f32 %v6853_v7, 0.0  ;;  %v11942_v53 = vld [vmem:[#allocation37_spill] sm:$0xff] }
 0x357   : > { %v6497_v2 = vpop.f32.mrf.mxu1  ;;  %v6116_v32 = vadd.f32 %v11940_v21, %v5873_v60  ;;  %v5872_v31 = vadd.f32 %v11616_v46, %v5574_v58  ;;  %v6117_v14 = vadd.f32 %v11942_v53, %v5874_v43 }
 0x358   : > { %v6854_v48 = vadd.f32 %v11636_v11, %v6831_v50  ;;  %v6836_v24 = vadd.f32 %v11631_v8, %v6538_v29  ;;  %v6536_v25 = vadd.f32 %v6497_v2, %v6110_v42  ;;  %v6872_v18 = vmax.f32 %v6856_v63, 0.0  ;;  %v6811_v61 = vpop.f32.mrf.mxu0  ;;  %v11943_v50 = vld [vmem:[#allocation30_spill] sm:$0xff] }
 0x359   : > { %v8688_v57 = vpop.f32.mrf.mxu1  ;;  %v6115_v29 = vadd.f32 %v11943_v50, %v5872_v31 }
 0x35a   : > { %v6870_v49 = vmax.f32 %v6854_v48, 0.0  ;;  %v6539_v9 = vadd.f32 %v8688_v57, %v6113_v33  ;;  %v7778_v54 = vpack.c.bf16 %v6872_v18, %v6871_v39  ;;  %v6834_v8 = vadd.f32 %v11647_v12, %v6536_v25  ;;  %v11941_v12 = vld [vmem:[#allocation31_spill] sm:$0xff]  ;;  %v8724_v46 = vpop.f32.mrf.mxu0 }
 0x35b   : > { %v6500_v38 = vpop.f32.mrf.mxu1  ;;  %v6859_v6 = vadd.f32 %v11636_v11, %v6836_v24  ;;  %v6114_v15 = vadd.f32 %v11941_v12, %v5871_v56 }
 0x35c   : > { %v7773_v34 = vpack.c.bf16 %v6870_v49, %v6869_v41  ;;  %v6837_v37 = vadd.f32 %v8720_v28, %v6539_v9  ;;  %7802 = vst [vmem:[%s11673_s14 + $0x18] sm:$0xff] %v7778_v54   ;;  %v6537_v47 = vadd.f32 %v6500_v38, %v6111_v30  ;;  %v6857_v52 = vadd.f32 %v11636_v11, %v6834_v8  ;;  %v6814_v63 = vpop.f32.mrf.mxu0 }
 0x35d   : > { %v8691_v3 = vpop.f32.mrf.mxu1  ;;  %v6875_v45 = vmax.f32 %v6859_v6, 0.0 }
 0x35e   : > { %7801 = vst [vmem:[%s11673_s14 + $0x10] sm:$0xff] %v7773_v34   ;;  %v6860_v20 = vadd.f32 %v11636_v11, %v6837_v37  ;;  %v6542_v0 = vadd.f32 %v8691_v3, %v6116_v32  ;;  %v6835_v27 = vadd.f32 %v6798_v4, %v6537_v47  ;;  %v6873_v4 = vmax.f32 %v6857_v52, 0.0 }
 0x35f   : > { %v6513_v28 = vpop.f32.mrf.mxu1 }
 0x360   : > { %v6876_v35 = vmax.f32 %v6860_v20, 0.0  ;;  %v6840_v22 = vadd.f32 %v8723_v1, %v6542_v0  ;;  %v6540_v59 = vadd.f32 %v6513_v28, %v6114_v15  ;;  %v6858_v51 = vadd.f32 %v11636_v11, %v6835_v27 }
 0x361   : > { %v8692_v23 = vpop.f32.mrf.mxu1 }
 0x362   : > { %v7788_v13 = vpack.c.bf16 %v6876_v35, %v6875_v45  ;;  %v6838_v36 = vadd.f32 %v6811_v61, %v6540_v59  ;;  %v6543_v7 = vadd.f32 %v8692_v23, %v6117_v14  ;;  %v6874_v5 = vmax.f32 %v6858_v51, 0.0 }
 0x363   : > { %v6516_v42 = vpop.f32.mrf.mxu1  ;;  %v6863_v55 = vadd.f32 %v11636_v11, %v6840_v22 }
 0x364   : > { %7804 = vst [vmem:[%s11673_s14 + $0x28] sm:$0xff] %v7788_v13   ;;  %v6841_v62 = vadd.f32 %v8724_v46, %v6543_v7  ;;  %v6541_v40 = vadd.f32 %v6516_v42, %v6115_v29  ;;  %v7783_v2 = vpack.c.bf16 %v6874_v5, %v6873_v4  ;;  %v6861_v17 = vadd.f32 %v11636_v11, %v6838_v36 }
 0x365   : > { %v6879_v60 = vmax.f32 %v6863_v55, 0.0 }
 0x366   : > { %v6864_v33 = vadd.f32 %v11636_v11, %v6841_v62  ;;  %v6839_v16 = vadd.f32 %v6814_v63, %v6541_v40  ;;  %7803 = vst [vmem:[%s11673_s14 + $0x20] sm:$0xff] %v7783_v2   ;;  %v6877_v25 = vmax.f32 %v6861_v17, 0.0 }
 0x368   : > { %v6880_v48 = vmax.f32 %v6864_v33, 0.0  ;;  %v6862_v24 = vadd.f32 %v11636_v11, %v6839_v16 }
 0x36a   : > { %v7798_v1 = vpack.c.bf16 %v6880_v48, %v6879_v60  ;;  %v6878_v19 = vmax.f32 %v6862_v24, 0.0 }
 0x36c   : > { %7806 = vst [vmem:[%s11673_s14 + $0x38] sm:$0xff] %v7798_v1   ;;  %v7793_v26 = vpack.c.bf16 %v6878_v19, %v6877_v25 }
 0x36e   : > { %7805 = vst [vmem:[%s11673_s14 + $0x30] sm:$0xff] %v7793_v26  }
 0x36f   : > { %9050 = shalt.err (!%p9047_p5)
}
 0x370   : > { %s9051_s6 = scalar_lea.hbm %s11723_s15, 1024  ;;  %s9055_s30 = scalar_lea.hbm %s11787_s5, 4096 }
 0x371   : > { %p9052_p6 = scmp.ne.s32.totalorder %s11723_s15, %s9051_s6  ;;  %p9056_p11 = scmp.lt.s32.totalorder %s11723_s15, %s11787_s5 }
 0x372   : > { %p9057_p13 = scmp.lt.s32.totalorder %s9055_s30, %s9051_s6 }
 0x373   : > { %p9053_p7 = pnand %p9052_p6, %p9223_p3 }
 0x374   : > { %p9058_p10 = por %p9057_p13, %p9056_p11 }
 0x375   : > { %p9054_p9 = pneg %p9053_p7 }
 0x377   : > { %p9059_p12 = pnand %p9058_p10, %p9054_p9 }
 0x379   : > { %9062 = shalt.err (!%p9059_p12)
}
 0x37a   : > { %s9139_s11 = smov 64   ;;  %s9140_s26 = smov 4  }
 0x37b   : > { %8730 = dma.vmem_to_hbm [thread:$0]  (%p9223_p3), %s11725_s22, 1024, %s11723_s15, %s11731_s12, %s9139_s11, %s9139_s11, %s9140_s26  }
 0x37c PF: > { %p8742_p0 = scmp.ge.s32.totalorder %s9133_s25, 2  ;;  %s6993_s27 = sand.u32 1, %s9105_s18  }
 0x37d   : > { %s6994_s9 = scalar_lea.sflag [#allocation5], %s6993_s27 }
 0x37e   : > { %p8737_p1 = pnand %p8742_p0, %p9232_p8 }
 0x380   : > { %p8738_p2 = pneg %p8737_p1 }
 0x382   : > { %9100 = dma.done.wait (%p8738_p2), %s6994_s9, 1024  }
 0x383   : > { %9102 = vsyncadd (%p8738_p2), %s6994_s9, 4294966272  ;;  %s19_s25 = sadd.s32 1, %s9133_s25   ;;  %s11944_s18 = smov %s9109_s19 }
 0x384   : > { %p16_p4 = scmp.ge.s32.totalorder %s19_s25, 6   ;;  %s11945_s19 = smov %s9113_s20 }
 0x385   : > { %s11946_s20 = smov %s9250_s13  ;;  %s11947_s21 = smov %s9125_s23 }
 0x386   : > { %s11948_s22 = smov %s9129_s24  ;;  %s11949_s23 = smov %s11952_s28 }
 0x387   : > { %s11950_s24 = smov %s11956_s29  ;;  %18 = sbr.rel (!%p16_p4) target bundleno = 6 (0x6), region = 100 }
 0x38c   :  { %6999 = vsyncpa [#allocation4], 1 }
 0x38d   :  { %7001 = vsyncpa [#allocation4 + $0x1], 1 }
 0x38e   :  { %7002 = vsyncpa [#allocation5], 1 }
 0x38f   :  { %7004 = vsyncpa [#allocation5 + $0x1], 1 }

</bundles_post_ra>
